<compile_context>
chip_gen: v7x
topology: tpu7x:2x2x1
jax: 0.10.0
libtpu: 0.0.40
codegen_flags: <defaults>
</compile_context>

<pallas_src>
import functools

import jax
import jax.numpy as jnp
from jax.experimental import pallas as pl
from jax.experimental.pallas import tpu as pltpu


def _round_up(n, m):
    return ((n + m - 1) // m) * m


def _pad2(a, rows, cols):
    r, c = a.shape
    if r == rows and c == cols:
        return a
    return jnp.pad(a, ((0, rows - r), (0, cols - c)))


def _vae_kernel(x_ref, eps_ref,
                w1_ref, b1_ref,
                wml_ref, bml_ref,
                w3_ref, b3_ref,
                w4_ref, b4_ref,
                xrec_ref, ml_ref):
    """One batch tile of the VAE forward: encode -> reparameterize -> decode."""
    lp = eps_ref.shape[-1]          # padded latent dim (multiple of 128)

    x = x_ref[...]

    # encode: h = relu(x @ W1 + b1)
    h = jnp.dot(x, w1_ref[...], preferred_element_type=jnp.float32) + b1_ref[...]
    h = jnp.maximum(h, 0.0)

    # fused head: [mu || logvar] = h @ [Wmu || Wlv] + [bmu || blv]
    ml = jnp.dot(h, wml_ref[...], preferred_element_type=jnp.float32) + bml_ref[...]
    mu = ml[:, :lp]
    logvar = ml[:, lp:]

    # reparameterize: z = mu + eps * exp(0.5 * logvar)
    z = mu + eps_ref[...] * jnp.exp(0.5 * logvar)

    # decode: x_recon = sigmoid(relu(z @ W3 + b3) @ W4 + b4)
    h2 = jnp.dot(z, w3_ref[...], preferred_element_type=jnp.float32) + b3_ref[...]
    h2 = jnp.maximum(h2, 0.0)
    logits = jnp.dot(h2, w4_ref[...], preferred_element_type=jnp.float32) + b4_ref[...]

    xrec_ref[...] = jax.nn.sigmoid(logits)
    ml_ref[...] = ml


def prepare_params(params):
    """One-time weight prep: pad to lane-dense (multiples of 128) shapes and fuse
    the mu/logvar head.  Do NOT call this per forward pass."""
    D, H = params["w1"].shape
    L = params["wmu"].shape[1]
    Dp, Hp, Lp = _round_up(D, 128), _round_up(H, 128), _round_up(L, 128)

    wml = jnp.concatenate(
        [_pad2(params["wmu"], Hp, Lp), _pad2(params["wlv"], Hp, Lp)], axis=1)
    bml = jnp.concatenate(
        [_pad2(params["bmu"], 1, Lp), _pad2(params["blv"], 1, Lp)], axis=1)

    return dict(
        w1=_pad2(params["w1"], Dp, Hp), b1=_pad2(params["b1"], 1, Hp),
        wml=wml, bml=bml,
        w3=_pad2(params["w3"], Lp, Hp), b3=_pad2(params["b3"], 1, Hp),
        w4=_pad2(params["w4"], Hp, Dp), b4=_pad2(params["b4"], 1, Dp),
    )


@functools.partial(jax.jit, static_argnames=("block_b",))
def vae_forward(x, eps, prepared, *, block_b=128):
    """Run the Pallas VAE kernel.

    x:        (B, input_dim) float32
    eps:      (B, latent_dim) float32 standard-normal noise (the randn_like of the
              PyTorch reparameterize, generated deterministically in the wrapper).
    prepared: output of prepare_params() -- padded, (in, out)-layout weights.
    """
    B, D = x.shape
    L = eps.shape[1]
    Dp, Hp = prepared["w1"].shape
    Lp = prepared["w3"].shape[0]

    # Batch tile: multiple of 8, capped at block_b (default 128 MXU rows).
    TB = min(block_b, _round_up(B, 8))
    nb = pl.cdiv(B, TB)
    Bp = nb * TB

    # Per-call activation padding only (weights already prepared once).
    xp = _pad2(x, Bp, Dp)
    epsp = _pad2(eps, Bp, Lp)

    # Batch-blocked activations / outputs; weights resident, single-buffered.
    batch_spec = lambda cols: pl.BlockSpec((TB, cols), lambda i: (i, 0))
    const_spec = lambda arr: pl.BlockSpec(
        arr.shape, lambda i: (0, 0), pipeline_mode=pl.Buffered(1))

    in_specs = [
        batch_spec(Dp),            # x
        batch_spec(Lp),            # eps
        const_spec(prepared["w1"]), const_spec(prepared["b1"]),
        const_spec(prepared["wml"]), const_spec(prepared["bml"]),
        const_spec(prepared["w3"]), const_spec(prepared["b3"]),
        const_spec(prepared["w4"]), const_spec(prepared["b4"]),
    ]
    out_specs = (batch_spec(Dp), batch_spec(2 * Lp))
    out_shape = (jax.ShapeDtypeStruct((Bp, Dp), jnp.float32),
                 jax.ShapeDtypeStruct((Bp, 2 * Lp), jnp.float32))

    # Megacore split only when each TC gets >=128 batch rows; otherwise the two
    # cores would each DMA a full weight copy for a tiny-M matmul (v7x).
    dim_sem = ("parallel",) if TB >= 128 else ("arbitrary",)

    # Advisory cost estimate for the XLA scheduler.
    flops = 2 * Bp * (Dp * Hp + Hp * 2 * Lp + Lp * Hp + Hp * Dp)
    weight_bytes = sum(int(v.size) for v in prepared.values()) * 4
    act_bytes = 4 * Bp * (Dp + Lp + Dp + 2 * Lp)
    cost = pl.CostEstimate(flops=flops,
                           transcendentals=Bp * (Lp + Dp),
                           bytes_accessed=weight_bytes + act_bytes)

    xrec_p, ml_p = pl.pallas_call(
        _vae_kernel,
        grid=(nb,),
        in_specs=in_specs,
        out_specs=out_specs,
        out_shape=out_shape,
        compiler_params=pltpu.CompilerParams(
            dimension_semantics=dim_sem,
            vmem_limit_bytes=32 << 20,   # real footprint is ~10-15 MiB even at TB=256
        ),
        cost_estimate=cost,
    )(xp, epsp,
      prepared["w1"], prepared["b1"],
      prepared["wml"], prepared["bml"],
      prepared["w3"], prepared["b3"],
      prepared["w4"], prepared["b4"])

    # Strip padding (layout plumbing only).
    x_recon = xrec_p[:B, :D]
    mu = ml_p[:B, :L]
    logvar = ml_p[:B, Lp:Lp + L]
    return x_recon, mu, logvar


def init_params(key, input_dim, hidden_dim, latent_dim):
    """Deterministic parameter init (PyTorch-Linear-like scale), (in, out) layout."""
    def linear(k, fan_in, fan_out):
        kw, kb = jax.random.split(k)
        bound = 1.0 / jnp.sqrt(fan_in)
        w = jax.random.uniform(kw, (fan_in, fan_out), jnp.float32, -bound, bound)
        b = jax.random.uniform(kb, (1, fan_out), jnp.float32, -bound, bound)
        return w, b

    k1, k2, k3, k4, k5 = jax.random.split(key, 5)
    w1, b1 = linear(k1, input_dim, hidden_dim)
    wmu, bmu = linear(k2, hidden_dim, latent_dim)
    wlv, blv = linear(k3, hidden_dim, latent_dim)
    w3, b3 = linear(k4, latent_dim, hidden_dim)
    w4, b4 = linear(k5, hidden_dim, input_dim)
    return dict(w1=w1, b1=b1, wmu=wmu, bmu=bmu, wlv=wlv, blv=blv,
                w3=w3, b3=b3, w4=w4, b4=b4)


def vae_forward_ref(x, eps, p):
    """Pure-JAX reference matching the PyTorch forward semantics."""
    h = jax.nn.relu(x @ p["w1"] + p["b1"])
    mu = h @ p["wmu"] + p["bmu"]
    logvar = h @ p["wlv"] + p["blv"]
    z = mu + eps * jnp.exp(0.5 * logvar)
    h2 = jax.nn.relu(z @ p["w3"] + p["b3"])
    x_recon = jax.nn.sigmoid(h2 @ p["w4"] + p["b4"])
    return x_recon, mu, logvar


if __name__ == "__main__":
    # Module-default feature dims (784 / 400 / 20) at a small batch.
    B, INPUT_DIM, HIDDEN_DIM, LATENT_DIM = 32, 784, 400, 20

    key = jax.random.PRNGKey(0)
    k_params, k_x, k_eps = jax.random.split(key, 3)

    params = init_params(k_params, INPUT_DIM, HIDDEN_DIM, LATENT_DIM)
    prepared = prepare_params(params)                               # one-time weight prep
    x = jax.random.uniform(k_x, (B, INPUT_DIM), jnp.float32)        # MNIST-like [0,1)
    eps = jax.random.normal(k_eps, (B, LATENT_DIM), jnp.float32)    # randn_like(std)

    x_recon, mu, logvar = vae_forward(x, eps, prepared)
    jax.block_until_ready((x_recon, mu, logvar))

    # Correctness check against pure-JAX reference.
    r_recon, r_mu, r_logvar = vae_forward_ref(x, eps, params)
    assert x_recon.shape == (B, INPUT_DIM)
    assert mu.shape == (B, LATENT_DIM) and logvar.shape == (B, LATENT_DIM)
    assert jnp.allclose(x_recon, r_recon, atol=1e-4, rtol=1e-4)
    assert jnp.allclose(mu, r_mu, atol=1e-4, rtol=1e-4)
    assert jnp.allclose(logvar, r_logvar, atol=1e-4, rtol=1e-4)

    print("KERNEL_OK")
</pallas_src>

<mosaic_0001>
module attributes {stable_mosaic.version = 11 : i64} {
  func.func @_vae_kernel(%arg0: i32, %arg1: memref<32x896xf32, #tpu.memory_space<vmem>>, %arg2: memref<32x128xf32, #tpu.memory_space<vmem>>, %arg3: memref<896x512xf32, #tpu.memory_space<vmem>>, %arg4: memref<1x512xf32, #tpu.memory_space<vmem>>, %arg5: memref<512x256xf32, #tpu.memory_space<vmem>>, %arg6: memref<1x256xf32, #tpu.memory_space<vmem>>, %arg7: memref<128x512xf32, #tpu.memory_space<vmem>>, %arg8: memref<1x512xf32, #tpu.memory_space<vmem>>, %arg9: memref<512x896xf32, #tpu.memory_space<vmem>>, %arg10: memref<1x896xf32, #tpu.memory_space<vmem>>, %arg11: memref<32x896xf32, #tpu.memory_space<vmem>>, %arg12: memref<32x256xf32, #tpu.memory_space<vmem>>) attributes {dimension_semantics = [#tpu.dimension_semantics<arbitrary>], iteration_bounds = array<i64: 1>, scalar_prefetch = 0 : i64, scratch_operands = 0 : i64, tpu.core_type = #tpu.core_type<tc>, window_params = [{transform_indices = @transform_0, window_bounds = array<i64: 32, 896>}, {transform_indices = @transform_1, window_bounds = array<i64: 32, 128>}, {pipeline_mode = #tpu.pipeline_mode<synchronous>, transform_indices = @transform_2, window_bounds = array<i64: 896, 512>}, {pipeline_mode = #tpu.pipeline_mode<synchronous>, transform_indices = @transform_3, window_bounds = array<i64: 1, 512>}, {pipeline_mode = #tpu.pipeline_mode<synchronous>, transform_indices = @transform_4, window_bounds = array<i64: 512, 256>}, {pipeline_mode = #tpu.pipeline_mode<synchronous>, transform_indices = @transform_5, window_bounds = array<i64: 1, 256>}, {pipeline_mode = #tpu.pipeline_mode<synchronous>, transform_indices = @transform_6, window_bounds = array<i64: 128, 512>}, {pipeline_mode = #tpu.pipeline_mode<synchronous>, transform_indices = @transform_7, window_bounds = array<i64: 1, 512>}, {pipeline_mode = #tpu.pipeline_mode<synchronous>, transform_indices = @transform_8, window_bounds = array<i64: 512, 896>}, {pipeline_mode = #tpu.pipeline_mode<synchronous>, transform_indices = @transform_9, window_bounds = array<i64: 1, 896>}, {transform_indices = @transform_10, window_bounds = array<i64: 32, 896>}, {transform_indices = @transform_11, window_bounds = array<i64: 32, 256>}]} {
    %c0 = arith.constant 0 : index
    %c0_0 = arith.constant 0 : index
    %0 = vector.load %arg1[%c0, %c0_0] : memref<32x896xf32, #tpu.memory_space<vmem>>, vector<32x896xf32>
    %c0_1 = arith.constant 0 : index
    %c0_2 = arith.constant 0 : index
    %1 = vector.load %arg3[%c0_1, %c0_2] : memref<896x512xf32, #tpu.memory_space<vmem>>, vector<896x512xf32>
    %cst = arith.constant dense<0.000000e+00> : vector<32x512xf32>
    %2 = tpu.matmul %0, %1, %cst {dimension_numbers = #tpu.dot_dimension_numbers<[1], [0], [0], [1], [0, 0, 1, 1], [], []>} : vector<32x896xf32>, vector<896x512xf32>, vector<32x512xf32> -> vector<32x512xf32>
    %c0_3 = arith.constant 0 : index
    %c0_4 = arith.constant 0 : index
    %3 = vector.load %arg4[%c0_3, %c0_4] : memref<1x512xf32, #tpu.memory_space<vmem>>, vector<1x512xf32>
    %4 = vector.broadcast %3 : vector<1x512xf32> to vector<32x512xf32>
    %5 = arith.addf %2, %4 : vector<32x512xf32>
    %cst_5 = arith.constant 0.000000e+00 : f32
    %6 = vector.broadcast %cst_5 : f32 to vector<32x512xf32>
    %7 = arith.maximumf %5, %6 : vector<32x512xf32>
    %c0_6 = arith.constant 0 : index
    %c0_7 = arith.constant 0 : index
    %8 = vector.load %arg5[%c0_6, %c0_7] : memref<512x256xf32, #tpu.memory_space<vmem>>, vector<512x256xf32>
    %cst_8 = arith.constant dense<0.000000e+00> : vector<32x256xf32>
    %9 = tpu.matmul %7, %8, %cst_8 {dimension_numbers = #tpu.dot_dimension_numbers<[1], [0], [0], [1], [0, 0, 1, 1], [], []>} : vector<32x512xf32>, vector<512x256xf32>, vector<32x256xf32> -> vector<32x256xf32>
    %c0_9 = arith.constant 0 : index
    %c0_10 = arith.constant 0 : index
    %10 = vector.load %arg6[%c0_9, %c0_10] : memref<1x256xf32, #tpu.memory_space<vmem>>, vector<1x256xf32>
    %11 = vector.broadcast %10 : vector<1x256xf32> to vector<32x256xf32>
    %12 = arith.addf %9, %11 : vector<32x256xf32>
    %13 = vector.extract_strided_slice %12 {offsets = [0, 0], sizes = [32, 128], strides = [1, 1]} : vector<32x256xf32> to vector<32x128xf32>
    %14 = vector.extract_strided_slice %12 {offsets = [0, 128], sizes = [32, 128], strides = [1, 1]} : vector<32x256xf32> to vector<32x128xf32>
    %c0_11 = arith.constant 0 : index
    %c0_12 = arith.constant 0 : index
    %15 = vector.load %arg2[%c0_11, %c0_12] : memref<32x128xf32, #tpu.memory_space<vmem>>, vector<32x128xf32>
    %cst_13 = arith.constant 5.000000e-01 : f32
    %16 = vector.broadcast %cst_13 : f32 to vector<32x128xf32>
    %17 = arith.mulf %16, %14 : vector<32x128xf32>
    %18 = math.exp %17 : vector<32x128xf32>
    %19 = arith.mulf %15, %18 : vector<32x128xf32>
    %20 = arith.addf %13, %19 : vector<32x128xf32>
    %c0_14 = arith.constant 0 : index
    %c0_15 = arith.constant 0 : index
    %21 = vector.load %arg7[%c0_14, %c0_15] : memref<128x512xf32, #tpu.memory_space<vmem>>, vector<128x512xf32>
    %cst_16 = arith.constant dense<0.000000e+00> : vector<32x512xf32>
    %22 = tpu.matmul %20, %21, %cst_16 {dimension_numbers = #tpu.dot_dimension_numbers<[1], [0], [0], [1], [0, 0, 1, 1], [], []>} : vector<32x128xf32>, vector<128x512xf32>, vector<32x512xf32> -> vector<32x512xf32>
    %c0_17 = arith.constant 0 : index
    %c0_18 = arith.constant 0 : index
    %23 = vector.load %arg8[%c0_17, %c0_18] : memref<1x512xf32, #tpu.memory_space<vmem>>, vector<1x512xf32>
    %24 = vector.broadcast %23 : vector<1x512xf32> to vector<32x512xf32>
    %25 = arith.addf %22, %24 : vector<32x512xf32>
    %cst_19 = arith.constant 0.000000e+00 : f32
    %26 = vector.broadcast %cst_19 : f32 to vector<32x512xf32>
    %27 = arith.maximumf %25, %26 : vector<32x512xf32>
    %c0_20 = arith.constant 0 : index
    %c0_21 = arith.constant 0 : index
    %28 = vector.load %arg9[%c0_20, %c0_21] : memref<512x896xf32, #tpu.memory_space<vmem>>, vector<512x896xf32>
    %cst_22 = arith.constant dense<0.000000e+00> : vector<32x896xf32>
    %29 = tpu.matmul %27, %28, %cst_22 {dimension_numbers = #tpu.dot_dimension_numbers<[1], [0], [0], [1], [0, 0, 1, 1], [], []>} : vector<32x512xf32>, vector<512x896xf32>, vector<32x896xf32> -> vector<32x896xf32>
    %c0_23 = arith.constant 0 : index
    %c0_24 = arith.constant 0 : index
    %30 = vector.load %arg10[%c0_23, %c0_24] : memref<1x896xf32, #tpu.memory_space<vmem>>, vector<1x896xf32>
    %31 = vector.broadcast %30 : vector<1x896xf32> to vector<32x896xf32>
    %32 = arith.addf %29, %31 : vector<32x896xf32>
    %33 = arith.negf %32 : vector<32x896xf32>
    %34 = math.exp %33 : vector<32x896xf32>
    %cst_25 = arith.constant 1.000000e+00 : f32
    %35 = vector.broadcast %cst_25 : f32 to vector<32x896xf32>
    %36 = arith.addf %35, %34 : vector<32x896xf32>
    %37 = arith.divf %35, %36 : vector<32x896xf32>
    %c0_26 = arith.constant 0 : index
    %c0_27 = arith.constant 0 : index
    %38 = vector.load %arg11[%c0_26, %c0_27] : memref<32x896xf32, #tpu.memory_space<vmem>>, vector<32x896xf32>
    tpu.vector_store %arg11[%c0_26, %c0_27], %37 {strides = array<i32>} : memref<32x896xf32, #tpu.memory_space<vmem>>, vector<32x896xf32>,
    %c0_28 = arith.constant 0 : index
    %c0_29 = arith.constant 0 : index
    %39 = vector.load %arg12[%c0_28, %c0_29] : memref<32x256xf32, #tpu.memory_space<vmem>>, vector<32x256xf32>
    tpu.vector_store %arg12[%c0_28, %c0_29], %12 {strides = array<i32>} : memref<32x256xf32, #tpu.memory_space<vmem>>, vector<32x256xf32>,
    return
  }
  func.func @transform_0(%arg0: i32) -> (i32, i32) {
    %c0_i32 = arith.constant 0 : i32
    %c0_i32_0 = arith.constant 0 : i32
    return %arg0, %c0_i32 : i32, i32
  }
  func.func @transform_1(%arg0: i32) -> (i32, i32) {
    %c0_i32 = arith.constant 0 : i32
    %c0_i32_0 = arith.constant 0 : i32
    return %arg0, %c0_i32 : i32, i32
  }
  func.func @transform_2(%arg0: i32) -> (i32, i32) {
    %c0_i32 = arith.constant 0 : i32
    %c0_i32_0 = arith.constant 0 : i32
    %c0_i32_1 = arith.constant 0 : i32
    return %c0_i32, %c0_i32_0 : i32, i32
  }
  func.func @transform_3(%arg0: i32) -> (i32, i32) {
    %c0_i32 = arith.constant 0 : i32
    %c0_i32_0 = arith.constant 0 : i32
    %c0_i32_1 = arith.constant 0 : i32
    return %c0_i32, %c0_i32_0 : i32, i32
  }
  func.func @transform_4(%arg0: i32) -> (i32, i32) {
    %c0_i32 = arith.constant 0 : i32
    %c0_i32_0 = arith.constant 0 : i32
    %c0_i32_1 = arith.constant 0 : i32
    return %c0_i32, %c0_i32_0 : i32, i32
  }
  func.func @transform_5(%arg0: i32) -> (i32, i32) {
    %c0_i32 = arith.constant 0 : i32
    %c0_i32_0 = arith.constant 0 : i32
    %c0_i32_1 = arith.constant 0 : i32
    return %c0_i32, %c0_i32_0 : i32, i32
  }
  func.func @transform_6(%arg0: i32) -> (i32, i32) {
    %c0_i32 = arith.constant 0 : i32
    %c0_i32_0 = arith.constant 0 : i32
    %c0_i32_1 = arith.constant 0 : i32
    return %c0_i32, %c0_i32_0 : i32, i32
  }
  func.func @transform_7(%arg0: i32) -> (i32, i32) {
    %c0_i32 = arith.constant 0 : i32
    %c0_i32_0 = arith.constant 0 : i32
    %c0_i32_1 = arith.constant 0 : i32
    return %c0_i32, %c0_i32_0 : i32, i32
  }
  func.func @transform_8(%arg0: i32) -> (i32, i32) {
    %c0_i32 = arith.constant 0 : i32
    %c0_i32_0 = arith.constant 0 : i32
    %c0_i32_1 = arith.constant 0 : i32
    return %c0_i32, %c0_i32_0 : i32, i32
  }
  func.func @transform_9(%arg0: i32) -> (i32, i32) {
    %c0_i32 = arith.constant 0 : i32
    %c0_i32_0 = arith.constant 0 : i32
    %c0_i32_1 = arith.constant 0 : i32
    return %c0_i32, %c0_i32_0 : i32, i32
  }
  func.func @transform_10(%arg0: i32) -> (i32, i32) {
    %c0_i32 = arith.constant 0 : i32
    %c0_i32_0 = arith.constant 0 : i32
    return %arg0, %c0_i32 : i32, i32
  }
  func.func @transform_11(%arg0: i32) -> (i32, i32) {
    %c0_i32 = arith.constant 0 : i32
    %c0_i32_0 = arith.constant 0 : i32
    return %arg0, %c0_i32 : i32, i32
  }
}

</mosaic_0001>

<bundles_post_ra>
// kernel: vae_forward.1
= control target key start
LH: loop header
LB: loop body
LE: loop exit
PB: predicated region body
PF: predicated region fallthrough
CT: control target
= control target key end

     0   :  { %17 = vsyncpa [#allocation3], 0  ;;  %s5676_s0 = inlined_call_operand.vmem [shape: f32[32,896], index: 0, kind: input, shape index: {}]   ;;  %s5677_s1 = inlined_call_operand.vmem [shape: f32[32,128], index: 1, kind: input, shape index: {}]   ;;  %s5678_s2 = inlined_call_operand.hbm [shape: f32[896,512], index: 2, kind: input, shape index: {}]   ;;  %s5679_s3 = inlined_call_operand.hbm [shape: f32[1,512], index: 3, kind: input, shape index: {}]   ;;  %s5680_s4 = inlined_call_operand.hbm [shape: f32[512,256], index: 4, kind: input, shape index: {}]   ;;  %s5681_s5 = inlined_call_operand.hbm [shape: f32[1,256], index: 5, kind: input, shape index: {}]   ;;  %s5682_s6 = inlined_call_operand.hbm [shape: f32[128,512], index: 6, kind: input, shape index: {}]   ;;  %s5683_s7 = inlined_call_operand.hbm [shape: f32[1,512], index: 7, kind: input, shape index: {}]   ;;  %s5684_s8 = inlined_call_operand.hbm [shape: f32[512,896], index: 8, kind: input, shape index: {}]   ;;  %s5685_s9 = inlined_call_operand.hbm [shape: f32[1,896], index: 9, kind: input, shape index: {}]   ;;  %s5686_s10 = inlined_call_operand.hbm [shape: f32[32,896], index: 10, kind: output, shape index: {0}]   ;;  %s5687_s11 = inlined_call_operand.vmem [shape: f32[32,256], index: 11, kind: output, shape index: {1}]  }
   0x1   :  { %18 = vsyncpa [#allocation6], 0 }
   0x2   :  { %19 = vsyncpa [#allocation9], 0 }
   0x3   :  { %20 = vsyncpa [#allocation12], 0 }
   0x4   :  { %21 = vsyncpa [#allocation15], 0 }
   0x5   :  { %22 = vsyncpa [#allocation4], 0  ;;  %s5083_s17 = smov [#allocation5]   ;;  %s5084_s19 = smov [#allocation8]  }
   0x6   :  { %s45_s18 = sshll.u32 %s5083_s17, 4  ;;  %s67_s20 = sshll.u32 %s5084_s19, 4  ;;  %s46_s18 = int_to_ptr.vmem [resolvable:$true] %s45_s18  ;;  %s68_s20 = int_to_ptr.vmem [resolvable:$true] %s67_s20 }
   0x7   :  { %s4873_s23 = scalar_lea.hbm %s5679_s3, 64 }
   0x8   :  { %p4874_p0 = scmp.ne.s32.totalorder %s5679_s3, %s4873_s23  ;;  %p4877_p1 = scmp.lt.u32.totalorder %s4873_s23, %s5679_s3 }
   0xa   :  { %p4879_p2 = pnand %p4877_p1, %p4874_p0 }
   0xc   :  { %4882 = shalt.err (!%p4879_p2)
}
   0xd   :  { %s4883_s28 = scalar_lea.vmem %s46_s18, 64  ;;  %p4888_p4 = scmp.lt.s32.totalorder %s46_s18, %s46_s18 }
   0xe   :  { %p4884_p3 = scmp.ne.s32.totalorder %s46_s18, %s4883_s28  ;;  %p4889_p5 = scmp.lt.s32.totalorder %s4883_s28, %s4883_s28 }
  0x10   :  { %p4890_p6 = por %p4889_p5, %p4888_p4 }
  0x12   :  { %p4891_p7 = pnand %p4890_p6, %p4884_p3 }
  0x14   :  { %4894 = shalt.err (!%p4891_p7)
}
  0x15   :  { %48 = dma.hbm_to_vmem [thread:$0]  %s5679_s3, 64, %s46_s18, [#allocation6]  }
  0x16   :  { %s4895_s14 = scalar_lea.hbm %s5681_s5, 32 }
  0x17   :  { %p4896_p8 = scmp.ne.s32.totalorder %s5681_s5, %s4895_s14  ;;  %p4899_p9 = scmp.lt.u32.totalorder %s4895_s14, %s5681_s5 }
  0x19   :  { %p4901_p10 = pnand %p4899_p9, %p4896_p8 }
  0x1b   :  { %4904 = shalt.err (!%p4901_p10)
}
  0x1c   :  { %s4905_s21 = scalar_lea.vmem %s68_s20, 32  ;;  %p4910_p12 = scmp.lt.s32.totalorder %s68_s20, %s68_s20 }
  0x1d   :  { %p4906_p11 = scmp.ne.s32.totalorder %s68_s20, %s4905_s21  ;;  %p4911_p13 = scmp.lt.s32.totalorder %s4905_s21, %s4905_s21 }
  0x1f   :  { %p4912_p0 = por %p4911_p13, %p4910_p12 }
  0x21   :  { %p4913_p1 = pnand %p4912_p0, %p4906_p11 }
  0x23   :  { %4916 = shalt.err (!%p4913_p1)
}
  0x24   :  { %70 = dma.hbm_to_vmem [thread:$0]  %s5681_s5, 32, %s68_s20, [#allocation9]  }
  0x25   :  { %s5085_s22 = smov [#allocation11]   ;;  %s5086_s24 = smov [#allocation2]  }
  0x26   :  { %s89_s23 = sshll.u32 %s5085_s22, 4  ;;  %s32_s25 = sshll.u32 %s5086_s24, 4  ;;  %s90_s23 = int_to_ptr.vmem [resolvable:$true] %s89_s23  ;;  %s5183_s25 = int_to_ptr.vmem [resolvable:$true] %s32_s25 }
  0x27   :  { %s4917_s28 = scalar_lea.hbm %s5683_s7, 64 }
  0x28   :  { %p4918_p2 = scmp.ne.s32.totalorder %s5683_s7, %s4917_s28  ;;  %p4921_p3 = scmp.lt.u32.totalorder %s4917_s28, %s5683_s7 }
  0x2a   :  { %p4923_p4 = pnand %p4921_p3, %p4918_p2 }
  0x2c   :  { %4926 = shalt.err (!%p4923_p4)
}
  0x2d   :  { %s4927_s5 = scalar_lea.vmem %s90_s23, 64  ;;  %p4932_p6 = scmp.lt.s32.totalorder %s90_s23, %s90_s23 }
  0x2e   :  { %p4928_p5 = scmp.ne.s32.totalorder %s90_s23, %s4927_s5  ;;  %p4933_p7 = scmp.lt.s32.totalorder %s4927_s5, %s4927_s5 }
  0x30   :  { %p4934_p8 = por %p4933_p7, %p4932_p6 }
  0x32   :  { %p4935_p9 = pnand %p4934_p8, %p4928_p5 }
  0x34   :  { %4938 = shalt.err (!%p4935_p9)
}
  0x35   :  { %92 = dma.hbm_to_vmem [thread:$0]  %s5683_s7, 64, %s90_s23, [#allocation12]  }
  0x36   :  { %s4939_s17 = scalar_lea.hbm %s5678_s2, 57344 }
  0x37   :  { %p4940_p10 = scmp.ne.s32.totalorder %s5678_s2, %s4939_s17  ;;  %p4943_p11 = scmp.lt.u32.totalorder %s4939_s17, %s5678_s2 }
  0x39   :  { %p4945_p12 = pnand %p4943_p11, %p4940_p10 }
  0x3b   :  { %4948 = shalt.err (!%p4945_p12)
}
  0x3c   :  { %s4949_s22 = scalar_lea.vmem %s5183_s25, 57344  ;;  %p4954_p0 = scmp.lt.s32.totalorder %s5183_s25, %s5183_s25 }
  0x3d   :  { %p4950_p13 = scmp.ne.s32.totalorder %s5183_s25, %s4949_s22  ;;  %p4955_p1 = scmp.lt.s32.totalorder %s4949_s22, %s4949_s22 }
  0x3f   :  { %p4956_p2 = por %p4955_p1, %p4954_p0 }
  0x41   :  { %p4957_p3 = pnand %p4956_p2, %p4950_p13 }
  0x43   :  { %4960 = shalt.err (!%p4957_p3)
}
  0x44   :  { %s5087_s7 = smov 512   ;;  %s5088_s23 = smov 32  }
  0x45   :  { %38 = dma.hbm_to_vmem [thread:$0]  %s5678_s2, 57344, %s5183_s25, [#allocation3], %s5087_s7, %s5087_s7, %s5088_s23  }
  0x46   :  { %s5089_s27 = smov [#allocation7]   ;;  %s4961_s12 = scalar_lea.hbm %s5680_s4, 16384 }
  0x47   :  { %s54_s28 = sshll.u32 %s5089_s27, 4  ;;  %p4962_p4 = scmp.ne.s32.totalorder %s5680_s4, %s4961_s12  ;;  %s55_s28 = int_to_ptr.vmem [resolvable:$true] %s54_s28 }
  0x48   :  { %p4965_p5 = scmp.lt.u32.totalorder %s4961_s12, %s5680_s4 }
  0x4a   :  { %p4967_p6 = pnand %p4965_p5, %p4962_p4 }
  0x4c   :  { %4970 = shalt.err (!%p4967_p6)
}
  0x4d   :  { %s4971_s15 = scalar_lea.vmem %s55_s28, 16384  ;;  %p4976_p8 = scmp.lt.s32.totalorder %s55_s28, %s55_s28 }
  0x4e   :  { %p4972_p7 = scmp.ne.s32.totalorder %s55_s28, %s4971_s15  ;;  %p4977_p9 = scmp.lt.s32.totalorder %s4971_s15, %s4971_s15 }
  0x50   :  { %p4978_p10 = por %p4977_p9, %p4976_p8 }
  0x52   :  { %p4979_p11 = pnand %p4978_p10, %p4972_p7 }
  0x54   :  { %4982 = shalt.err (!%p4979_p11)
}
  0x55   :  { %s5090_s2 = smov 256   ;;  %s5091_s25 = smov 16  }
  0x56   :  { %60 = dma.hbm_to_vmem [thread:$0]  %s5680_s4, 16384, %s55_s28, [#allocation6], %s5090_s2, %s5090_s2, %s5091_s25  }
  0x57   :  { %s5092_s19 = smov [#allocation10]   ;;  %s5093_s3 = smov [#allocation13]  }
  0x58   :  { %s76_s21 = sshll.u32 %s5092_s19, 4  ;;  %s98_s18 = sshll.u32 %s5093_s3, 4  ;;  %s77_s21 = int_to_ptr.vmem [resolvable:$true] %s76_s21  ;;  %s99_s18 = int_to_ptr.vmem [resolvable:$true] %s98_s18 }
  0x59   :  { %s4983_s26 = scalar_lea.hbm %s5682_s6, 8192 }
  0x5a   :  { %p4984_p12 = scmp.ne.s32.totalorder %s5682_s6, %s4983_s26  ;;  %p4987_p13 = scmp.lt.u32.totalorder %s4983_s26, %s5682_s6 }
  0x5c   :  { %p4989_p0 = pnand %p4987_p13, %p4984_p12 }
  0x5e   :  { %4992 = shalt.err (!%p4989_p0)
}
  0x5f   :  { %s4993_s4 = scalar_lea.vmem %s77_s21, 8192  ;;  %p4998_p2 = scmp.lt.s32.totalorder %s77_s21, %s77_s21 }
  0x60   :  { %p4994_p1 = scmp.ne.s32.totalorder %s77_s21, %s4993_s4  ;;  %p4999_p3 = scmp.lt.s32.totalorder %s4993_s4, %s4993_s4 }
  0x62   :  { %p5000_p4 = por %p4999_p3, %p4998_p2 }
  0x64   :  { %p5001_p5 = pnand %p5000_p4, %p4994_p1 }
  0x66   :  { %5004 = shalt.err (!%p5001_p5)
}
  0x67   :  { %82 = dma.hbm_to_vmem [thread:$0]  %s5682_s6, 8192, %s77_s21, [#allocation9], %s5087_s7, %s5087_s7, %s5088_s23  }
  0x68   :  { %s5005_s14 = scalar_lea.hbm %s5684_s8, 57344 }
  0x69   :  { %p5006_p6 = scmp.ne.s32.totalorder %s5684_s8, %s5005_s14  ;;  %p5009_p7 = scmp.lt.u32.totalorder %s5005_s14, %s5684_s8 }
  0x6b   :  { %p5011_p8 = pnand %p5009_p7, %p5006_p6 }
  0x6d   :  { %5014 = shalt.err (!%p5011_p8)
}
  0x6e   :  { %s5015_s17 = scalar_lea.vmem %s99_s18, 57344  ;;  %p5020_p10 = scmp.lt.s32.totalorder %s99_s18, %s99_s18 }
  0x6f   :  { %p5016_p9 = scmp.ne.s32.totalorder %s99_s18, %s5015_s17  ;;  %p5021_p11 = scmp.lt.s32.totalorder %s5015_s17, %s5015_s17 }
  0x71   :  { %p5022_p12 = por %p5021_p11, %p5020_p10 }
  0x73   :  { %p5023_p13 = pnand %p5022_p12, %p5016_p9 }
  0x75   :  { %5026 = shalt.err (!%p5023_p13)
}
  0x76   :  { %s5094_s6 = smov 896   ;;  %s5095_s7 = smov 56  }
  0x77   :  { %104 = dma.hbm_to_vmem [thread:$0]  %s5684_s8, 57344, %s99_s18, [#allocation12], %s5094_s6, %s5094_s6, %s5095_s7  }
  0x78   :  { %s5096_s21 = smov [#allocation14]   ;;  %s5027_s26 = scalar_lea.hbm %s5685_s9, 112 }
  0x79   :  { %s111_s3 = sshll.u32 %s5096_s21, 4  ;;  %p5028_p0 = scmp.ne.s32.totalorder %s5685_s9, %s5027_s26  ;;  %s112_s3 = int_to_ptr.vmem [resolvable:$true] %s111_s3 }
  0x7a   :  { %p5031_p1 = scmp.lt.u32.totalorder %s5027_s26, %s5685_s9 }
  0x7c   :  { %p5033_p2 = pnand %p5031_p1, %p5028_p0 }
  0x7e   :  { %5036 = shalt.err (!%p5033_p2)
}
  0x7f   :  { %s5037_s4 = scalar_lea.vmem %s112_s3, 112  ;;  %s5041_s8 = scalar_lea.vmem %s112_s3, 128 }
  0x80   :  { %p5038_p3 = scmp.ne.s32.totalorder %s112_s3, %s5037_s4  ;;  %p5042_p4 = scmp.lt.s32.totalorder %s112_s3, %s112_s3 }
  0x81   :  { %p5043_p5 = scmp.lt.s32.totalorder %s5041_s8, %s5037_s4 }
  0x83   :  { %p5044_p6 = por %p5043_p5, %p5042_p4 }
  0x85   :  { %p5045_p7 = pnand %p5044_p6, %p5038_p3 }
  0x87   :  { %5048 = shalt.err (!%p5045_p7)
}
  0x88   :  { %114 = dma.hbm_to_vmem [thread:$0]  %s5685_s9, 112, %s112_s3, [#allocation15]  }
  0x89   :  { %5071 = dma.done.wait [#allocation3], 57344  }
  0x8a   :  { %5072 = vsyncadd [#allocation3], 4294909952 }
  0x8b   :  { %5073 = dma.done.wait [#allocation6], 16448  }
  0x8c   :  { %5074 = vsyncadd [#allocation6], 4294950848 }
  0x8d   :  { %5075 = dma.done.wait [#allocation9], 8224  }
  0x8e   :  { %5076 = vsyncadd [#allocation9], 4294959072 }
  0x8f   :  { %5077 = dma.done.wait [#allocation12], 57408  }
  0x90   :  { %5078 = vsyncadd [#allocation12], 4294909888 }
  0x91   :  { %5079 = dma.done.wait [#allocation15], 112  }
  0x92   :  { %5080 = vsyncadd [#allocation15], 4294967184  ;;  %v168_v0 = vld [vmem:[#allocation2 + $0x8] sm:$0xff]  ;;  %v170_v2 = vld [vmem:[#allocation2 + $0x18] sm:$0xff] }
  0x93   :  { %v172_v1 = vld [vmem:[#allocation2 + $0x28] sm:$0xff]  ;;  %v174_v4 = vld [vmem:[#allocation2 + $0x38] sm:$0xff]  ;;  %v167_v5 = vld [vmem:[#allocation2] sm:$0xff] }
  0x94   :  { %v3521_v3 = vpack.c.bf16 %v172_v1, %v168_v0  ;;  %v171_v6 = vld [vmem:[#allocation2 + $0x20] sm:$0xff]  ;;  %v3745_v7 = vpack.c.bf16 %v174_v4, %v170_v2  ;;  %v169_v9 = vld [vmem:[#allocation2 + $0x10] sm:$0xff]  ;;  %v176_v11 = vld [vmem:[#allocation2 + $0x48] sm:$0xff] }
  0x95   :  { %v3523_v8 = vpack.c.bf16 %v171_v6, %v167_v5  ;;  %v173_v10 = vld [vmem:[#allocation2 + $0x30] sm:$0xff]  ;;  %v180_v13 = vld [vmem:[#allocation2 + $0x68] sm:$0xff]  ;;  %v178_v14 = vld [vmem:[#allocation2 + $0x58] sm:$0xff] }
  0x96   :  { %3522 = vmatprep.subr.bf16.mxu0 %v3521_v3  ;;  %v3747_v12 = vpack.c.bf16 %v173_v10, %v169_v9  ;;  %v182_v15 = vld [vmem:[#allocation2 + $0x78] sm:$0xff]  ;;  %3746 = vmatprep.subr.bf16.mxu1 %v3745_v7  ;;  %v3525_v16 = vpack.c.bf16 %v180_v13, %v176_v11  ;;  %v175_v18 = vld [vmem:[#allocation2 + $0x40] sm:$0xff]  ;;  %v177_v20 = vld [vmem:[#allocation2 + $0x50] sm:$0xff] }
  0x97   :  { %3524 = vmatpush1.bf16.msra.mxu0 %v3523_v8  ;;  %v3749_v17 = vpack.c.bf16 %v182_v15, %v178_v14  ;;  %v179_v19 = vld [vmem:[#allocation2 + $0x60] sm:$0xff]  ;;  %v181_v22 = vld [vmem:[#allocation2 + $0x70] sm:$0xff]  ;;  %v184_v23 = vld [vmem:[#allocation2 + $0x88] sm:$0xff] }
  0x98   :  { %3748 = vmatpush1.bf16.msra.mxu1 %v3747_v12  ;;  %v3527_v21 = vpack.c.bf16 %v179_v19, %v175_v18  ;;  %v188_v24 = vld [vmem:[#allocation2 + $0xa8] sm:$0xff]  ;;  %3526 = vmatprep.subr.bf16.mxu0 %v3525_v16  ;;  %v3751_v25 = vpack.c.bf16 %v181_v22, %v177_v20  ;;  %v186_v27 = vld [vmem:[#allocation2 + $0x98] sm:$0xff]  ;;  %v183_v29 = vld [vmem:[#allocation2 + $0x80] sm:$0xff] }
  0x99   :  { %3750 = vmatprep.subr.bf16.mxu1 %v3749_v17  ;;  %v3529_v26 = vpack.c.bf16 %v188_v24, %v184_v23  ;;  %v190_v28 = vld [vmem:[#allocation2 + $0xb8] sm:$0xff]  ;;  %v187_v31 = vld [vmem:[#allocation2 + $0xa0] sm:$0xff]  ;;  %v185_v32 = vld [vmem:[#allocation2 + $0x90] sm:$0xff] }
  0x9a   :  { %v3753_v30 = vpack.c.bf16 %v190_v28, %v186_v27  ;;  %v189_v33 = vld [vmem:[#allocation2 + $0xb0] sm:$0xff]  ;;  %v3531_v34 = vpack.c.bf16 %v187_v31, %v183_v29  ;;  %v192_v35 = vld [vmem:[#allocation2 + $0xc8] sm:$0xff]  ;;  %v194_v37 = vld [vmem:[#allocation2 + $0xd8] sm:$0xff] }
  0x9b   :  { %3528 = vmatpush1.bf16.msra.mxu0 %v3527_v21  ;;  %v196_v36 = vld [vmem:[#allocation2 + $0xe8] sm:$0xff]  ;;  %v3755_v38 = vpack.c.bf16 %v189_v33, %v185_v32  ;;  %v198_v40 = vld [vmem:[#allocation2 + $0xf8] sm:$0xff]  ;;  %v191_v41 = vld [vmem:[#allocation2 + $0xc0] sm:$0xff] }
  0x9c   :  { %3752 = vmatpush1.bf16.msra.mxu1 %v3751_v25  ;;  %3530 = vmatprep.subr.bf16.mxu0 %v3529_v26  ;;  %v3533_v39 = vpack.c.bf16 %v196_v36, %v192_v35  ;;  %v195_v42 = vld [vmem:[#allocation2 + $0xe0] sm:$0xff]  ;;  %v3757_v43 = vpack.c.bf16 %v198_v40, %v194_v37  ;;  %v193_v44 = vld [vmem:[#allocation2 + $0xd0] sm:$0xff]  ;;  %v200_v46 = vld [vmem:[#allocation2 + $0x108] sm:$0xff] }
  0x9d   :  { %3754 = vmatprep.subr.bf16.mxu1 %v3753_v30  ;;  %v197_v45 = vld [vmem:[#allocation2 + $0xf0] sm:$0xff]  ;;  %v204_v47 = vld [vmem:[#allocation2 + $0x128] sm:$0xff]  ;;  %v202_v48 = vld [vmem:[#allocation2 + $0x118] sm:$0xff]  ;;  %v3535_v50 = vpack.c.bf16 %v195_v42, %v191_v41 }
  0x9e   :  { %v206_v49 = vld [vmem:[#allocation2 + $0x138] sm:$0xff]  ;;  %v3759_v51 = vpack.c.bf16 %v197_v45, %v193_v44  ;;  %v3537_v52 = vpack.c.bf16 %v204_v47, %v200_v46  ;;  %v199_v53 = vld [vmem:[#allocation2 + $0x100] sm:$0xff]  ;;  %v201_v55 = vld [vmem:[#allocation2 + $0x110] sm:$0xff] }
  0x9f   :  { %3532 = vmatpush1.bf16.msra.mxu0 %v3531_v34  ;;  %v203_v54 = vld [vmem:[#allocation2 + $0x120] sm:$0xff]  ;;  %v3761_v56 = vpack.c.bf16 %v206_v49, %v202_v48  ;;  %v205_v57 = vld [vmem:[#allocation2 + $0x130] sm:$0xff]  ;;  %v208_v58 = vld [vmem:[#allocation2 + $0x148] sm:$0xff] }
  0xa0   :  { %3756 = vmatpush1.bf16.msra.mxu1 %v3755_v38  ;;  %3534 = vmatprep.subr.bf16.mxu0 %v3533_v39  ;;  %v212_v59 = vld [vmem:[#allocation2 + $0x168] sm:$0xff]  ;;  %v210_v60 = vld [vmem:[#allocation2 + $0x158] sm:$0xff]  ;;  %v3539_v62 = vpack.c.bf16 %v203_v54, %v199_v53  ;;  %v3763_v63 = vpack.c.bf16 %v205_v57, %v201_v55  ;;  %v207_v1 = vld [vmem:[#allocation2 + $0x140] sm:$0xff] }
  0xa1   :  { %3758 = vmatprep.subr.bf16.mxu1 %v3757_v43  ;;  %v214_v61 = vld [vmem:[#allocation2 + $0x178] sm:$0xff]  ;;  %v3541_v0 = vpack.c.bf16 %v212_v59, %v208_v58  ;;  %v211_v2 = vld [vmem:[#allocation2 + $0x160] sm:$0xff]  ;;  %v209_v3 = vld [vmem:[#allocation2 + $0x150] sm:$0xff] }
  0xa2   :  { %v3765_v4 = vpack.c.bf16 %v214_v61, %v210_v60  ;;  %v213_v5 = vld [vmem:[#allocation2 + $0x170] sm:$0xff]  ;;  %v216_v6 = vld [vmem:[#allocation2 + $0x188] sm:$0xff]  ;;  %v218_v8 = vld [vmem:[#allocation2 + $0x198] sm:$0xff]  ;;  %v3543_v10 = vpack.c.bf16 %v211_v2, %v207_v1 }
  0xa3   :  { %3536 = vmatpush1.bf16.msra.mxu0 %v3535_v50  ;;  %v220_v7 = vld [vmem:[#allocation2 + $0x1a8] sm:$0xff]  ;;  %v222_v9 = vld [vmem:[#allocation2 + $0x1b8] sm:$0xff]  ;;  %v3767_v11 = vpack.c.bf16 %v213_v5, %v209_v3  ;;  %v215_v13 = vld [vmem:[#allocation2 + $0x180] sm:$0xff] }
  0xa4   :  { %3760 = vmatpush1.bf16.msra.mxu1 %v3759_v51  ;;  %3538 = vmatprep.subr.bf16.mxu0 %v3537_v52  ;;  %v3545_v12 = vpack.c.bf16 %v220_v7, %v216_v6  ;;  %v219_v14 = vld [vmem:[#allocation2 + $0x1a0] sm:$0xff]  ;;  %v217_v15 = vld [vmem:[#allocation2 + $0x190] sm:$0xff]  ;;  %v3769_v16 = vpack.c.bf16 %v222_v9, %v218_v8  ;;  %v224_v18 = vld [vmem:[#allocation2 + $0x1c8] sm:$0xff] }
  0xa5   :  { %3762 = vmatprep.subr.bf16.mxu1 %v3761_v56  ;;  %v221_v17 = vld [vmem:[#allocation2 + $0x1b0] sm:$0xff]  ;;  %v228_v19 = vld [vmem:[#allocation2 + $0x1e8] sm:$0xff]  ;;  %v226_v20 = vld [vmem:[#allocation2 + $0x1d8] sm:$0xff]  ;;  %v3547_v22 = vpack.c.bf16 %v219_v14, %v215_v13 }
  0xa6   :  { %v230_v21 = vld [vmem:[#allocation2 + $0x1f8] sm:$0xff]  ;;  %v3771_v23 = vpack.c.bf16 %v221_v17, %v217_v15  ;;  %v3549_v24 = vpack.c.bf16 %v228_v19, %v224_v18  ;;  %v223_v25 = vld [vmem:[#allocation2 + $0x1c0] sm:$0xff]  ;;  %v225_v27 = vld [vmem:[#allocation2 + $0x1d0] sm:$0xff] }
  0xa7   :  { %3540 = vmatpush1.bf16.msra.mxu0 %v3539_v62  ;;  %v227_v26 = vld [vmem:[#allocation2 + $0x1e0] sm:$0xff]  ;;  %v3773_v28 = vpack.c.bf16 %v230_v21, %v226_v20  ;;  %v229_v29 = vld [vmem:[#allocation2 + $0x1f0] sm:$0xff]  ;;  %v232_v30 = vld [vmem:[#allocation2 + $0x208] sm:$0xff] }
  0xa8   :  { %3764 = vmatpush1.bf16.msra.mxu1 %v3763_v63  ;;  %3542 = vmatprep.subr.bf16.mxu0 %v3541_v0  ;;  %v236_v31 = vld [vmem:[#allocation2 + $0x228] sm:$0xff]  ;;  %v234_v32 = vld [vmem:[#allocation2 + $0x218] sm:$0xff]  ;;  %v3551_v34 = vpack.c.bf16 %v227_v26, %v223_v25  ;;  %v3775_v35 = vpack.c.bf16 %v229_v29, %v225_v27  ;;  %v231_v37 = vld [vmem:[#allocation2 + $0x200] sm:$0xff] }
  0xa9   :  { %3766 = vmatprep.subr.bf16.mxu1 %v3765_v4  ;;  %v238_v33 = vld [vmem:[#allocation2 + $0x238] sm:$0xff]  ;;  %v3553_v36 = vpack.c.bf16 %v236_v31, %v232_v30  ;;  %v235_v38 = vld [vmem:[#allocation2 + $0x220] sm:$0xff]  ;;  %v233_v39 = vld [vmem:[#allocation2 + $0x210] sm:$0xff] }
  0xaa   :  { %v3777_v40 = vpack.c.bf16 %v238_v33, %v234_v32  ;;  %v237_v41 = vld [vmem:[#allocation2 + $0x230] sm:$0xff]  ;;  %v240_v42 = vld [vmem:[#allocation2 + $0x248] sm:$0xff]  ;;  %v242_v44 = vld [vmem:[#allocation2 + $0x258] sm:$0xff]  ;;  %v3555_v46 = vpack.c.bf16 %v235_v38, %v231_v37 }
  0xab   :  { %3544 = vmatpush1.bf16.msra.mxu0 %v3543_v10  ;;  %v244_v43 = vld [vmem:[#allocation2 + $0x268] sm:$0xff]  ;;  %v246_v45 = vld [vmem:[#allocation2 + $0x278] sm:$0xff]  ;;  %v3779_v47 = vpack.c.bf16 %v237_v41, %v233_v39  ;;  %v239_v49 = vld [vmem:[#allocation2 + $0x240] sm:$0xff] }
  0xac   :  { %3768 = vmatpush1.bf16.msra.mxu1 %v3767_v11  ;;  %3546 = vmatprep.subr.bf16.mxu0 %v3545_v12  ;;  %v3557_v48 = vpack.c.bf16 %v244_v43, %v240_v42  ;;  %v243_v50 = vld [vmem:[#allocation2 + $0x260] sm:$0xff]  ;;  %v241_v51 = vld [vmem:[#allocation2 + $0x250] sm:$0xff]  ;;  %v3781_v52 = vpack.c.bf16 %v246_v45, %v242_v44  ;;  %v248_v54 = vld [vmem:[#allocation2 + $0x288] sm:$0xff] }
  0xad   :  { %3770 = vmatprep.subr.bf16.mxu1 %v3769_v16  ;;  %v245_v53 = vld [vmem:[#allocation2 + $0x270] sm:$0xff]  ;;  %v252_v55 = vld [vmem:[#allocation2 + $0x2a8] sm:$0xff]  ;;  %v250_v56 = vld [vmem:[#allocation2 + $0x298] sm:$0xff]  ;;  %v3559_v58 = vpack.c.bf16 %v243_v50, %v239_v49 }
  0xae   :  { %v254_v57 = vld [vmem:[#allocation2 + $0x2b8] sm:$0xff]  ;;  %v3783_v59 = vpack.c.bf16 %v245_v53, %v241_v51  ;;  %v3561_v60 = vpack.c.bf16 %v252_v55, %v248_v54  ;;  %v247_v61 = vld [vmem:[#allocation2 + $0x280] sm:$0xff]  ;;  %v249_v63 = vld [vmem:[#allocation2 + $0x290] sm:$0xff] }
  0xaf   :  { %3548 = vmatpush1.bf16.msra.mxu0 %v3547_v22  ;;  %v251_v62 = vld [vmem:[#allocation2 + $0x2a0] sm:$0xff]  ;;  %v3785_v0 = vpack.c.bf16 %v254_v57, %v250_v56  ;;  %v253_v1 = vld [vmem:[#allocation2 + $0x2b0] sm:$0xff]  ;;  %v256_v2 = vld [vmem:[#allocation2 + $0x2c8] sm:$0xff] }
  0xb0   :  { %3772 = vmatpush1.bf16.msra.mxu1 %v3771_v23  ;;  %3550 = vmatprep.subr.bf16.mxu0 %v3549_v24  ;;  %v260_v3 = vld [vmem:[#allocation2 + $0x2e8] sm:$0xff]  ;;  %v258_v4 = vld [vmem:[#allocation2 + $0x2d8] sm:$0xff]  ;;  %v3563_v6 = vpack.c.bf16 %v251_v62, %v247_v61  ;;  %v255_v7 = vld [vmem:[#allocation2 + $0x2c0] sm:$0xff]  ;;  %v3787_v8 = vpack.c.bf16 %v253_v1, %v249_v63 }
  0xb1   :  { %3774 = vmatprep.subr.bf16.mxu1 %v3773_v28  ;;  %v262_v5 = vld [vmem:[#allocation2 + $0x2f8] sm:$0xff]  ;;  %v3565_v9 = vpack.c.bf16 %v260_v3, %v256_v2  ;;  %v259_v10 = vld [vmem:[#allocation2 + $0x2e0] sm:$0xff]  ;;  %v257_v11 = vld [vmem:[#allocation2 + $0x2d0] sm:$0xff] }
  0xb2   :  { %v261_v12 = vld [vmem:[#allocation2 + $0x2f0] sm:$0xff]  ;;  %v3789_v13 = vpack.c.bf16 %v262_v5, %v258_v4  ;;  %v264_v14 = vld [vmem:[#allocation2 + $0x308] sm:$0xff]  ;;  %v266_v17 = vld [vmem:[#allocation2 + $0x318] sm:$0xff]  ;;  %v3567_v19 = vpack.c.bf16 %v259_v10, %v255_v7 }
  0xb3   :  { %3552 = vmatpush1.bf16.msra.mxu0 %v3551_v34  ;;  %v268_v15 = vld [vmem:[#allocation2 + $0x328] sm:$0xff]  ;;  %v270_v18 = vld [vmem:[#allocation2 + $0x338] sm:$0xff]  ;;  %v3791_v20 = vpack.c.bf16 %v261_v12, %v257_v11  ;;  %v263_v22 = vld [vmem:[#allocation2 + $0x300] sm:$0xff] }
  0xb4   :  { %3776 = vmatpush1.bf16.msra.mxu1 %v3775_v35  ;;  %3554 = vmatprep.subr.bf16.mxu0 %v3553_v36  ;;  %v140_v16 = vld [vmem:[%s5676_s0 + $0x8] sm:$0xff]  ;;  %v3569_v21 = vpack.c.bf16 %v268_v15, %v264_v14  ;;  %v267_v23 = vld [vmem:[#allocation2 + $0x320] sm:$0xff]  ;;  %v265_v24 = vld [vmem:[#allocation2 + $0x310] sm:$0xff]  ;;  %v3793_v25 = vpack.c.bf16 %v270_v18, %v266_v17 }
  0xb5   :  { %3778 = vmatprep.subr.bf16.mxu1 %v3777_v40  ;;  %701 = vmatprep.mubr.f32.mxu0 %v140_v16  ;;  %v269_v26 = vld [vmem:[#allocation2 + $0x330] sm:$0xff]  ;;  %v272_v27 = vld [vmem:[#allocation2 + $0x348] sm:$0xff]  ;;  %v274_v29 = vld [vmem:[#allocation2 + $0x358] sm:$0xff]  ;;  %v3571_v31 = vpack.c.bf16 %v267_v23, %v263_v22 }
  0xb6   :  { %1057 = vmatprep.mubr.f32.mxu1 %v140_v16  ;;  %v276_v28 = vld [vmem:[#allocation2 + $0x368] sm:$0xff]  ;;  %v278_v30 = vld [vmem:[#allocation2 + $0x378] sm:$0xff]  ;;  %v3795_v32 = vpack.c.bf16 %v269_v26, %v265_v24  ;;  %v271_v34 = vld [vmem:[#allocation2 + $0x340] sm:$0xff] }
  0xb7   :  { %3556 = vmatpush1.bf16.msra.mxu0 %v3555_v46  ;;  %v3573_v33 = vpack.c.bf16 %v276_v28, %v272_v27  ;;  %v275_v35 = vld [vmem:[#allocation2 + $0x360] sm:$0xff]  ;;  %v273_v36 = vld [vmem:[#allocation2 + $0x350] sm:$0xff]  ;;  %v3797_v37 = vpack.c.bf16 %v278_v30, %v274_v29  ;;  %v280_v39 = vld [vmem:[#allocation2 + $0x388] sm:$0xff] }
  0xb8   :  { %3780 = vmatpush1.bf16.msra.mxu1 %v3779_v47  ;;  %3558 = vmatprep.subr.bf16.mxu0 %v3557_v48  ;;  %v277_v38 = vld [vmem:[#allocation2 + $0x370] sm:$0xff]  ;;  %v284_v40 = vld [vmem:[#allocation2 + $0x3a8] sm:$0xff]  ;;  %v282_v41 = vld [vmem:[#allocation2 + $0x398] sm:$0xff]  ;;  %v3575_v43 = vpack.c.bf16 %v275_v35, %v271_v34 }
  0xb9   :  { %3782 = vmatprep.subr.bf16.mxu1 %v3781_v52  ;;  %v286_v42 = vld [vmem:[#allocation2 + $0x3b8] sm:$0xff]  ;;  %v3799_v44 = vpack.c.bf16 %v277_v38, %v273_v36  ;;  %v3577_v45 = vpack.c.bf16 %v284_v40, %v280_v39  ;;  %v279_v46 = vld [vmem:[#allocation2 + $0x380] sm:$0xff]  ;;  %v281_v48 = vld [vmem:[#allocation2 + $0x390] sm:$0xff] }
  0xba   :  { %v283_v47 = vld [vmem:[#allocation2 + $0x3a0] sm:$0xff]  ;;  %v3801_v49 = vpack.c.bf16 %v286_v42, %v282_v41  ;;  %v285_v50 = vld [vmem:[#allocation2 + $0x3b0] sm:$0xff]  ;;  %v288_v51 = vld [vmem:[#allocation2 + $0x3c8] sm:$0xff] }
  0xbb   :  { %3560 = vmatpush1.bf16.msra.mxu0 %v3559_v58  ;;  %v292_v52 = vld [vmem:[#allocation2 + $0x3e8] sm:$0xff]  ;;  %v290_v53 = vld [vmem:[#allocation2 + $0x3d8] sm:$0xff]  ;;  %v3579_v55 = vpack.c.bf16 %v283_v47, %v279_v46  ;;  %v3803_v56 = vpack.c.bf16 %v285_v50, %v281_v48  ;;  %v287_v58 = vld [vmem:[#allocation2 + $0x3c0] sm:$0xff] }
  0xbc   :  { %3784 = vmatpush1.bf16.msra.mxu1 %v3783_v59  ;;  %3562 = vmatprep.subr.bf16.mxu0 %v3561_v60  ;;  %v294_v54 = vld [vmem:[#allocation2 + $0x3f8] sm:$0xff]  ;;  %v3581_v57 = vpack.c.bf16 %v292_v52, %v288_v51  ;;  %v291_v59 = vld [vmem:[#allocation2 + $0x3e0] sm:$0xff]  ;;  %v289_v60 = vld [vmem:[#allocation2 + $0x3d0] sm:$0xff] }
  0xbd   :  { %3786 = vmatprep.subr.bf16.mxu1 %v3785_v0  ;;  %v3805_v61 = vpack.c.bf16 %v294_v54, %v290_v53  ;;  %v293_v62 = vld [vmem:[#allocation2 + $0x3f0] sm:$0xff]  ;;  %v296_v63 = vld [vmem:[#allocation2 + $0x408] sm:$0xff]  ;;  %v298_v1 = vld [vmem:[#allocation2 + $0x418] sm:$0xff]  ;;  %v3583_v3 = vpack.c.bf16 %v291_v59, %v287_v58 }
  0xbe   :  { %v300_v0 = vld [vmem:[#allocation2 + $0x428] sm:$0xff]  ;;  %v302_v2 = vld [vmem:[#allocation2 + $0x438] sm:$0xff]  ;;  %v3807_v4 = vpack.c.bf16 %v293_v62, %v289_v60  ;;  %v299_v7 = vld [vmem:[#allocation2 + $0x420] sm:$0xff] }
  0xbf   :  { %3564 = vmatpush1.bf16.msra.mxu0 %v3563_v6  ;;  %v3585_v5 = vpack.c.bf16 %v300_v0, %v296_v63  ;;  %v295_v6 = vld [vmem:[#allocation2 + $0x400] sm:$0xff]  ;;  %v301_v10 = vld [vmem:[#allocation2 + $0x430] sm:$0xff]  ;;  %v304_v11 = vld [vmem:[#allocation2 + $0x448] sm:$0xff] }
  0xc0   :  { %3788 = vmatpush1.bf16.msra.mxu1 %v3787_v8  ;;  %3566 = vmatprep.subr.bf16.mxu0 %v3565_v9  ;;  %v297_v8 = vld [vmem:[#allocation2 + $0x410] sm:$0xff]  ;;  %v3809_v9 = vpack.c.bf16 %v302_v2, %v298_v1  ;;  %v308_v12 = vld [vmem:[#allocation2 + $0x468] sm:$0xff]  ;;  %v310_v14 = vld [vmem:[#allocation2 + $0x478] sm:$0xff]  ;;  %v3587_v16 = vpack.c.bf16 %v299_v7, %v295_v6 }
  0xc1   :  { %3790 = vmatprep.subr.bf16.mxu1 %v3789_v13  ;;  %v306_v13 = vld [vmem:[#allocation2 + $0x458] sm:$0xff]  ;;  %v139_v15 = vld [vmem:[%s5676_s0] sm:$0xff]  ;;  %v3811_v17 = vpack.c.bf16 %v301_v10, %v297_v8  ;;  %v3589_v18 = vpack.c.bf16 %v308_v12, %v304_v11  ;;  %v309_v23 = vld [vmem:[#allocation2 + $0x470] sm:$0xff] }
  0xc2   :  { %v3813_v22 = vpack.c.bf16 %v310_v14, %v306_v13  ;;  %v312_v24 = vld [vmem:[#allocation2 + $0x488] sm:$0xff]  ;;  %v314_v26 = vld [vmem:[#allocation2 + $0x498] sm:$0xff]  ;;  %v317_v35 = vld [vmem:[#allocation2 + $0x4b0] sm:$0xff] }
  0xc3   :  { %3568 = vmatpush1.bf16.msra.mxu0 %v3567_v19  ;;  %v303_v19 = vld [vmem:[#allocation2 + $0x440] sm:$0xff]  ;;  %v318_v27 = vld [vmem:[#allocation2 + $0x4b8] sm:$0xff]  ;;  %v320_v36 = vld [vmem:[#allocation2 + $0x4c8] sm:$0xff] }
  0xc4   :  { %3792 = vmatpush1.bf16.msra.mxu1 %v3791_v20  ;;  %3570 = vmatprep.subr.bf16.mxu0 %v3569_v21  ;;  %v307_v20 = vld [vmem:[#allocation2 + $0x460] sm:$0xff]  ;;  %v305_v21 = vld [vmem:[#allocation2 + $0x450] sm:$0xff]  ;;  %v3817_v34 = vpack.c.bf16 %v318_v27, %v314_v26  ;;  %v322_v38 = vld [vmem:[#allocation2 + $0x4d8] sm:$0xff] }
  0xc5   :  { %3794 = vmatprep.subr.bf16.mxu1 %v3793_v25  ;;  %v316_v25 = vld [vmem:[#allocation2 + $0x4a8] sm:$0xff]  ;;  %v3591_v28 = vpack.c.bf16 %v307_v20, %v303_v19  ;;  %v3815_v29 = vpack.c.bf16 %v309_v23, %v305_v21  ;;  %v326_v39 = vld [vmem:[#allocation2 + $0x4f8] sm:$0xff]  ;;  %v325_v47 = vld [vmem:[#allocation2 + $0x4f0] sm:$0xff] }
  0xc6   :  { %v3593_v30 = vpack.c.bf16 %v316_v25, %v312_v24  ;;  %v3821_v46 = vpack.c.bf16 %v326_v39, %v322_v38  ;;  %v328_v48 = vld [vmem:[#allocation2 + $0x508] sm:$0xff]  ;;  %v330_v50 = vld [vmem:[#allocation2 + $0x518] sm:$0xff]  ;;  %v327_v53 = vld [vmem:[#allocation2 + $0x500] sm:$0xff] }
  0xc7   :  { %3572 = vmatpush1.bf16.msra.mxu0 %v3571_v31  ;;  %v311_v31 = vld [vmem:[#allocation2 + $0x480] sm:$0xff]  ;;  %v334_v51 = vld [vmem:[#allocation2 + $0x538] sm:$0xff]  ;;  %v333_v58 = vld [vmem:[#allocation2 + $0x530] sm:$0xff] }
  0xc8   :  { %3796 = vmatpush1.bf16.msra.mxu1 %v3795_v32  ;;  %3574 = vmatprep.subr.bf16.mxu0 %v3573_v33  ;;  %v315_v32 = vld [vmem:[#allocation2 + $0x4a0] sm:$0xff]  ;;  %v313_v33 = vld [vmem:[#allocation2 + $0x490] sm:$0xff]  ;;  %v3825_v59 = vpack.c.bf16 %v334_v51, %v330_v50  ;;  %v336_v60 = vld [vmem:[#allocation2 + $0x548] sm:$0xff] }
  0xc9   :  { %3798 = vmatprep.subr.bf16.mxu1 %v3797_v37  ;;  %v324_v37 = vld [vmem:[#allocation2 + $0x4e8] sm:$0xff]  ;;  %v3595_v40 = vpack.c.bf16 %v315_v32, %v311_v31  ;;  %v3819_v41 = vpack.c.bf16 %v317_v35, %v313_v33  ;;  %v147_v62 = vld [vmem:[%s5676_s0 + $0x40] sm:$0xff]  ;;  %v338_v63 = vld [vmem:[#allocation2 + $0x558] sm:$0xff] }
  0xca   :  { %v3597_v42 = vpack.c.bf16 %v324_v37, %v320_v36  ;;  %v342_v0 = vld [vmem:[#allocation2 + $0x578] sm:$0xff]  ;;  %v339_v6 = vld [vmem:[#allocation2 + $0x560] sm:$0xff]  ;;  %v337_v7 = vld [vmem:[#allocation2 + $0x550] sm:$0xff] }
  0xcb   :  { %3576 = vmatpush1.bf16.msra.mxu0 %v3575_v43  ;;  %v319_v43 = vld [vmem:[#allocation2 + $0x4c0] sm:$0xff]  ;;  %v146_v1 = vld [vmem:[%s5676_s0 + $0x38] sm:$0xff]  ;;  %v341_v10 = vld [vmem:[#allocation2 + $0x570] sm:$0xff] }
  0xcc   :  { %3800 = vmatpush1.bf16.msra.mxu1 %v3799_v44  ;;  %3578 = vmatprep.subr.bf16.mxu0 %v3577_v45  ;;  %v323_v44 = vld [vmem:[#allocation2 + $0x4e0] sm:$0xff]  ;;  %v321_v45 = vld [vmem:[#allocation2 + $0x4d0] sm:$0xff]  ;;  %v154_v8 = vld [vmem:[%s5676_s0 + $0x78] sm:$0xff]  ;;  %v3831_v19 = vpack.c.bf16 %v341_v10, %v337_v7 }
  0xcd   :  { %3802 = vmatprep.subr.bf16.mxu1 %v3801_v49  ;;  %v332_v49 = vld [vmem:[#allocation2 + $0x528] sm:$0xff]  ;;  %v3599_v52 = vpack.c.bf16 %v323_v44, %v319_v43  ;;  %v3823_v54 = vpack.c.bf16 %v325_v47, %v321_v45  ;;  %v346_v13 = vld [vmem:[#allocation2 + $0x598] sm:$0xff]  ;;  %v347_v21 = vld [vmem:[#allocation2 + $0x5a0] sm:$0xff] }
  0xce   :  { %v344_v11 = vld [vmem:[#allocation2 + $0x588] sm:$0xff]  ;;  %v350_v14 = vld [vmem:[#allocation2 + $0x5b8] sm:$0xff]  ;;  %v349_v23 = vld [vmem:[#allocation2 + $0x5b0] sm:$0xff] }
  0xcf   :  { %3580 = vmatpush1.bf16.msra.mxu0 %v3579_v55  ;;  %v3601_v55 = vpack.c.bf16 %v332_v49, %v328_v48  ;;  %v348_v12 = vld [vmem:[#allocation2 + $0x5a8] sm:$0xff]  ;;  %v3833_v24 = vpack.c.bf16 %v350_v14, %v346_v13  ;;  %v142_v31 = vld [vmem:[%s5676_s0 + $0x18] sm:$0xff]  ;;  %v355_v35 = vld [vmem:[#allocation2 + $0x5e0] sm:$0xff] }
  0xd0   :  { %3804 = vmatpush1.bf16.msra.mxu1 %v3803_v56  ;;  %3582 = vmatprep.subr.bf16.mxu0 %v3581_v57  ;;  %v331_v56 = vld [vmem:[#allocation2 + $0x520] sm:$0xff]  ;;  %v329_v57 = vld [vmem:[#allocation2 + $0x510] sm:$0xff]  ;;  %v3609_v20 = vpack.c.bf16 %v348_v12, %v344_v11  ;;  %v352_v25 = vld [vmem:[#allocation2 + $0x5c8] sm:$0xff] }
  0xd1   :  { %3806 = vmatprep.subr.bf16.mxu1 %v3805_v61  ;;  %v340_v61 = vld [vmem:[#allocation2 + $0x568] sm:$0xff]  ;;  %v3603_v2 = vpack.c.bf16 %v331_v56, %v327_v53  ;;  %v353_v36 = vld [vmem:[#allocation2 + $0x5d0] sm:$0xff]  ;;  %v363_v47 = vld [vmem:[#allocation2 + $0x620] sm:$0xff] }
  0xd2   :  { %v356_v26 = vld [vmem:[#allocation2 + $0x5e8] sm:$0xff]  ;;  %v357_v38 = vld [vmem:[#allocation2 + $0x5f0] sm:$0xff]  ;;  %v370_v53 = vld [vmem:[#allocation2 + $0x658] sm:$0xff] }
  0xd3   :  { %3584 = vmatpush1.bf16.msra.mxu0 %v3583_v3  ;;  %v335_v3 = vld [vmem:[#allocation2 + $0x540] sm:$0xff]  ;;  %v160_v27 = vld [vmem:[%s5676_s0 + $0xa8] sm:$0xff]  ;;  %v3613_v33 = vpack.c.bf16 %v356_v26, %v352_v25  ;;  %v3839_v44 = vpack.c.bf16 %v357_v38, %v353_v36  ;;  %v361_v48 = vld [vmem:[#allocation2 + $0x610] sm:$0xff] }
  0xd4   :  { %3808 = vmatpush1.bf16.msra.mxu1 %v3807_v4  ;;  %3586 = vmatprep.subr.bf16.mxu0 %v3585_v5  ;;  %v3827_v4 = vpack.c.bf16 %v333_v58, %v329_v57  ;;  %v3605_v5 = vpack.c.bf16 %v340_v61, %v336_v60  ;;  %v360_v39 = vld [vmem:[#allocation2 + $0x608] sm:$0xff]  ;;  %v365_v50 = vld [vmem:[#allocation2 + $0x630] sm:$0xff]  ;;  %v367_v58 = vld [vmem:[#allocation2 + $0x640] sm:$0xff] }
  0xd5   :  { %3810 = vmatprep.subr.bf16.mxu1 %v3809_v9  ;;  %v3829_v9 = vpack.c.bf16 %v342_v0, %v338_v63  ;;  %v368_v51 = vld [vmem:[#allocation2 + $0x648] sm:$0xff]  ;;  %v3843_v56 = vpack.c.bf16 %v365_v50, %v361_v48  ;;  %v369_v60 = vld [vmem:[#allocation2 + $0x650] sm:$0xff]  ;;  %v379_v7 = vld [vmem:[#allocation2 + $0x6a0] sm:$0xff] }
  0xd6   :  { %702 = vmatmul.mubr.f32.vlgmr.msra.gmra.mrb[0].mxu0 %v139_v15  ;;  %v376_v63 = vld [vmem:[#allocation2 + $0x688] sm:$0xff]  ;;  %v381_v10 = vld [vmem:[#allocation2 + $0x6b0] sm:$0xff]  ;;  %v386_v13 = vld [vmem:[#allocation2 + $0x6d8] sm:$0xff] }
  0xd7   :  { %3588 = vmatpush1.bf16.msra.mxu0 %v3587_v16  ;;  %1058 = vmatmul.mubr.f32.vlgmr.msra.gmra.mrb[0].mxu1 %v139_v15  ;;  %v153_v15 = vld [vmem:[%s5676_s0 + $0x70] sm:$0xff]  ;;  %v3607_v16 = vpack.c.bf16 %v339_v6, %v335_v3  ;;  %v380_v0 = vld [vmem:[#allocation2 + $0x6a8] sm:$0xff]  ;;  %v375_v6 = vld [vmem:[#allocation2 + $0x680] sm:$0xff] }
  0xd8   :  { %3812 = vmatpush1.bf16.msra.mxu1 %v3811_v17  ;;  %3590 = vmatprep.subr.bf16.mxu0 %v3589_v18  ;;  %v343_v17 = vld [vmem:[#allocation2 + $0x580] sm:$0xff]  ;;  %v161_v18 = vld [vmem:[%s5676_s0 + $0xb0] sm:$0xff]  ;;  %v384_v11 = vld [vmem:[#allocation2 + $0x6c8] sm:$0xff] }
  0xd9   :  { %3814 = vmatprep.subr.bf16.mxu1 %v3813_v22  ;;  %707 = vmatprep.mubr.f32.mxu0 %v147_v62  ;;  %v345_v22 = vld [vmem:[#allocation2 + $0x590] sm:$0xff]  ;;  %v388_v12 = vld [vmem:[#allocation2 + $0x6e8] sm:$0xff]  ;;  %v390_v14 = vld [vmem:[#allocation2 + $0x6f8] sm:$0xff] }
  0xda   :  { %1063 = vmatprep.mubr.f32.mxu1 %v147_v62  ;;  %708 = vmatmul.mubr.f32.gmra.mrb[2].mxu0 %v146_v1  ;;  %v3835_v32 = vpack.c.bf16 %v349_v23, %v345_v22  ;;  %v373_v62 = vld [vmem:[#allocation2 + $0x670] sm:$0xff]  ;;  %v392_v23 = vld [vmem:[#allocation2 + $0x708] sm:$0xff]  ;;  %v394_v25 = vld [vmem:[#allocation2 + $0x718] sm:$0xff] }
  0xdb   :  { %3592 = vmatpush1.bf16.msra.mxu0 %v3591_v28  ;;  %1064 = vmatmul.mubr.f32.gmra.mrb[2].mxu1 %v146_v1  ;;  %v354_v28 = vld [vmem:[#allocation2 + $0x5d8] sm:$0xff]  ;;  %v389_v22 = vld [vmem:[#allocation2 + $0x6f0] sm:$0xff]  ;;  %v404_v36 = vld [vmem:[#allocation2 + $0x768] sm:$0xff] }
  0xdc   :  { %3816 = vmatpush1.bf16.msra.mxu1 %v3815_v29  ;;  %3594 = vmatprep.subr.bf16.mxu0 %v3593_v30  ;;  %v358_v29 = vld [vmem:[#allocation2 + $0x5f8] sm:$0xff]  ;;  %v3611_v30 = vpack.c.bf16 %v347_v21, %v343_v17  ;;  %v3629_v17 = vpack.c.bf16 %v388_v12, %v384_v11  ;;  %v3853_v21 = vpack.c.bf16 %v390_v14, %v386_v13  ;;  %v412_v48 = vld [vmem:[#allocation2 + $0x7a8] sm:$0xff]  ;;  %v423_v14 = vld [vmem:[#allocation2 + $0x800] sm:$0xff] }
  0xdd   :  { %3818 = vmatprep.subr.bf16.mxu1 %v3817_v34  ;;  %713 = vmatprep.mubr.f32.mxu0 %v154_v8  ;;  %v351_v34 = vld [vmem:[#allocation2 + $0x5c0] sm:$0xff]  ;;  %v3837_v37 = vpack.c.bf16 %v358_v29, %v354_v28  ;;  %v378_v1 = vld [vmem:[#allocation2 + $0x698] sm:$0xff] }
  0xde   :  { %1069 = vmatprep.mubr.f32.mxu1 %v154_v8  ;;  %714 = vmatmul.mubr.f32.gmra.mrb[4].mxu0 %v153_v15  ;;  %v3615_v43 = vpack.c.bf16 %v355_v35, %v351_v34  ;;  %v377_v8 = vld [vmem:[#allocation2 + $0x690] sm:$0xff]  ;;  %v398_v26 = vld [vmem:[#allocation2 + $0x738] sm:$0xff]  ;;  %v400_v35 = vld [vmem:[#allocation2 + $0x748] sm:$0xff] }
  0xdf   :  { %3596 = vmatpush1.bf16.msra.mxu0 %v3595_v40  ;;  %1070 = vmatmul.mubr.f32.gmra.mrb[4].mxu1 %v153_v15  ;;  %v364_v40 = vld [vmem:[#allocation2 + $0x628] sm:$0xff]  ;;  %v3627_v15 = vpack.c.bf16 %v379_v7, %v375_v6  ;;  %v397_v34 = vld [vmem:[#allocation2 + $0x730] sm:$0xff]  ;;  %v406_v38 = vld [vmem:[#allocation2 + $0x778] sm:$0xff] }
  0xe0   :  { %3820 = vmatpush1.bf16.msra.mxu1 %v3819_v41  ;;  %3598 = vmatprep.subr.bf16.mxu0 %v3597_v42  ;;  %v362_v41 = vld [vmem:[#allocation2 + $0x618] sm:$0xff]  ;;  %v3617_v45 = vpack.c.bf16 %v364_v40, %v360_v39  ;;  %v421_v6 = vld [vmem:[#allocation2 + $0x7f0] sm:$0xff]  ;;  %v424_v7 = vld [vmem:[#allocation2 + $0x808] sm:$0xff] }
  0xe1   :  { %3822 = vmatprep.subr.bf16.mxu1 %v3821_v46  ;;  %719 = vmatprep.mubr.f32.mxu0 %v161_v18  ;;  %v366_v42 = vld [vmem:[#allocation2 + $0x638] sm:$0xff]  ;;  %v359_v46 = vld [vmem:[#allocation2 + $0x600] sm:$0xff] }
  0xe2   :  { %1075 = vmatprep.mubr.f32.mxu1 %v161_v18  ;;  %720 = vmatmul.mubr.f32.gmra.mrb[6].mxu0 %v160_v27  ;;  %v3841_v49 = vpack.c.bf16 %v366_v42, %v362_v41  ;;  %v383_v18 = vld [vmem:[#allocation2 + $0x6c0] sm:$0xff]  ;;  %v3637_v41 = vpack.c.bf16 %v404_v36, %v400_v35  ;;  %v414_v50 = vld [vmem:[#allocation2 + $0x7b8] sm:$0xff]  ;;  %v149_v36 = vld [vmem:[%s5676_s0 + $0x50] sm:$0xff] }
  0xe3   :  { %3600 = vmatpush1.bf16.msra.mxu0 %v3599_v52  ;;  %1076 = vmatmul.mubr.f32.gmra.mrb[6].mxu1 %v160_v27  ;;  %v372_v52 = vld [vmem:[#allocation2 + $0x668] sm:$0xff]  ;;  %v399_v42 = vld [vmem:[#allocation2 + $0x740] sm:$0xff]  ;;  %v446_v35 = vld [vmem:[#allocation2 + $0x8b8] sm:$0xff] }
  0xe4   :  { %3824 = vmatpush1.bf16.msra.mxu1 %v3823_v54  ;;  %3602 = vmatprep.subr.bf16.mxu0 %v3601_v55  ;;  %v374_v54 = vld [vmem:[#allocation2 + $0x678] sm:$0xff]  ;;  %v3619_v55 = vpack.c.bf16 %v363_v47, %v359_v46  ;;  %v3621_v57 = vpack.c.bf16 %v372_v52, %v368_v51  ;;  %v405_v46 = vld [vmem:[#allocation2 + $0x770] sm:$0xff]  ;;  %v408_v47 = vld [vmem:[#allocation2 + $0x788] sm:$0xff] }
  0xe5   :  { %3826 = vmatprep.subr.bf16.mxu1 %v3825_v59  ;;  %790 = vmatprep.mubr.f32.mxu0 %v142_v31  ;;  %v371_v59 = vld [vmem:[#allocation2 + $0x660] sm:$0xff]  ;;  %v3845_v61 = vpack.c.bf16 %v374_v54, %v370_v53  ;;  %v3641_v53 = vpack.c.bf16 %v412_v48, %v408_v47  ;;  %v452_v47 = vld [vmem:[#allocation2 + $0x8e8] sm:$0xff]  ;;  %v450_v48 = vld [vmem:[#allocation2 + $0x8d8] sm:$0xff] }
  0xe6   :  { %1146 = vmatprep.mubr.f32.mxu1 %v142_v31  ;;  %v3623_v3 = vpack.c.bf16 %v371_v59, %v367_v58  ;;  %v395_v31 = vld [vmem:[#allocation2 + $0x720] sm:$0xff]  ;;  %v413_v58 = vld [vmem:[#allocation2 + $0x7b0] sm:$0xff]  ;;  %v416_v59 = vld [vmem:[#allocation2 + $0x7c8] sm:$0xff] }
  0xe7   :  { %3604 = vmatpush1.bf16.msra.mxu0 %v3603_v2  ;;  %v382_v2 = vld [vmem:[#allocation2 + $0x6b8] sm:$0xff]  ;;  %v407_v54 = vld [vmem:[#allocation2 + $0x780] sm:$0xff] }
  0xe8   :  { %3828 = vmatpush1.bf16.msra.mxu1 %v3827_v4  ;;  %3606 = vmatprep.subr.bf16.mxu0 %v3605_v5  ;;  %v3847_v4 = vpack.c.bf16 %v373_v62, %v369_v60  ;;  %v3625_v5 = vpack.c.bf16 %v380_v0, %v376_v63  ;;  %v420_v60 = vld [vmem:[#allocation2 + $0x7e8] sm:$0xff]  ;;  %v422_v62 = vld [vmem:[#allocation2 + $0x7f8] sm:$0xff] }
  0xe9   :  { %3830 = vmatprep.subr.bf16.mxu1 %v3829_v9  ;;  %v3849_v9 = vpack.c.bf16 %v382_v2, %v378_v1  ;;  %v3645_v1 = vpack.c.bf16 %v420_v60, %v416_v59  ;;  %v415_v2 = vld [vmem:[#allocation2 + $0x7c0] sm:$0xff]  ;;  %v453_v59 = vld [vmem:[#allocation2 + $0x8f0] sm:$0xff]  ;;  %v456_v60 = vld [vmem:[#allocation2 + $0x908] sm:$0xff] }
  0xeb   :  { %3608 = vmatpush1.bf16.msra.mxu0 %v3607_v16  ;;  %v3851_v16 = vpack.c.bf16 %v381_v10, %v377_v8  ;;  %v428_v8 = vld [vmem:[#allocation2 + $0x828] sm:$0xff]  ;;  %v430_v10 = vld [vmem:[#allocation2 + $0x838] sm:$0xff] }
  0xec   :  { %3832 = vmatpush1.bf16.msra.mxu1 %v3831_v19  ;;  %3610 = vmatprep.subr.bf16.mxu0 %v3609_v20  ;;  %v387_v19 = vld [vmem:[#allocation2 + $0x6e0] sm:$0xff]  ;;  %v385_v20 = vld [vmem:[#allocation2 + $0x6d0] sm:$0xff]  ;;  %v3649_v13 = vpack.c.bf16 %v428_v8, %v424_v7 }
  0xed   :  { %3834 = vmatprep.subr.bf16.mxu1 %v3833_v24  ;;  %v396_v24 = vld [vmem:[#allocation2 + $0x728] sm:$0xff]  ;;  %v3631_v27 = vpack.c.bf16 %v387_v19, %v383_v18  ;;  %v3855_v28 = vpack.c.bf16 %v389_v22, %v385_v20  ;;  %v429_v18 = vld [vmem:[#allocation2 + $0x830] sm:$0xff]  ;;  %v438_v22 = vld [vmem:[#allocation2 + $0x878] sm:$0xff] }
  0xee   :  { %v3633_v29 = vpack.c.bf16 %v396_v24, %v392_v23  ;;  %v432_v19 = vld [vmem:[#allocation2 + $0x848] sm:$0xff]  ;;  %v141_v23 = vld [vmem:[%s5676_s0 + $0x10] sm:$0xff] }
  0xef   :  { %3612 = vmatpush1.bf16.msra.mxu0 %v3611_v30  ;;  %v391_v30 = vld [vmem:[#allocation2 + $0x700] sm:$0xff]  ;;  %v436_v20 = vld [vmem:[#allocation2 + $0x868] sm:$0xff]  ;;  %v457_v7 = vld [vmem:[#allocation2 + $0x910] sm:$0xff] }
  0xf0   :  { %3836 = vmatpush1.bf16.msra.mxu1 %v3835_v32  ;;  %3614 = vmatprep.subr.bf16.mxu0 %v3613_v33  ;;  %v393_v32 = vld [vmem:[#allocation2 + $0x710] sm:$0xff]  ;;  %v3857_v33 = vpack.c.bf16 %v398_v26, %v394_v25  ;;  %v3635_v39 = vpack.c.bf16 %v395_v31, %v391_v30  ;;  %v3653_v26 = vpack.c.bf16 %v436_v20, %v432_v19  ;;  %v467_v19 = vld [vmem:[#allocation2 + $0x960] sm:$0xff] }
  0xf1   :  { %3838 = vmatprep.subr.bf16.mxu1 %v3837_v37  ;;  %v402_v37 = vld [vmem:[#allocation2 + $0x758] sm:$0xff]  ;;  %v3859_v40 = vpack.c.bf16 %v397_v34, %v393_v32  ;;  %v437_v31 = vld [vmem:[#allocation2 + $0x870] sm:$0xff]  ;;  %v440_v32 = vld [vmem:[#allocation2 + $0x888] sm:$0xff] }
  0xf2   :  { %v442_v34 = vld [vmem:[#allocation2 + $0x898] sm:$0xff]  ;;  %v465_v20 = vld [vmem:[#allocation2 + $0x950] sm:$0xff] }
  0xf3   :  { %3616 = vmatpush1.bf16.msra.mxu0 %v3615_v43  ;;  %v403_v43 = vld [vmem:[#allocation2 + $0x760] sm:$0xff] }
  0xf4   :  { %3840 = vmatpush1.bf16.msra.mxu1 %v3839_v44  ;;  %3618 = vmatprep.subr.bf16.mxu0 %v3617_v45  ;;  %v401_v44 = vld [vmem:[#allocation2 + $0x750] sm:$0xff]  ;;  %v3861_v45 = vpack.c.bf16 %v406_v38, %v402_v37  ;;  %v3639_v51 = vpack.c.bf16 %v403_v43, %v399_v42  ;;  %v148_v38 = vld [vmem:[%s5676_s0 + $0x48] sm:$0xff]  ;;  %v443_v42 = vld [vmem:[#allocation2 + $0x8a0] sm:$0xff] }
  0xf5   :  { %3842 = vmatprep.subr.bf16.mxu1 %v3841_v49  ;;  %v410_v49 = vld [vmem:[#allocation2 + $0x798] sm:$0xff]  ;;  %v3863_v52 = vpack.c.bf16 %v405_v46, %v401_v44  ;;  %v441_v43 = vld [vmem:[#allocation2 + $0x890] sm:$0xff]  ;;  %v3881_v44 = vpack.c.bf16 %v446_v35, %v442_v34  ;;  %v448_v46 = vld [vmem:[#allocation2 + $0x8c8] sm:$0xff] }
  0xf6   :  { %v477_v34 = vld [vmem:[#allocation2 + $0x9b0] sm:$0xff]  ;;  %v480_v35 = vld [vmem:[#allocation2 + $0x9c8] sm:$0xff] }
  0xf7   :  { %3620 = vmatpush1.bf16.msra.mxu0 %v3619_v55  ;;  %v411_v55 = vld [vmem:[#allocation2 + $0x7a0] sm:$0xff] }
  0xf8   :  { %3844 = vmatpush1.bf16.msra.mxu1 %v3843_v56  ;;  %3622 = vmatprep.subr.bf16.mxu0 %v3621_v57  ;;  %v409_v56 = vld [vmem:[#allocation2 + $0x790] sm:$0xff]  ;;  %v3865_v57 = vpack.c.bf16 %v414_v50, %v410_v49  ;;  %v3643_v63 = vpack.c.bf16 %v411_v55, %v407_v54  ;;  %v454_v49 = vld [vmem:[#allocation2 + $0x8f8] sm:$0xff]  ;;  %v156_v50 = vld [vmem:[%s5676_s0 + $0x88] sm:$0xff]  ;;  %v3661_v54 = vpack.c.bf16 %v452_v47, %v448_v46 }
  0xf9   :  { %3846 = vmatprep.subr.bf16.mxu1 %v3845_v61  ;;  %v418_v61 = vld [vmem:[#allocation2 + $0x7d8] sm:$0xff]  ;;  %v3867_v0 = vpack.c.bf16 %v413_v58, %v409_v56  ;;  %v447_v55 = vld [vmem:[#allocation2 + $0x8c0] sm:$0xff]  ;;  %v3885_v58 = vpack.c.bf16 %v454_v49, %v450_v48  ;;  %v485_v46 = vld [vmem:[#allocation2 + $0x9f0] sm:$0xff] }
  0xfa   :  { %v451_v56 = vld [vmem:[#allocation2 + $0x8e0] sm:$0xff]  ;;  %v488_v47 = vld [vmem:[#allocation2 + $0xa08] sm:$0xff]  ;;  %v490_v49 = vld [vmem:[#allocation2 + $0xa18] sm:$0xff] }
  0xfb   :  { %3624 = vmatpush1.bf16.msra.mxu0 %v3623_v3  ;;  %v419_v3 = vld [vmem:[#allocation2 + $0x7e0] sm:$0xff]  ;;  %v492_v48 = vld [vmem:[#allocation2 + $0xa28] sm:$0xff] }
  0xfc   :  { %3848 = vmatpush1.bf16.msra.mxu1 %v3847_v4  ;;  %3626 = vmatprep.subr.bf16.mxu0 %v3625_v5  ;;  %v417_v4 = vld [vmem:[#allocation2 + $0x7d0] sm:$0xff]  ;;  %v3869_v5 = vpack.c.bf16 %v422_v62, %v418_v61  ;;  %v3647_v11 = vpack.c.bf16 %v419_v3, %v415_v2  ;;  %v460_v61 = vld [vmem:[#allocation2 + $0x928] sm:$0xff]  ;;  %v458_v62 = vld [vmem:[#allocation2 + $0x918] sm:$0xff] }
  0xfd   :  { %3850 = vmatprep.subr.bf16.mxu1 %v3849_v9  ;;  %v426_v9 = vld [vmem:[#allocation2 + $0x818] sm:$0xff]  ;;  %v3871_v12 = vpack.c.bf16 %v421_v6, %v417_v4  ;;  %v3665_v4 = vpack.c.bf16 %v460_v61, %v456_v60  ;;  %v459_v6 = vld [vmem:[#allocation2 + $0x920] sm:$0xff]  ;;  %v500_v60 = vld [vmem:[#allocation2 + $0xa68] sm:$0xff] }
  0xfe   :  { %v162_v2 = vld [vmem:[%s5676_s0 + $0xb8] sm:$0xff] }
  0xff   :  { %3628 = vmatpush1.bf16.msra.mxu0 %v3627_v15  ;;  %v427_v15 = vld [vmem:[#allocation2 + $0x820] sm:$0xff]  ;;  %v498_v61 = vld [vmem:[#allocation2 + $0xa58] sm:$0xff] }
 0x100   :  { %3852 = vmatpush1.bf16.msra.mxu1 %v3851_v16  ;;  %3630 = vmatprep.subr.bf16.mxu0 %v3629_v17  ;;  %v425_v16 = vld [vmem:[#allocation2 + $0x810] sm:$0xff]  ;;  %v3873_v17 = vpack.c.bf16 %v430_v10, %v426_v9  ;;  %v3651_v24 = vpack.c.bf16 %v427_v15, %v423_v14  ;;  %v464_v10 = vld [vmem:[#allocation2 + $0x948] sm:$0xff] }
 0x101   :  { %3854 = vmatprep.subr.bf16.mxu1 %v3853_v21  ;;  %v434_v21 = vld [vmem:[#allocation2 + $0x858] sm:$0xff]  ;;  %v3875_v25 = vpack.c.bf16 %v429_v18, %v425_v16  ;;  %v461_v9 = vld [vmem:[#allocation2 + $0x930] sm:$0xff]  ;;  %v144_v14 = vld [vmem:[%s5676_s0 + $0x28] sm:$0xff] }
 0x102   :  { %v3877_v30 = vpack.c.bf16 %v438_v22, %v434_v21  ;;  %v3891_v16 = vpack.c.bf16 %v461_v9, %v457_v7  ;;  %v463_v18 = vld [vmem:[#allocation2 + $0x940] sm:$0xff]  ;;  %v469_v22 = vld [vmem:[#allocation2 + $0x970] sm:$0xff]  ;;  %v504_v7 = vld [vmem:[#allocation2 + $0xa88] sm:$0xff] }
 0x103   :  { %3632 = vmatpush1.bf16.msra.mxu0 %v3631_v27  ;;  %v431_v27 = vld [vmem:[#allocation2 + $0x840] sm:$0xff]  ;;  %v506_v9 = vld [vmem:[#allocation2 + $0xa98] sm:$0xff] }
 0x104   :  { %3856 = vmatpush1.bf16.msra.mxu1 %v3855_v28  ;;  %3634 = vmatprep.subr.bf16.mxu0 %v3633_v29  ;;  %v435_v28 = vld [vmem:[#allocation2 + $0x860] sm:$0xff]  ;;  %v433_v29 = vld [vmem:[#allocation2 + $0x850] sm:$0xff] }
 0x105   :  { %3858 = vmatprep.subr.bf16.mxu1 %v3857_v33  ;;  %v444_v33 = vld [vmem:[#allocation2 + $0x8a8] sm:$0xff]  ;;  %v3655_v37 = vpack.c.bf16 %v435_v28, %v431_v27  ;;  %v3671_v27 = vpack.c.bf16 %v467_v19, %v463_v18  ;;  %v3895_v28 = vpack.c.bf16 %v469_v22, %v465_v20  ;;  %v509_v18 = vld [vmem:[#allocation2 + $0xab0] sm:$0xff]  ;;  %v518_v22 = vld [vmem:[#allocation2 + $0xaf8] sm:$0xff] }
 0x106   :  { %v512_v19 = vld [vmem:[#allocation2 + $0xac8] sm:$0xff] }
 0x107   :  { %3636 = vmatpush1.bf16.msra.mxu0 %v3635_v39  ;;  %v3879_v39 = vpack.c.bf16 %v437_v31, %v433_v29  ;;  %v475_v31 = vld [vmem:[#allocation2 + $0x9a0] sm:$0xff]  ;;  %v516_v20 = vld [vmem:[#allocation2 + $0xae8] sm:$0xff] }
 0x108   :  { %3860 = vmatpush1.bf16.msra.mxu1 %v3859_v40  ;;  %3638 = vmatprep.subr.bf16.mxu0 %v3637_v41  ;;  %v3657_v40 = vpack.c.bf16 %v444_v33, %v440_v32  ;;  %v439_v41 = vld [vmem:[#allocation2 + $0x880] sm:$0xff]  ;;  %v473_v32 = vld [vmem:[#allocation2 + $0x990] sm:$0xff] }
 0x109   :  { %3862 = vmatprep.subr.bf16.mxu1 %v3861_v45  ;;  %v445_v45 = vld [vmem:[#allocation2 + $0x8b0] sm:$0xff] }
 0x10b   :  { %3640 = vmatpush1.bf16.msra.mxu0 %v3639_v51  ;;  %v3659_v51 = vpack.c.bf16 %v443_v42, %v439_v41  ;;  %v479_v42 = vld [vmem:[#allocation2 + $0x9c0] sm:$0xff] }
 0x10c   :  { %3864 = vmatpush1.bf16.msra.mxu1 %v3863_v52  ;;  %3642 = vmatprep.subr.bf16.mxu0 %v3641_v53  ;;  %v155_v52 = vld [vmem:[%s5676_s0 + $0x80] sm:$0xff]  ;;  %v3883_v53 = vpack.c.bf16 %v445_v45, %v441_v43 }
 0x10d   :  { %3866 = vmatprep.subr.bf16.mxu1 %v3865_v57  ;;  %v449_v57 = vld [vmem:[#allocation2 + $0x8d0] sm:$0xff]  ;;  %v483_v43 = vld [vmem:[#allocation2 + $0x9e0] sm:$0xff] }
 0x10e   :  { %v3887_v3 = vpack.c.bf16 %v453_v59, %v449_v57  ;;  %v496_v59 = vld [vmem:[#allocation2 + $0xa48] sm:$0xff] }
 0x10f   :  { %3644 = vmatpush1.bf16.msra.mxu0 %v3643_v63  ;;  %v462_v63 = vld [vmem:[#allocation2 + $0x938] sm:$0xff] }
 0x110   :  { %3868 = vmatpush1.bf16.msra.mxu1 %v3867_v0  ;;  %3646 = vmatprep.subr.bf16.mxu0 %v3645_v1  ;;  %v163_v0 = vld [vmem:[%s5676_s0 + $0xc0] sm:$0xff]  ;;  %v3663_v1 = vpack.c.bf16 %v451_v56, %v447_v55  ;;  %v3889_v8 = vpack.c.bf16 %v462_v63, %v458_v62  ;;  %v489_v56 = vld [vmem:[#allocation2 + $0xa10] sm:$0xff]  ;;  %v502_v62 = vld [vmem:[#allocation2 + $0xa78] sm:$0xff] }
 0x111   :  { %3870 = vmatprep.subr.bf16.mxu1 %v3869_v5  ;;  %v455_v5 = vld [vmem:[#allocation2 + $0x900] sm:$0xff] }
 0x112   :  { %v3667_v15 = vpack.c.bf16 %v459_v6, %v455_v5  ;;  %v491_v55 = vld [vmem:[#allocation2 + $0xa20] sm:$0xff]  ;;  %v3909_v5 = vpack.c.bf16 %v502_v62, %v498_v61  ;;  %v501_v6 = vld [vmem:[#allocation2 + $0xa70] sm:$0xff] }
 0x113   :  { %3648 = vmatpush1.bf16.msra.mxu0 %v3647_v11  ;;  %v468_v11 = vld [vmem:[#allocation2 + $0x968] sm:$0xff]  ;;  %v535_v62 = vld [vmem:[#allocation2 + $0xb80] sm:$0xff] }
 0x114   :  { %3872 = vmatpush1.bf16.msra.mxu1 %v3871_v12  ;;  %3650 = vmatprep.subr.bf16.mxu0 %v3649_v13  ;;  %v466_v12 = vld [vmem:[#allocation2 + $0x958] sm:$0xff] }
 0x115   :  { %3874 = vmatprep.subr.bf16.mxu1 %v3873_v17  ;;  %v470_v13 = vld [vmem:[#allocation2 + $0x978] sm:$0xff]  ;;  %v3669_v17 = vpack.c.bf16 %v468_v11, %v464_v10 }
 0x116   :  { %791 = vmatmul.mubr.f32.vlgmr.msra.gmra.mrb[0].mxu0 %v141_v23  ;;  %v3893_v21 = vpack.c.bf16 %v470_v13, %v466_v12  ;;  %v510_v10 = vld [vmem:[#allocation2 + $0xab8] sm:$0xff] }
 0x117   :  { %3652 = vmatpush1.bf16.msra.mxu0 %v3651_v24  ;;  %1147 = vmatmul.mubr.f32.vlgmr.msra.gmra.mrb[0].mxu1 %v141_v23  ;;  %v472_v23 = vld [vmem:[#allocation2 + $0x988] sm:$0xff] }
 0x118   :  { %3876 = vmatpush1.bf16.msra.mxu1 %v3875_v25  ;;  %3654 = vmatprep.subr.bf16.mxu0 %v3653_v26  ;;  %v476_v24 = vld [vmem:[#allocation2 + $0x9a8] sm:$0xff]  ;;  %v474_v25 = vld [vmem:[#allocation2 + $0x998] sm:$0xff] }
 0x119   :  { %3878 = vmatprep.subr.bf16.mxu1 %v3877_v30  ;;  %796 = vmatprep.mubr.f32.mxu0 %v149_v36  ;;  %v478_v26 = vld [vmem:[#allocation2 + $0x9b8] sm:$0xff]  ;;  %v3673_v29 = vpack.c.bf16 %v476_v24, %v472_v23  ;;  %v471_v30 = vld [vmem:[#allocation2 + $0x980] sm:$0xff] }
 0x11a   :  { %1152 = vmatprep.mubr.f32.mxu1 %v149_v36  ;;  %797 = vmatmul.mubr.f32.gmra.mrb[2].mxu0 %v148_v38  ;;  %v3897_v33 = vpack.c.bf16 %v478_v26, %v474_v25  ;;  %v484_v36 = vld [vmem:[#allocation2 + $0x9e8] sm:$0xff]  ;;  %v3693_v25 = vpack.c.bf16 %v516_v20, %v512_v19  ;;  %v511_v26 = vld [vmem:[#allocation2 + $0xac0] sm:$0xff] }
 0x11b   :  { %3656 = vmatpush1.bf16.msra.mxu0 %v3655_v37  ;;  %1153 = vmatmul.mubr.f32.gmra.mrb[2].mxu1 %v148_v38  ;;  %v482_v37 = vld [vmem:[#allocation2 + $0x9d8] sm:$0xff]  ;;  %v3677_v41 = vpack.c.bf16 %v484_v36, %v480_v35 }
 0x11c   :  { %3880 = vmatpush1.bf16.msra.mxu1 %v3879_v39  ;;  %3658 = vmatprep.subr.bf16.mxu0 %v3657_v40  ;;  %v486_v38 = vld [vmem:[#allocation2 + $0x9f8] sm:$0xff]  ;;  %v3675_v39 = vpack.c.bf16 %v475_v31, %v471_v30  ;;  %v3899_v40 = vpack.c.bf16 %v477_v34, %v473_v32  ;;  %v517_v30 = vld [vmem:[#allocation2 + $0xaf0] sm:$0xff]  ;;  %v520_v31 = vld [vmem:[#allocation2 + $0xb08] sm:$0xff] }
 0x11d   :  { %3882 = vmatprep.subr.bf16.mxu1 %v3881_v44  ;;  %802 = vmatprep.mubr.f32.mxu0 %v156_v50  ;;  %v481_v44 = vld [vmem:[#allocation2 + $0x9d0] sm:$0xff]  ;;  %v3901_v45 = vpack.c.bf16 %v486_v38, %v482_v37  ;;  %v524_v32 = vld [vmem:[#allocation2 + $0xb28] sm:$0xff]  ;;  %v526_v34 = vld [vmem:[#allocation2 + $0xb38] sm:$0xff] }
 0x11e   :  { %1158 = vmatprep.mubr.f32.mxu1 %v156_v50  ;;  %803 = vmatmul.mubr.f32.gmra.mrb[4].mxu0 %v155_v52  ;;  %v494_v50 = vld [vmem:[#allocation2 + $0xa38] sm:$0xff]  ;;  %v3697_v37 = vpack.c.bf16 %v524_v32, %v520_v31  ;;  %v519_v38 = vld [vmem:[#allocation2 + $0xb00] sm:$0xff] }
 0x11f   :  { %3660 = vmatpush1.bf16.msra.mxu0 %v3659_v51  ;;  %1159 = vmatmul.mubr.f32.gmra.mrb[4].mxu1 %v155_v52  ;;  %v3679_v51 = vpack.c.bf16 %v483_v43, %v479_v42  ;;  %v3903_v52 = vpack.c.bf16 %v485_v46, %v481_v44  ;;  %v3905_v57 = vpack.c.bf16 %v494_v50, %v490_v49  ;;  %v525_v42 = vld [vmem:[#allocation2 + $0xb30] sm:$0xff]  ;;  %v528_v43 = vld [vmem:[#allocation2 + $0xb48] sm:$0xff]  ;;  %v534_v46 = vld [vmem:[#allocation2 + $0xb78] sm:$0xff] }
 0x120   :  { %3884 = vmatpush1.bf16.msra.mxu1 %v3883_v53  ;;  %3662 = vmatprep.subr.bf16.mxu0 %v3661_v54  ;;  %v3681_v53 = vpack.c.bf16 %v492_v48, %v488_v47  ;;  %v487_v54 = vld [vmem:[#allocation2 + $0xa00] sm:$0xff]  ;;  %v532_v44 = vld [vmem:[#allocation2 + $0xb68] sm:$0xff] }
 0x121   :  { %3886 = vmatprep.subr.bf16.mxu1 %v3885_v58  ;;  %808 = vmatprep.mubr.f32.mxu0 %v163_v0  ;;  %v493_v58 = vld [vmem:[#allocation2 + $0xa30] sm:$0xff]  ;;  %v3683_v63 = vpack.c.bf16 %v491_v55, %v487_v54  ;;  %v3701_v49 = vpack.c.bf16 %v532_v44, %v528_v43  ;;  %v527_v50 = vld [vmem:[#allocation2 + $0xb40] sm:$0xff]  ;;  %v536_v55 = vld [vmem:[#allocation2 + $0xb88] sm:$0xff] }
 0x122   :  { %1164 = vmatprep.mubr.f32.mxu1 %v163_v0  ;;  %809 = vmatmul.mubr.f32.gmra.mrb[6].mxu0 %v162_v2  ;;  %v3907_v0 = vpack.c.bf16 %v493_v58, %v489_v56  ;;  %v533_v54 = vld [vmem:[#allocation2 + $0xb70] sm:$0xff]  ;;  %v540_v56 = vld [vmem:[#allocation2 + $0xba8] sm:$0xff]  ;;  %v542_v58 = vld [vmem:[#allocation2 + $0xbb8] sm:$0xff] }
 0x123   :  { %3664 = vmatpush1.bf16.msra.mxu0 %v3663_v1  ;;  %1165 = vmatmul.mubr.f32.gmra.mrb[6].mxu1 %v162_v2  ;;  %v3685_v1 = vpack.c.bf16 %v500_v60, %v496_v59  ;;  %v495_v2 = vld [vmem:[#allocation2 + $0xa40] sm:$0xff]  ;;  %v3705_v61 = vpack.c.bf16 %v540_v56, %v536_v55  ;;  %v574_v43 = vld [vmem:[#allocation2 + $0xcb8] sm:$0xff]  ;;  %v580_v55 = vld [vmem:[#allocation2 + $0xce8] sm:$0xff] }
 0x124   :  { %3888 = vmatpush1.bf16.msra.mxu1 %v3887_v3  ;;  %3666 = vmatprep.subr.bf16.mxu0 %v3665_v4  ;;  %v499_v3 = vld [vmem:[#allocation2 + $0xa60] sm:$0xff]  ;;  %v497_v4 = vld [vmem:[#allocation2 + $0xa50] sm:$0xff]  ;;  %v578_v56 = vld [vmem:[#allocation2 + $0xcd8] sm:$0xff] }
 0x125   :  { %3890 = vmatprep.subr.bf16.mxu1 %v3889_v8  ;;  %879 = vmatprep.mubr.f32.mxu0 %v144_v14  ;;  %v508_v8 = vld [vmem:[#allocation2 + $0xaa8] sm:$0xff]  ;;  %v3687_v11 = vpack.c.bf16 %v499_v3, %v495_v2  ;;  %v3911_v12 = vpack.c.bf16 %v501_v6, %v497_v4  ;;  %v541_v2 = vld [vmem:[#allocation2 + $0xbb0] sm:$0xff]  ;;  %v550_v6 = vld [vmem:[#allocation2 + $0xbf8] sm:$0xff] }
 0x126   :  { %1235 = vmatprep.mubr.f32.mxu1 %v144_v14  ;;  %v3689_v13 = vpack.c.bf16 %v508_v8, %v504_v7  ;;  %v503_v14 = vld [vmem:[#allocation2 + $0xa80] sm:$0xff]  ;;  %v544_v3 = vld [vmem:[#allocation2 + $0xbc8] sm:$0xff] }
 0x127   :  { %3668 = vmatpush1.bf16.msra.mxu0 %v3667_v15  ;;  %v507_v15 = vld [vmem:[#allocation2 + $0xaa0] sm:$0xff]  ;;  %v548_v4 = vld [vmem:[#allocation2 + $0xbe8] sm:$0xff] }
 0x128   :  { %3892 = vmatpush1.bf16.msra.mxu1 %v3891_v16  ;;  %3670 = vmatprep.subr.bf16.mxu0 %v3669_v17  ;;  %v505_v16 = vld [vmem:[#allocation2 + $0xa90] sm:$0xff]  ;;  %v3913_v17 = vpack.c.bf16 %v510_v10, %v506_v9  ;;  %v3691_v23 = vpack.c.bf16 %v507_v15, %v503_v14  ;;  %v3709_v9 = vpack.c.bf16 %v548_v4, %v544_v3  ;;  %v543_v10 = vld [vmem:[#allocation2 + $0xbc0] sm:$0xff]  ;;  %v552_v15 = vld [vmem:[#allocation2 + $0xc08] sm:$0xff] }
 0x129   :  { %3894 = vmatprep.subr.bf16.mxu1 %v3893_v21  ;;  %v514_v21 = vld [vmem:[#allocation2 + $0xad8] sm:$0xff]  ;;  %v3915_v24 = vpack.c.bf16 %v509_v18, %v505_v16  ;;  %v549_v14 = vld [vmem:[#allocation2 + $0xbf0] sm:$0xff]  ;;  %v556_v16 = vld [vmem:[#allocation2 + $0xc28] sm:$0xff] }
 0x12a   :  { %v558_v18 = vld [vmem:[#allocation2 + $0xc38] sm:$0xff]  ;;  %v143_v31 = vld [vmem:[%s5676_s0 + $0x20] sm:$0xff]  ;;  %v581_v3 = vld [vmem:[#allocation2 + $0xcf0] sm:$0xff] }
 0x12b   :  { %3672 = vmatpush1.bf16.msra.mxu0 %v3671_v27  ;;  %v515_v27 = vld [vmem:[#allocation2 + $0xae0] sm:$0xff]  ;;  %v584_v4 = vld [vmem:[#allocation2 + $0xd08] sm:$0xff] }
 0x12c   :  { %3896 = vmatpush1.bf16.msra.mxu1 %v3895_v28  ;;  %3674 = vmatprep.subr.bf16.mxu0 %v3673_v29  ;;  %v513_v28 = vld [vmem:[#allocation2 + $0xad0] sm:$0xff]  ;;  %v3917_v29 = vpack.c.bf16 %v518_v22, %v514_v21  ;;  %v3695_v35 = vpack.c.bf16 %v515_v27, %v511_v26  ;;  %v3713_v21 = vpack.c.bf16 %v556_v16, %v552_v15  ;;  %v551_v22 = vld [vmem:[#allocation2 + $0xc00] sm:$0xff]  ;;  %v560_v27 = vld [vmem:[#allocation2 + $0xc48] sm:$0xff] }
 0x12d   :  { %3898 = vmatprep.subr.bf16.mxu1 %v3897_v33  ;;  %v522_v33 = vld [vmem:[#allocation2 + $0xb18] sm:$0xff]  ;;  %v3919_v36 = vpack.c.bf16 %v517_v30, %v513_v28  ;;  %v557_v26 = vld [vmem:[#allocation2 + $0xc30] sm:$0xff]  ;;  %v564_v28 = vld [vmem:[#allocation2 + $0xc68] sm:$0xff] }
 0x12e   :  { %v566_v30 = vld [vmem:[#allocation2 + $0xc78] sm:$0xff]  ;;  %v151_v44 = vld [vmem:[%s5676_s0 + $0x60] sm:$0xff]  ;;  %v585_v15 = vld [vmem:[#allocation2 + $0xd10] sm:$0xff] }
 0x12f   :  { %3676 = vmatpush1.bf16.msra.mxu0 %v3675_v39  ;;  %v523_v39 = vld [vmem:[#allocation2 + $0xb20] sm:$0xff] }
 0x130   :  { %3900 = vmatpush1.bf16.msra.mxu1 %v3899_v40  ;;  %3678 = vmatprep.subr.bf16.mxu0 %v3677_v41  ;;  %v521_v40 = vld [vmem:[#allocation2 + $0xb10] sm:$0xff]  ;;  %v3921_v41 = vpack.c.bf16 %v526_v34, %v522_v33  ;;  %v3699_v47 = vpack.c.bf16 %v523_v39, %v519_v38  ;;  %v3717_v34 = vpack.c.bf16 %v564_v28, %v560_v27 }
 0x131   :  { %3902 = vmatprep.subr.bf16.mxu1 %v3901_v45  ;;  %v530_v45 = vld [vmem:[#allocation2 + $0xb58] sm:$0xff]  ;;  %v3923_v48 = vpack.c.bf16 %v525_v42, %v521_v40  ;;  %v565_v39 = vld [vmem:[#allocation2 + $0xc70] sm:$0xff]  ;;  %v568_v40 = vld [vmem:[#allocation2 + $0xc88] sm:$0xff] }
 0x132   :  { %v570_v42 = vld [vmem:[#allocation2 + $0xc98] sm:$0xff]  ;;  %v593_v27 = vld [vmem:[#allocation2 + $0xd50] sm:$0xff] }
 0x133   :  { %3680 = vmatpush1.bf16.msra.mxu0 %v3679_v51  ;;  %v531_v51 = vld [vmem:[#allocation2 + $0xb60] sm:$0xff] }
 0x134   :  { %3904 = vmatpush1.bf16.msra.mxu1 %v3903_v52  ;;  %3682 = vmatprep.subr.bf16.mxu0 %v3681_v53  ;;  %v529_v52 = vld [vmem:[#allocation2 + $0xb50] sm:$0xff]  ;;  %v3925_v53 = vpack.c.bf16 %v534_v46, %v530_v45  ;;  %v3703_v59 = vpack.c.bf16 %v531_v51, %v527_v50  ;;  %v150_v46 = vld [vmem:[%s5676_s0 + $0x58] sm:$0xff]  ;;  %v571_v50 = vld [vmem:[#allocation2 + $0xca0] sm:$0xff] }
 0x135   :  { %3906 = vmatprep.subr.bf16.mxu1 %v3905_v57  ;;  %v538_v57 = vld [vmem:[#allocation2 + $0xb98] sm:$0xff]  ;;  %v3927_v60 = vpack.c.bf16 %v533_v54, %v529_v52  ;;  %v569_v51 = vld [vmem:[#allocation2 + $0xc90] sm:$0xff]  ;;  %v3945_v52 = vpack.c.bf16 %v574_v43, %v570_v42  ;;  %v576_v54 = vld [vmem:[#allocation2 + $0xcc8] sm:$0xff] }
 0x136   :  { %v605_v42 = vld [vmem:[#allocation2 + $0xdb0] sm:$0xff]  ;;  %v608_v43 = vld [vmem:[#allocation2 + $0xdc8] sm:$0xff] }
 0x137   :  { %3684 = vmatpush1.bf16.msra.mxu0 %v3683_v63  ;;  %v539_v63 = vld [vmem:[#allocation2 + $0xba0] sm:$0xff] }
 0x138   :  { %3908 = vmatpush1.bf16.msra.mxu1 %v3907_v0  ;;  %3686 = vmatprep.subr.bf16.mxu0 %v3685_v1  ;;  %v537_v0 = vld [vmem:[#allocation2 + $0xb90] sm:$0xff]  ;;  %v3929_v1 = vpack.c.bf16 %v542_v58, %v538_v57  ;;  %v3707_v7 = vpack.c.bf16 %v539_v63, %v535_v62  ;;  %v582_v57 = vld [vmem:[#allocation2 + $0xcf8] sm:$0xff]  ;;  %v3725_v62 = vpack.c.bf16 %v580_v55, %v576_v54  ;;  %v575_v63 = vld [vmem:[#allocation2 + $0xcc0] sm:$0xff] }
 0x139   :  { %3910 = vmatprep.subr.bf16.mxu1 %v3909_v5  ;;  %v546_v5 = vld [vmem:[#allocation2 + $0xbd8] sm:$0xff]  ;;  %v3931_v8 = vpack.c.bf16 %v541_v2, %v537_v0  ;;  %v579_v0 = vld [vmem:[#allocation2 + $0xce0] sm:$0xff]  ;;  %v3949_v2 = vpack.c.bf16 %v582_v57, %v578_v56  ;;  %v613_v54 = vld [vmem:[#allocation2 + $0xdf0] sm:$0xff] }
 0x13a   :  { %v158_v58 = vld [vmem:[%s5676_s0 + $0x98] sm:$0xff]  ;;  %v1366_v55 = vld [vmem:[#allocation7 + $0x8] sm:$0xff] }
 0x13b   :  { %3688 = vmatpush1.bf16.msra.mxu0 %v3687_v11  ;;  %v547_v11 = vld [vmem:[#allocation2 + $0xbe0] sm:$0xff] }
 0x13c   :  { %3912 = vmatpush1.bf16.msra.mxu1 %v3911_v12  ;;  %3690 = vmatprep.subr.bf16.mxu0 %v3689_v13  ;;  %v545_v12 = vld [vmem:[#allocation2 + $0xbd0] sm:$0xff]  ;;  %v3933_v13 = vpack.c.bf16 %v550_v6, %v546_v5  ;;  %v3711_v19 = vpack.c.bf16 %v547_v11, %v543_v10  ;;  %v588_v5 = vld [vmem:[#allocation2 + $0xd28] sm:$0xff]  ;;  %v586_v6 = vld [vmem:[#allocation2 + $0xd18] sm:$0xff] }
 0x13d   :  { %3914 = vmatprep.subr.bf16.mxu1 %v3913_v17  ;;  %v554_v17 = vld [vmem:[#allocation2 + $0xc18] sm:$0xff]  ;;  %v3935_v20 = vpack.c.bf16 %v549_v14, %v545_v12  ;;  %v164_v10 = vld [vmem:[%s5676_s0 + $0xc8] sm:$0xff]  ;;  %v3729_v12 = vpack.c.bf16 %v588_v5, %v584_v4  ;;  %v587_v14 = vld [vmem:[#allocation2 + $0xd20] sm:$0xff] }
 0x13e   :  { %v1368_v56 = vld [vmem:[#allocation7 + $0x18] sm:$0xff]  ;;  %v1371_v4 = vld [vmem:[#allocation7 + $0x30] sm:$0xff]  ;;  %v1374_v5 = vld [vmem:[#allocation7 + $0x48] sm:$0xff] }
 0x13f   :  { %3692 = vmatpush1.bf16.msra.mxu0 %v3691_v23  ;;  %v555_v23 = vld [vmem:[#allocation2 + $0xc20] sm:$0xff] }
 0x140   :  { %3916 = vmatpush1.bf16.msra.mxu1 %v3915_v24  ;;  %3694 = vmatprep.subr.bf16.mxu0 %v3693_v25  ;;  %v553_v24 = vld [vmem:[#allocation2 + $0xc10] sm:$0xff]  ;;  %v3937_v25 = vpack.c.bf16 %v558_v18, %v554_v17  ;;  %v3715_v32 = vpack.c.bf16 %v555_v23, %v551_v22  ;;  %v592_v18 = vld [vmem:[#allocation2 + $0xd48] sm:$0xff] }
 0x141   :  { %3918 = vmatprep.subr.bf16.mxu1 %v3917_v29  ;;  %v562_v29 = vld [vmem:[#allocation2 + $0xc58] sm:$0xff]  ;;  %v3939_v33 = vpack.c.bf16 %v557_v26, %v553_v24  ;;  %v589_v17 = vld [vmem:[#allocation2 + $0xd30] sm:$0xff]  ;;  %v595_v26 = vld [vmem:[#allocation2 + $0xd60] sm:$0xff] }
 0x142   :  { %v3941_v38 = vpack.c.bf16 %v566_v30, %v562_v29  ;;  %v3955_v23 = vpack.c.bf16 %v589_v17, %v585_v15  ;;  %v597_v29 = vld [vmem:[#allocation2 + $0xd70] sm:$0xff]  ;;  %v600_v30 = vld [vmem:[#allocation2 + $0xd88] sm:$0xff] }
 0x143   :  { %3696 = vmatpush1.bf16.msra.mxu0 %v3695_v35  ;;  %v559_v35 = vld [vmem:[#allocation2 + $0xc40] sm:$0xff] }
 0x144   :  { %3920 = vmatpush1.bf16.msra.mxu1 %v3919_v36  ;;  %3698 = vmatprep.subr.bf16.mxu0 %v3697_v37  ;;  %v563_v36 = vld [vmem:[#allocation2 + $0xc60] sm:$0xff]  ;;  %v561_v37 = vld [vmem:[#allocation2 + $0xc50] sm:$0xff] }
 0x145   :  { %3922 = vmatprep.subr.bf16.mxu1 %v3921_v41  ;;  %v572_v41 = vld [vmem:[#allocation2 + $0xca8] sm:$0xff]  ;;  %v3719_v45 = vpack.c.bf16 %v563_v36, %v559_v35  ;;  %v3959_v36 = vpack.c.bf16 %v597_v29, %v593_v27  ;;  %v1388_v27 = vld [vmem:[#allocation7 + $0xb8] sm:$0xff] }
 0x146   :  { %v1377_v17 = vld [vmem:[#allocation7 + $0x60] sm:$0xff] }
 0x147   :  { %3700 = vmatpush1.bf16.msra.mxu0 %v3699_v47  ;;  %v3943_v47 = vpack.c.bf16 %v565_v39, %v561_v37  ;;  %v603_v39 = vld [vmem:[#allocation2 + $0xda0] sm:$0xff] }
 0x148   :  { %3924 = vmatpush1.bf16.msra.mxu1 %v3923_v48  ;;  %3702 = vmatprep.subr.bf16.mxu0 %v3701_v49  ;;  %v3721_v48 = vpack.c.bf16 %v572_v41, %v568_v40  ;;  %v567_v49 = vld [vmem:[#allocation2 + $0xc80] sm:$0xff]  ;;  %v601_v40 = vld [vmem:[#allocation2 + $0xd90] sm:$0xff] }
 0x149   :  { %3926 = vmatprep.subr.bf16.mxu1 %v3925_v53  ;;  %v573_v53 = vld [vmem:[#allocation2 + $0xcb0] sm:$0xff] }
 0x14b   :  { %3704 = vmatpush1.bf16.msra.mxu0 %v3703_v59  ;;  %v3723_v59 = vpack.c.bf16 %v571_v50, %v567_v49  ;;  %v607_v50 = vld [vmem:[#allocation2 + $0xdc0] sm:$0xff] }
 0x14c   :  { %3928 = vmatpush1.bf16.msra.mxu1 %v3927_v60  ;;  %3706 = vmatprep.subr.bf16.mxu0 %v3705_v61  ;;  %v157_v60 = vld [vmem:[%s5676_s0 + $0x90] sm:$0xff]  ;;  %v3947_v61 = vpack.c.bf16 %v573_v53, %v569_v51  ;;  %v611_v51 = vld [vmem:[#allocation2 + $0xde0] sm:$0xff] }
 0x14d   :  { %3930 = vmatprep.subr.bf16.mxu1 %v3929_v1  ;;  %v577_v1 = vld [vmem:[#allocation2 + $0xcd0] sm:$0xff]  ;;  %v3743_v57 = vpack.c.bf16 %v611_v51, %v607_v50 }
 0x14e   :  { %v3951_v11 = vpack.c.bf16 %v581_v3, %v577_v1  ;;  %v1369_v3 = vld [vmem:[#allocation7 + $0x20] sm:$0xff]  ;;  %v1399_v50 = vld [vmem:[#allocation7 + $0x110] sm:$0xff]  ;;  %v1402_v51 = vld [vmem:[#allocation7 + $0x128] sm:$0xff] }
 0x14f   :  { %3708 = vmatpush1.bf16.msra.mxu0 %v3707_v7  ;;  %v590_v7 = vld [vmem:[#allocation2 + $0xd38] sm:$0xff] }
 0x150   :  { %3932 = vmatpush1.bf16.msra.mxu1 %v3931_v8  ;;  %3710 = vmatprep.subr.bf16.mxu0 %v3709_v9  ;;  %v165_v8 = vld [vmem:[%s5676_s0 + $0xd0] sm:$0xff]  ;;  %v3727_v9 = vpack.c.bf16 %v579_v0, %v575_v63  ;;  %v3953_v16 = vpack.c.bf16 %v590_v7, %v586_v6  ;;  %v1372_v63 = vld [vmem:[#allocation7 + $0x38] sm:$0xff]  ;;  %v152_v7 = vld [vmem:[%s5676_s0 + $0x68] sm:$0xff] }
 0x151   :  { %3934 = vmatprep.subr.bf16.mxu1 %v3933_v13  ;;  %v583_v13 = vld [vmem:[#allocation2 + $0xd00] sm:$0xff]  ;;  %v145_v0 = vld [vmem:[%s5676_s0 + $0x30] sm:$0xff] }
 0x152   :  { %v3731_v22 = vpack.c.bf16 %v587_v14, %v583_v13  ;;  %v1376_v6 = vld [vmem:[#allocation7 + $0x58] sm:$0xff] }
 0x153   :  { %3712 = vmatpush1.bf16.msra.mxu0 %v3711_v19  ;;  %v596_v19 = vld [vmem:[#allocation2 + $0xd68] sm:$0xff]  ;;  %v1380_v13 = vld [vmem:[#allocation7 + $0x78] sm:$0xff] }
 0x154   :  { %3936 = vmatpush1.bf16.msra.mxu1 %v3935_v20  ;;  %3714 = vmatprep.subr.bf16.mxu0 %v3713_v21  ;;  %v594_v20 = vld [vmem:[#allocation2 + $0xd58] sm:$0xff]  ;;  %v3733_v24 = vpack.c.bf16 %v596_v19, %v592_v18  ;;  %v159_v14 = vld [vmem:[%s5676_s0 + $0xa0] sm:$0xff]  ;;  %v1382_v19 = vld [vmem:[#allocation7 + $0x88] sm:$0xff] }
 0x155   :  { %3938 = vmatprep.subr.bf16.mxu1 %v3937_v25  ;;  %v598_v21 = vld [vmem:[#allocation2 + $0xd78] sm:$0xff]  ;;  %v591_v25 = vld [vmem:[#allocation2 + $0xd40] sm:$0xff] }
 0x156   :  { %880 = vmatmul.mubr.f32.vlgmr.msra.gmra.mrb[0].mxu0 %v143_v31  ;;  %v3957_v28 = vpack.c.bf16 %v598_v21, %v594_v20  ;;  %v3735_v35 = vpack.c.bf16 %v595_v26, %v591_v25  ;;  %v1379_v18 = vld [vmem:[#allocation7 + $0x70] sm:$0xff]  ;;  %v1384_v20 = vld [vmem:[#allocation7 + $0x98] sm:$0xff]  ;;  %v1386_v26 = vld [vmem:[#allocation7 + $0xa8] sm:$0xff] }
 0x157   :  { %3716 = vmatpush1.bf16.msra.mxu0 %v3715_v32  ;;  %1236 = vmatmul.mubr.f32.vlgmr.msra.gmra.mrb[0].mxu1 %v143_v31  ;;  %v604_v31 = vld [vmem:[#allocation2 + $0xda8] sm:$0xff]  ;;  %v5097_v32 = vmov 0.0   ;;  %v166_v21 = vld [vmem:[%s5676_s0 + $0xd8] sm:$0xff]  ;;  %v3989_v29 = vpack.c.bf16 %v1388_v27, %v1386_v26 }
 0x158   :  { %3940 = vmatpush1.bf16.msra.mxu1 %v3939_v33  ;;  %3718 = vmatprep.subr.bf16.mxu0 %v3717_v34  ;;  %v602_v33 = vld [vmem:[#allocation2 + $0xd98] sm:$0xff]  ;;  %v3737_v37 = vpack.c.bf16 %v604_v31, %v600_v30  ;;  %v1385_v30 = vld [vmem:[#allocation7 + $0xa0] sm:$0xff] }
 0x159   :  { %3942 = vmatprep.subr.bf16.mxu1 %v3941_v38  ;;  %885 = vmatprep.mubr.f32.mxu0 %v151_v44  ;;  %v606_v34 = vld [vmem:[#allocation2 + $0xdb8] sm:$0xff]  ;;  %v599_v38 = vld [vmem:[#allocation2 + $0xd80] sm:$0xff] }
 0x15a   :  { %1241 = vmatprep.mubr.f32.mxu1 %v151_v44  ;;  %886 = vmatmul.mubr.f32.gmra.mrb[2].mxu0 %v150_v46  ;;  %v3961_v41 = vpack.c.bf16 %v606_v34, %v602_v33  ;;  %v612_v44 = vld [vmem:[#allocation2 + $0xde8] sm:$0xff]  ;;  %v1383_v25 = vld [vmem:[#allocation7 + $0x90] sm:$0xff]  ;;  %v1392_v34 = vld [vmem:[#allocation7 + $0xd8] sm:$0xff] }
 0x15b   :  { %3720 = vmatpush1.bf16.msra.mxu0 %v3719_v45  ;;  %1242 = vmatmul.mubr.f32.gmra.mrb[2].mxu1 %v150_v46  ;;  %v610_v45 = vld [vmem:[#allocation2 + $0xdd8] sm:$0xff]  ;;  %v3741_v49 = vpack.c.bf16 %v612_v44, %v608_v43  ;;  %v1390_v33 = vld [vmem:[#allocation7 + $0xc8] sm:$0xff]  ;;  %v1393_v43 = vld [vmem:[#allocation7 + $0xe0] sm:$0xff] }
 0x15c   :  { %3944 = vmatpush1.bf16.msra.mxu1 %v3943_v47  ;;  %3722 = vmatprep.subr.bf16.mxu0 %v3721_v48  ;;  %v614_v46 = vld [vmem:[#allocation2 + $0xdf8] sm:$0xff]  ;;  %v3739_v47 = vpack.c.bf16 %v603_v39, %v599_v38  ;;  %v3963_v48 = vpack.c.bf16 %v605_v42, %v601_v40  ;;  %v1394_v39 = vld [vmem:[#allocation7 + $0xe8] sm:$0xff]  ;;  %v1425_v27 = vld [vmem:[#allocation7 + $0x1e0] sm:$0xff] }
 0x15d   :  { %3946 = vmatprep.subr.bf16.mxu1 %v3945_v52  ;;  %891 = vmatprep.mubr.f32.mxu0 %v158_v58  ;;  %v609_v52 = vld [vmem:[#allocation2 + $0xdd0] sm:$0xff]  ;;  %v3965_v53 = vpack.c.bf16 %v614_v46, %v610_v45  ;;  %v1396_v40 = vld [vmem:[#allocation7 + $0xf8] sm:$0xff] }
 0x15e   :  { %1247 = vmatprep.mubr.f32.mxu1 %v158_v58  ;;  %892 = vmatmul.mubr.f32.gmra.mrb[4].mxu0 %v157_v60  ;;  %v3967_v58 = vpack.c.bf16 %v613_v54, %v609_v52  ;;  %v1387_v31 = vld [vmem:[#allocation7 + $0xb0] sm:$0xff]  ;;  %v3997_v42 = vpack.c.bf16 %v1396_v40, %v1394_v39  ;;  %v1398_v45 = vld [vmem:[#allocation7 + $0x108] sm:$0xff]  ;;  %v1400_v46 = vld [vmem:[#allocation7 + $0x118] sm:$0xff] }
 0x15f   :  { %3724 = vmatpush1.bf16.msra.mxu0 %v3723_v59  ;;  %1248 = vmatmul.mubr.f32.gmra.mrb[4].mxu1 %v157_v60  ;;  %v3969_v59 = vpack.c.bf16 %v1368_v56, %v1366_v55  ;;  %v1365_v60 = vld [vmem:[#allocation7] sm:$0xff]  ;;  %v1391_v38 = vld [vmem:[#allocation7 + $0xd0] sm:$0xff]  ;;  %v1404_v52 = vld [vmem:[#allocation7 + $0x138] sm:$0xff] }
 0x160   :  { %3948 = vmatpush1.bf16.msra.mxu1 %v3947_v61  ;;  %3726 = vmatprep.subr.bf16.mxu0 %v3725_v62  ;;  %v1367_v61 = vld [vmem:[#allocation7 + $0x10] sm:$0xff]  ;;  %v1370_v62 = vld [vmem:[#allocation7 + $0x28] sm:$0xff]  ;;  %v4005_v54 = vpack.c.bf16 %v1404_v52, %v1402_v51  ;;  %v1401_v55 = vld [vmem:[#allocation7 + $0x120] sm:$0xff]  ;;  %v617_v52 = vlaneseq }
 0x161   :  { %3950 = vmatprep.subr.bf16.mxu1 %v3949_v2  ;;  %897 = vmatprep.mubr.f32.mxu0 %v165_v8  ;;  %v3971_v1 = vpack.c.bf16 %v1367_v61, %v1365_v60  ;;  %v3973_v2 = vpack.c.bf16 %v1372_v63, %v1370_v62  ;;  %v1395_v44 = vld [vmem:[#allocation7 + $0xf0] sm:$0xff]  ;;  %v1405_v61 = vld [vmem:[#allocation7 + $0x140] sm:$0xff]  ;;  %v1410_v63 = vld [vmem:[#allocation7 + $0x168] sm:$0xff] }
 0x162   :  { %1253 = vmatprep.mubr.f32.mxu1 %v165_v8  ;;  %898 = vmatmul.mubr.f32.gmra.mrb[6].mxu0 %v164_v10  ;;  %v3975_v8 = vpack.c.bf16 %v1371_v4, %v1369_v3  ;;  %v1403_v56 = vld [vmem:[#allocation7 + $0x130] sm:$0xff]  ;;  %v1409_v3 = vld [vmem:[#allocation7 + $0x160] sm:$0xff] }
 0x163   :  { %3728 = vmatpush1.bf16.msra.mxu0 %v3727_v9  ;;  %1254 = vmatmul.mubr.f32.gmra.mrb[6].mxu1 %v164_v10  ;;  %v3977_v9 = vpack.c.bf16 %v1376_v6, %v1374_v5  ;;  %v1373_v10 = vld [vmem:[#allocation7 + $0x40] sm:$0xff]  ;;  %v1407_v62 = vld [vmem:[#allocation7 + $0x150] sm:$0xff]  ;;  %v1414_v5 = vld [vmem:[#allocation7 + $0x188] sm:$0xff] }
 0x164   :  { %3952 = vmatpush1.bf16.msra.mxu1 %v3951_v11  ;;  %3730 = vmatprep.subr.bf16.mxu0 %v3729_v12  ;;  %v1375_v11 = vld [vmem:[#allocation7 + $0x50] sm:$0xff]  ;;  %v1378_v12 = vld [vmem:[#allocation7 + $0x68] sm:$0xff]  ;;  %v1416_v6 = vld [vmem:[#allocation7 + $0x198] sm:$0xff] }
 0x165   :  { %3954 = vmatprep.subr.bf16.mxu1 %v3953_v16  ;;  %968 = vmatprep.mubr.f32.mxu0 %v5097_v32  ;;  %v3979_v15 = vpack.c.bf16 %v1375_v11, %v1373_v10  ;;  %v3981_v16 = vpack.c.bf16 %v1380_v13, %v1378_v12  ;;  %v1411_v4 = vld [vmem:[#allocation7 + $0x170] sm:$0xff]  ;;  %v1418_v11 = vld [vmem:[#allocation7 + $0x1a8] sm:$0xff]  ;;  %v1420_v12 = vld [vmem:[#allocation7 + $0x1b8] sm:$0xff] }
 0x166   :  { %1324 = vmatprep.mubr.f32.mxu1 %v5097_v32  ;;  %v1415_v10 = vld [vmem:[#allocation7 + $0x190] sm:$0xff] }
 0x167   :  { %3732 = vmatpush1.bf16.msra.mxu0 %v3731_v22  ;;  %v3983_v22 = vpack.c.bf16 %v1379_v18, %v1377_v17  ;;  %v1422_v17 = vld [vmem:[#allocation7 + $0x1c8] sm:$0xff]  ;;  %v1424_v18 = vld [vmem:[#allocation7 + $0x1d8] sm:$0xff] }
 0x168   :  { %3956 = vmatpush1.bf16.msra.mxu1 %v3955_v23  ;;  %3734 = vmatprep.subr.bf16.mxu0 %v3733_v24  ;;  %v3985_v23 = vpack.c.bf16 %v1384_v20, %v1382_v19  ;;  %v1381_v24 = vld [vmem:[#allocation7 + $0x80] sm:$0xff]  ;;  %v4025_v20 = vpack.c.bf16 %v1424_v18, %v1422_v17  ;;  %v1716_v39 = vld [vmem:[#allocation10 + $0x48] sm:$0xff] }
 0x169   :  { %3958 = vmatprep.subr.bf16.mxu1 %v3957_v28  ;;  %v3987_v28 = vpack.c.bf16 %v1383_v25, %v1381_v24  ;;  %v1426_v24 = vld [vmem:[#allocation7 + $0x1e8] sm:$0xff]  ;;  %v1428_v25 = vld [vmem:[#allocation7 + $0x1f8] sm:$0xff] }
 0x16a   :  { %v4029_v26 = vpack.c.bf16 %v1428_v25, %v1426_v24  ;;  %v1720_v40 = vld [vmem:[#allocation10 + $0x68] sm:$0xff] }
 0x16b   :  { %3736 = vmatpush1.bf16.msra.mxu0 %v3735_v35  ;;  %v3991_v35 = vpack.c.bf16 %v1387_v31, %v1385_v30  ;;  %v1430_v30 = vld [vmem:[#allocation7 + $0x208] sm:$0xff]  ;;  %v1432_v31 = vld [vmem:[#allocation7 + $0x218] sm:$0xff] }
 0x16c   :  { %3960 = vmatpush1.bf16.msra.mxu1 %v3959_v36  ;;  %3738 = vmatprep.subr.bf16.mxu0 %v3737_v37  ;;  %v3993_v36 = vpack.c.bf16 %v1392_v34, %v1390_v33  ;;  %v1389_v37 = vld [vmem:[#allocation7 + $0xc0] sm:$0xff]  ;;  %v4033_v33 = vpack.c.bf16 %v1432_v31, %v1430_v30  ;;  %v1708_v34 = vld [vmem:[#allocation10 + $0x8] sm:$0xff] }
 0x16d   :  { %3962 = vmatprep.subr.bf16.mxu1 %v3961_v41  ;;  %v3995_v41 = vpack.c.bf16 %v1391_v38, %v1389_v37  ;;  %v1711_v38 = vld [vmem:[#allocation10 + $0x20] sm:$0xff] }
 0x16e   :  { %v1438_v18 = vld [vmem:[#allocation7 + $0x248] sm:$0xff] }
 0x16f   :  { %3740 = vmatpush1.bf16.msra.mxu0 %v3739_v47  ;;  %v3999_v47 = vpack.c.bf16 %v1395_v44, %v1393_v43  ;;  %v1715_v43 = vld [vmem:[#allocation10 + $0x40] sm:$0xff] }
 0x170   :  { %3964 = vmatpush1.bf16.msra.mxu1 %v3963_v48  ;;  %3742 = vmatprep.subr.bf16.mxu0 %v3741_v49  ;;  %v4001_v48 = vpack.c.bf16 %v1400_v46, %v1398_v45  ;;  %v1397_v49 = vld [vmem:[#allocation7 + $0x100] sm:$0xff]  ;;  %v1724_v45 = vld [vmem:[#allocation10 + $0x88] sm:$0xff] }
 0x171   :  { %3966 = vmatprep.subr.bf16.mxu1 %v3965_v53  ;;  %v4003_v53 = vpack.c.bf16 %v1399_v50, %v1397_v49  ;;  %v1719_v44 = vld [vmem:[#allocation10 + $0x60] sm:$0xff]  ;;  %v1728_v46 = vld [vmem:[#allocation10 + $0xa8] sm:$0xff] }
 0x172   :  { %v1723_v49 = vld [vmem:[#allocation10 + $0x80] sm:$0xff] }
 0x173   :  { %3744 = vmatpush1.bf16.msra.mxu0 %v3743_v57  ;;  %v1406_v57 = vld [vmem:[#allocation7 + $0x148] sm:$0xff] }
 0x174   :  { %3968 = vmatpush1.bf16.msra.mxu1 %v3967_v58  ;;  %3970 = vmatprep.subr.bf16.mxu0 %v3969_v59  ;;  %v1408_v58 = vld [vmem:[#allocation7 + $0x158] sm:$0xff]  ;;  %v4007_v59 = vpack.c.bf16 %v1403_v56, %v1401_v55  ;;  %v1727_v50 = vld [vmem:[#allocation10 + $0xa0] sm:$0xff] }
 0x175   :  { %v4009_v60 = vpack.c.bf16 %v1408_v58, %v1406_v57  ;;  %v4107_v51 = vpack.c.bf16 %v1727_v50, %v1723_v49  ;;  %v5369_v55 = vld [vmem:[#allocation5] sm:$0xf]  ;;  %v1446_v49 = vld [vmem:[#allocation7 + $0x288] sm:$0xff] }
 0x176   :  { %969 = vmatmul.mubr.f32.vlgmr.msra.gmra.mrb[0].mxu0 %v145_v0  ;;  %v1448_v50 = vld [vmem:[#allocation7 + $0x298] sm:$0xff] }
 0x177   :  { %1325 = vmatmul.mubr.f32.vlgmr.msra.gmra.mrb[0].mxu1 %v145_v0  ;;  %974 = vmatprep.mubr.f32.mxu0 %v5097_v32  ;;  %v1412_v0 = vld [vmem:[#allocation7 + $0x178] sm:$0xff] }
 0x178   :  { %1330 = vmatprep.mubr.f32.mxu1 %v5097_v32  ;;  %3972 = vmatpush1.bf16.msra.mxu0 %v3971_v1  ;;  %v4011_v1 = vpack.c.bf16 %v1407_v62, %v1405_v61 }
 0x179   :  { %3974 = vmatprep.subr.bf16.mxu0 %v3973_v2  ;;  %v4013_v2 = vpack.c.bf16 %v1412_v0, %v1410_v63  ;;  %v1429_v63 = vld [vmem:[#allocation7 + $0x200] sm:$0xff]  ;;  %v1431_v0 = vld [vmem:[#allocation7 + $0x210] sm:$0xff] }
 0x17a   :  { %975 = vmatmul.mubr.f32.gmra.mrb[2].mxu0 %v152_v7 }
 0x17b   :  { %1331 = vmatmul.mubr.f32.gmra.mrb[2].mxu1 %v152_v7  ;;  %980 = vmatprep.mubr.f32.mxu0 %v5097_v32  ;;  %v4015_v7 = vpack.c.bf16 %v1411_v4, %v1409_v3  ;;  %v1434_v3 = vld [vmem:[#allocation7 + $0x228] sm:$0xff]  ;;  %v1436_v4 = vld [vmem:[#allocation7 + $0x238] sm:$0xff] }
 0x17c   :  { %1336 = vmatprep.mubr.f32.mxu1 %v5097_v32  ;;  %3976 = vmatpush1.bf16.msra.mxu0 %v3975_v8  ;;  %v4017_v8 = vpack.c.bf16 %v1416_v6, %v1414_v5 }
 0x17d   :  { %3978 = vmatprep.subr.bf16.mxu0 %v3977_v9  ;;  %v1413_v9 = vld [vmem:[#allocation7 + $0x180] sm:$0xff] }
 0x17e   :  { %981 = vmatmul.mubr.f32.gmra.mrb[4].mxu0 %v159_v14  ;;  %v4019_v13 = vpack.c.bf16 %v1415_v10, %v1413_v9 }
 0x17f   :  { %1337 = vmatmul.mubr.f32.gmra.mrb[4].mxu1 %v159_v14  ;;  %986 = vmatprep.mubr.f32.mxu0 %v5097_v32  ;;  %v4021_v14 = vpack.c.bf16 %v1420_v12, %v1418_v11  ;;  %v4037_v12 = vpack.c.bf16 %v1436_v4, %v1434_v3  ;;  %v1449_v3 = vld [vmem:[#allocation7 + $0x2a0] sm:$0xff]  ;;  %v1451_v4 = vld [vmem:[#allocation7 + $0x2b0] sm:$0xff] }
 0x180   :  { %1342 = vmatprep.mubr.f32.mxu1 %v5097_v32  ;;  %3980 = vmatpush1.bf16.msra.mxu0 %v3979_v15  ;;  %v1417_v15 = vld [vmem:[#allocation7 + $0x1a0] sm:$0xff] }
 0x181   :  { %3982 = vmatprep.subr.bf16.mxu0 %v3981_v16  ;;  %v1419_v16 = vld [vmem:[#allocation7 + $0x1b0] sm:$0xff] }
 0x182   :  { %987 = vmatmul.mubr.f32.gmra.mrb[6].mxu0 %v166_v21  ;;  %v4023_v19 = vpack.c.bf16 %v1419_v16, %v1417_v15 }
 0x183   :  { %1343 = vmatmul.mubr.f32.gmra.mrb[6].mxu1 %v166_v21  ;;  %v1421_v21 = vld [vmem:[#allocation7 + $0x1c0] sm:$0xff] }
 0x184   :  { %3984 = vmatpush1.bf16.msra.mxu0 %v3983_v22  ;;  %1857 = vmatprep.mubr.f32.mxu1 %v5097_v32  ;;  %v1423_v22 = vld [vmem:[#allocation7 + $0x1d0] sm:$0xff] }
 0x185   :  { %3986 = vmatprep.subr.bf16.mxu0 %v3985_v23  ;;  %v4027_v23 = vpack.c.bf16 %v1423_v22, %v1421_v21 }
 0x188   :  { %3988 = vmatpush1.bf16.msra.mxu0 %v3987_v28  ;;  %v1427_v28 = vld [vmem:[#allocation7 + $0x1f0] sm:$0xff] }
 0x189   :  { %3990 = vmatprep.subr.bf16.mxu0 %v3989_v29  ;;  %v4031_v29 = vpack.c.bf16 %v1427_v28, %v1425_v27  ;;  %v1437_v28 = vld [vmem:[#allocation7 + $0x240] sm:$0xff] }
 0x18c   :  { %3992 = vmatpush1.bf16.msra.mxu0 %v3991_v35  ;;  %v1712_v35 = vld [vmem:[#allocation10 + $0x28] sm:$0xff] }
 0x18d   :  { %3994 = vmatprep.subr.bf16.mxu0 %v3993_v36  ;;  %v1707_v36 = vld [vmem:[#allocation10] sm:$0xff]  ;;  %v4097_v37 = vpack.c.bf16 %v1712_v35, %v1708_v34  ;;  %v1444_v35 = vld [vmem:[#allocation7 + $0x278] sm:$0xff] }
 0x18e   :  { %v1442_v34 = vld [vmem:[#allocation7 + $0x268] sm:$0xff] }
 0x18f   :  { %4098 = vmatprep.subr.bf16.mxu1 %v4097_v37 }
 0x190   :  { %3996 = vmatpush1.bf16.msra.mxu0 %v3995_v41  ;;  %v4099_v41 = vpack.c.bf16 %v1711_v38, %v1707_v36 }
 0x191   :  { %3998 = vmatprep.subr.bf16.mxu0 %v3997_v42  ;;  %v4101_v42 = vpack.c.bf16 %v1720_v40, %v1716_v39 }
 0x192   :  { %4100 = vmatpush1.bf16.msra.mxu1 %v4099_v41 }
 0x193   :  { %4102 = vmatprep.subr.bf16.mxu1 %v4101_v42 }
 0x194   :  { %4000 = vmatpush1.bf16.msra.mxu0 %v3999_v47  ;;  %v4103_v47 = vpack.c.bf16 %v1719_v44, %v1715_v43  ;;  %v4045_v43 = vpack.c.bf16 %v1444_v35, %v1442_v34  ;;  %v1441_v44 = vld [vmem:[#allocation7 + $0x260] sm:$0xff]  ;;  %v1467_v35 = vld [vmem:[#allocation7 + $0x330] sm:$0xff] }
 0x195   :  { %4002 = vmatprep.subr.bf16.mxu0 %v4001_v48  ;;  %v4105_v48 = vpack.c.bf16 %v1728_v46, %v1724_v45  ;;  %v1443_v45 = vld [vmem:[#allocation7 + $0x270] sm:$0xff]  ;;  %v1465_v34 = vld [vmem:[#allocation7 + $0x320] sm:$0xff] }
 0x196   :  { %4104 = vmatpush1.bf16.msra.mxu1 %v4103_v47 }
 0x197   :  { %4106 = vmatprep.subr.bf16.mxu1 %v4105_v48 }
 0x198   :  { %4004 = vmatpush1.bf16.msra.mxu0 %v4003_v53  ;;  %v5364_v53 = vshrl.u32 %v617_v52, 7  ;;  %v4047_v52 = vpack.c.bf16 %v1443_v45, %v1441_v44  ;;  %v1476_v44 = vld [vmem:[#allocation7 + $0x378] sm:$0xff] }
 0x199   :  { %4006 = vmatprep.subr.bf16.mxu0 %v4005_v54 }
 0x19a   :  { %4108 = vmatpush1.bf16.msra.mxu1 %v4107_v51  ;;  %v5367_v54 = vsub.s32 0, %v5364_v53  ;;  %v5372_v56 = vsub.s32 1, %v5364_v53  ;;  %v5383_v15 = vsub.s32 3, %v5364_v53 }
 0x19c   :  { %4008 = vmatpush1.bf16.msra.mxu0 %v4007_v59  ;;  %v620_v57 = vrot.slane %v5369_v55, %v5367_v54  ;;  %v624_v58 = vrot.slane %v5369_v55, %v5372_v56  ;;  %v5391_v30 = vrot.slane %v5369_v55, %v5383_v15 }
 0x19d   :  { %4010 = vmatprep.subr.bf16.mxu0 %v4009_v60 }
 0x1a0   :  { %4012 = vmatpush1.bf16.msra.mxu0 %v4011_v1 }
 0x1a1   :  { %4014 = vmatprep.subr.bf16.mxu0 %v4013_v2 }
 0x1a4   :  { %4016 = vmatpush1.bf16.msra.mxu0 %v4015_v7  ;;  %v4035_v7 = vpack.c.bf16 %v1431_v0, %v1429_v63  ;;  %v1450_v0 = vld [vmem:[#allocation7 + $0x2a8] sm:$0xff] }
 0x1a5   :  { %4018 = vmatprep.subr.bf16.mxu0 %v4017_v8 }
 0x1a8   :  { %4020 = vmatpush1.bf16.msra.mxu0 %v4019_v13  ;;  %v1433_v13 = vld [vmem:[#allocation7 + $0x220] sm:$0xff] }
 0x1a9   :  { %4022 = vmatprep.subr.bf16.mxu0 %v4021_v14  ;;  %v1435_v14 = vld [vmem:[#allocation7 + $0x230] sm:$0xff] }
 0x1aa   :  { %v4039_v22 = vpack.c.bf16 %v1435_v14, %v1433_v13  ;;  %v1460_v13 = vld [vmem:[#allocation7 + $0x2f8] sm:$0xff] }
 0x1ac   :  { %4024 = vmatpush1.bf16.msra.mxu0 %v4023_v19  ;;  %v1440_v19 = vld [vmem:[#allocation7 + $0x258] sm:$0xff] }
 0x1ad   :  { %4026 = vmatprep.subr.bf16.mxu0 %v4025_v20  ;;  %v4041_v27 = vpack.c.bf16 %v1440_v19, %v1438_v18  ;;  %v1457_v18 = vld [vmem:[#allocation7 + $0x2e0] sm:$0xff]  ;;  %v1459_v19 = vld [vmem:[#allocation7 + $0x2f0] sm:$0xff] }
 0x1b0   :  { %4028 = vmatpush1.bf16.msra.mxu0 %v4027_v23 }
 0x1b1   :  { %4030 = vmatprep.subr.bf16.mxu0 %v4029_v26 }
 0x1b4   :  { %4032 = vmatpush1.bf16.msra.mxu0 %v4031_v29  ;;  %v1439_v29 = vld [vmem:[#allocation7 + $0x250] sm:$0xff] }
 0x1b5   :  { %4034 = vmatprep.subr.bf16.mxu0 %v4033_v33  ;;  %v4043_v38 = vpack.c.bf16 %v1439_v29, %v1437_v28  ;;  %v1468_v28 = vld [vmem:[#allocation7 + $0x338] sm:$0xff] }
 0x249   :  { %v970_v59 = vpop.f32.mrb[0].mxu0 }
 0x24a   :  { %v4609_v60 = vadd.f32 %v970_v59, %v620_v57  ;;  %v5378_v61 = vpop.f32.mrb[0].mxu1  ;;  %v972_v62 = vpop.f32.mrb[1].mxu0  ;;  %v4049_v59 = vpack.c.bf16 %v1448_v50, %v1446_v49  ;;  %v1475_v49 = vld [vmem:[#allocation7 + $0x370] sm:$0xff]  ;;  %v1478_v50 = vld [vmem:[#allocation7 + $0x388] sm:$0xff] }
 0x24b   :  { %v4610_v1 = vadd.f32 %v972_v62, %v624_v58  ;;  %v1328_v2 = vpop.f32.mrb[1].mxu1  ;;  %v1447_v62 = vld [vmem:[#allocation7 + $0x290] sm:$0xff] }
 0x24c   :  { %v1349_v8 = vmax.f32 %v4609_v60, 0.0  ;;  %v4618_v46 = vadd.f32 %v1328_v2, %v5391_v30  ;;  %v1445_v60 = vld [vmem:[#allocation7 + $0x280] sm:$0xff] }
 0x24d   :  { %v1350_v5 = vmax.f32 %v4610_v1, 0.0  ;;  %v976_v6 = vpop.f32.mrb[2].mxu0  ;;  %v1452_v1 = vld [vmem:[#allocation7 + $0x2b8] sm:$0xff] }
 0x24e   :  { %v4611_v9 = vadd.f32 %v976_v6, %v620_v57  ;;  %v5380_v10 = vpop.f32.mrb[2].mxu1  ;;  %v978_v11 = vpop.f32.mrb[3].mxu0  ;;  %v1352_v63 = vmax.f32 %v4618_v46, 0.0  ;;  %v4053_v2 = vpack.c.bf16 %v1452_v1, %v1450_v0  ;;  %v1456_v6 = vld [vmem:[#allocation7 + $0x2d8] sm:$0xff] }
 0x24f   :  { %v4612_v16 = vadd.f32 %v978_v11, %v624_v58  ;;  %v5385_v17 = vpop.f32.mrb[3].mxu1  ;;  %1569 = vmatprep.mubr.f32.mxu0 %v1350_v5  ;;  %v1454_v5 = vld [vmem:[#allocation7 + $0x2c8] sm:$0xff]  ;;  %v1455_v11 = vld [vmem:[#allocation7 + $0x2d0] sm:$0xff] }
 0x250   :  { %1570 = vmatmul.mubr.f32.vlgmr.msra.gmra.mrb[8].mxu0 %v1349_v8  ;;  %v1353_v23 = vmax.f32 %v4611_v9, 0.0  ;;  %v4057_v8 = vpack.c.bf16 %v1456_v6, %v1454_v5  ;;  %v1453_v9 = vld [vmem:[#allocation7 + $0x2c0] sm:$0xff]  ;;  %v5401_v6 = vsub.s32 2, %v5364_v53 }
 0x251   :  { %v1354_v20 = vmax.f32 %v4612_v16, 0.0  ;;  %4036 = vmatpush1.bf16.msra.mxu0 %v4035_v7  ;;  %v982_v21 = vpop.f32.mrb[4].mxu0  ;;  %v4055_v7 = vpack.c.bf16 %v1451_v4, %v1449_v3  ;;  %v4059_v14 = vpack.c.bf16 %v1455_v11, %v1453_v9  ;;  %v1486_v3 = vld [vmem:[#allocation7 + $0x3c8] sm:$0xff]  ;;  %v1488_v4 = vld [vmem:[#allocation7 + $0x3d8] sm:$0xff]  ;;  %v1487_v9 = vld [vmem:[#allocation7 + $0x3d0] sm:$0xff] }
 0x252   :  { %v4613_v24 = vadd.f32 %v982_v21, %v620_v57  ;;  %v5387_v25 = vpop.f32.mrb[4].mxu1  ;;  %v984_v26 = vpop.f32.mrb[5].mxu0  ;;  %4038 = vmatprep.subr.bf16.mxu0 %v4037_v12  ;;  %v1458_v12 = vld [vmem:[#allocation7 + $0x2e8] sm:$0xff]  ;;  %v1464_v21 = vld [vmem:[#allocation7 + $0x318] sm:$0xff] }
 0x253   :  { %v4614_v31 = vadd.f32 %v984_v26, %v624_v58  ;;  %v5393_v33 = vpop.f32.mrb[5].mxu1  ;;  %1575 = vmatprep.mubr.f32.mxu0 %v1354_v20  ;;  %v4061_v16 = vpack.c.bf16 %v1460_v13, %v1458_v12  ;;  %v1462_v20 = vld [vmem:[#allocation7 + $0x308] sm:$0xff]  ;;  %v1463_v26 = vld [vmem:[#allocation7 + $0x310] sm:$0xff]  ;;  %v1492_v12 = vld [vmem:[#allocation7 + $0x3f8] sm:$0xff] }
 0x254   :  { %1576 = vmatmul.mubr.f32.gmra.mrb[10].mxu0 %v1353_v23  ;;  %v1357_v39 = vmax.f32 %v4613_v24, 0.0  ;;  %v4065_v23 = vpack.c.bf16 %v1464_v21, %v1462_v20  ;;  %v1461_v24 = vld [vmem:[#allocation7 + $0x300] sm:$0xff]  ;;  %v1490_v11 = vld [vmem:[#allocation7 + $0x3e8] sm:$0xff] }
 0x255   :  { %v1358_v36 = vmax.f32 %v4614_v31, 0.0  ;;  %4040 = vmatpush1.bf16.msra.mxu0 %v4039_v22  ;;  %v988_v37 = vpop.f32.mrb[6].mxu0  ;;  %v4063_v22 = vpack.c.bf16 %v1459_v19, %v1457_v18  ;;  %v4067_v29 = vpack.c.bf16 %v1463_v26, %v1461_v24  ;;  %v1489_v18 = vld [vmem:[#allocation7 + $0x3e0] sm:$0xff]  ;;  %v1491_v19 = vld [vmem:[#allocation7 + $0x3f0] sm:$0xff] }
 0x256   :  { %v4615_v40 = vadd.f32 %v988_v37, %v620_v57  ;;  %v5395_v41 = vpop.f32.mrb[6].mxu1  ;;  %v990_v42 = vpop.f32.mrb[7].mxu0  ;;  %4042 = vmatprep.subr.bf16.mxu0 %v4041_v27  ;;  %v1466_v27 = vld [vmem:[#allocation7 + $0x328] sm:$0xff]  ;;  %v1472_v37 = vld [vmem:[#allocation7 + $0x358] sm:$0xff]  ;;  %v4095_v20 = vpack.c.bf16 %v1491_v19, %v1489_v18 }
 0x257   :  { %v4616_v47 = vadd.f32 %v990_v42, %v624_v58  ;;  %v5398_v48 = vpop.f32.mrb[7].mxu1  ;;  %1581 = vmatprep.mubr.f32.mxu0 %v1358_v36  ;;  %v4051_v58 = vpack.c.bf16 %v1447_v62, %v1445_v60  ;;  %v4069_v31 = vpack.c.bf16 %v1468_v28, %v1466_v27  ;;  %v1470_v36 = vld [vmem:[#allocation7 + $0x348] sm:$0xff]  ;;  %v1471_v42 = vld [vmem:[#allocation7 + $0x350] sm:$0xff] }
 0x258   :  { %1582 = vmatmul.mubr.f32.gmra.mrb[12].mxu0 %v1357_v39  ;;  %v1361_v57 = vmax.f32 %v4615_v40, 0.0  ;;  %v4073_v39 = vpack.c.bf16 %v1472_v37, %v1470_v36  ;;  %v1469_v40 = vld [vmem:[#allocation7 + $0x340] sm:$0xff]  ;;  %v1479_v60 = vld [vmem:[#allocation7 + $0x390] sm:$0xff]  ;;  %v1482_v62 = vld [vmem:[#allocation7 + $0x3a8] sm:$0xff] }
 0x259   :  { %v1362_v51 = vmax.f32 %v4616_v47, 0.0  ;;  %4044 = vmatpush1.bf16.msra.mxu0 %v4043_v38  ;;  %v4071_v38 = vpack.c.bf16 %v1467_v35, %v1465_v34  ;;  %v4075_v45 = vpack.c.bf16 %v1471_v42, %v1469_v40  ;;  %v1473_v47 = vld [vmem:[#allocation7 + $0x360] sm:$0xff]  ;;  %v1736_v35 = vld [vmem:[#allocation10 + $0xe8] sm:$0xff] }
 0x25a   :  { %4046 = vmatprep.subr.bf16.mxu0 %v4045_v43  ;;  %v1474_v43 = vld [vmem:[#allocation7 + $0x368] sm:$0xff] }
 0x25b   :  { %1587 = vmatprep.mubr.f32.mxu0 %v1362_v51  ;;  %v4077_v46 = vpack.c.bf16 %v1476_v44, %v1474_v43  ;;  %v1480_v51 = vld [vmem:[#allocation7 + $0x398] sm:$0xff]  ;;  %v1731_v37 = vld [vmem:[#allocation10 + $0xc0] sm:$0xff]  ;;  %v1752_v44 = vld [vmem:[#allocation10 + $0x168] sm:$0xff] }
 0x25c   :  { %1588 = vmatmul.mubr.f32.gmra.mrb[14].mxu0 %v1361_v57  ;;  %v4081_v57 = vpack.c.bf16 %v1480_v51, %v1478_v50  ;;  %v1739_v40 = vld [vmem:[#allocation10 + $0x100] sm:$0xff]  ;;  %v1756_v50 = vld [vmem:[#allocation10 + $0x188] sm:$0xff] }
 0x25d   :  { %4048 = vmatpush1.bf16.msra.mxu0 %v4047_v52  ;;  %1658 = vmatprep.mubr.f32.mxu0 %v1352_v63  ;;  %v4079_v52 = vpack.c.bf16 %v1475_v49, %v1473_v47  ;;  %v1484_v63 = vld [vmem:[#allocation7 + $0x3b8] sm:$0xff]  ;;  %v1743_v42 = vld [vmem:[#allocation10 + $0x120] sm:$0xff]  ;;  %v1760_v51 = vld [vmem:[#allocation10 + $0x1a8] sm:$0xff] }
 0x25e   :  { %4050 = vmatprep.subr.bf16.mxu0 %v4049_v59  ;;  %v1477_v59 = vld [vmem:[#allocation7 + $0x380] sm:$0xff]  ;;  %v4085_v1 = vpack.c.bf16 %v1484_v63, %v1482_v62  ;;  %v4115_v43 = vpack.c.bf16 %v1743_v42, %v1739_v40  ;;  %v1764_v62 = vld [vmem:[#allocation10 + $0x1c8] sm:$0xff] }
 0x25f   :  { %v4083_v0 = vpack.c.bf16 %v1479_v60, %v1477_v59  ;;  %v1751_v47 = vld [vmem:[#allocation10 + $0x160] sm:$0xff]  ;;  %v1768_v63 = vld [vmem:[#allocation10 + $0x1e8] sm:$0xff] }
 0x260   :  { %v1759_v59 = vld [vmem:[#allocation10 + $0x1a0] sm:$0xff] }
 0x261   :  { %4052 = vmatpush1.bf16.msra.mxu0 %v4051_v58  ;;  %v1481_v58 = vld [vmem:[#allocation7 + $0x3a0] sm:$0xff] }
 0x262   :  { %4054 = vmatprep.subr.bf16.mxu0 %v4053_v2  ;;  %v1483_v2 = vld [vmem:[#allocation7 + $0x3b0] sm:$0xff]  ;;  %v2003_v19 = vld [vmem:[#allocation13 + $0x80] sm:$0xff]  ;;  %v2066_v40 = vld [vmem:[#allocation13 + $0x278] sm:$0xff] }
 0x263   :  { %v4087_v5 = vpack.c.bf16 %v1483_v2, %v1481_v58  ;;  %v1767_v58 = vld [vmem:[#allocation10 + $0x1e0] sm:$0xff] }
 0x264   :  { %v2074_v42 = vld [vmem:[#allocation13 + $0x2b8] sm:$0xff] }
 0x265   :  { %4056 = vmatpush1.bf16.msra.mxu0 %v4055_v7  ;;  %v4089_v7 = vpack.c.bf16 %v1488_v4, %v1486_v3  ;;  %v1710_v3 = vld [vmem:[#allocation10 + $0x18] sm:$0xff] }
 0x266   :  { %4058 = vmatprep.subr.bf16.mxu0 %v4057_v8  ;;  %v1485_v8 = vld [vmem:[#allocation7 + $0x3c0] sm:$0xff] }
 0x267   :  { %v4091_v13 = vpack.c.bf16 %v1487_v9, %v1485_v8  ;;  %v1714_v4 = vld [vmem:[#allocation10 + $0x38] sm:$0xff] }
 0x268   :  { %v1997_v8 = vld [vmem:[#allocation13 + $0x50] sm:$0xff] }
 0x269   :  { %4060 = vmatpush1.bf16.msra.mxu0 %v4059_v14  ;;  %v628_v14 = vrot.slane %v5369_v55, %v5401_v6  ;;  %v4622_v55 = vadd.f32 %v5393_v33, %v5391_v30  ;;  %v1732_v33 = vld [vmem:[#allocation10 + $0xc8] sm:$0xff] }
 0x26a   :  { %4062 = vmatprep.subr.bf16.mxu0 %v4061_v16  ;;  %v4093_v16 = vpack.c.bf16 %v1492_v12, %v1490_v11  ;;  %v4109_v36 = vpack.c.bf16 %v1736_v35, %v1732_v33  ;;  %v1989_v11 = vld [vmem:[#allocation13 + $0x10] sm:$0xff]  ;;  %v1996_v12 = vld [vmem:[#allocation13 + $0x48] sm:$0xff] }
 0x26b   :  { %v4617_v21 = vadd.f32 %v5378_v61, %v628_v14  ;;  %v4619_v24 = vadd.f32 %v5380_v10, %v628_v14  ;;  %v4621_v28 = vadd.f32 %v5387_v25, %v628_v14  ;;  %v4624_v61 = vadd.f32 %v5398_v48, %v5391_v30 }
 0x26c   :  { %4110 = vmatprep.subr.bf16.mxu1 %v4109_v36  ;;  %v2045_v36 = vld [vmem:[#allocation13 + $0x1d0] sm:$0xff] }
 0x26d   :  { %4064 = vmatpush1.bf16.msra.mxu0 %v4063_v22  ;;  %v4620_v22 = vadd.f32 %v5385_v17, %v5391_v30  ;;  %v1355_v27 = vmax.f32 %v4619_v24, 0.0  ;;  %v1359_v17 = vmax.f32 %v4621_v28, 0.0  ;;  %v1364_v34 = vmax.f32 %v4624_v61, 0.0  ;;  %v1744_v30 = vld [vmem:[#allocation10 + $0x128] sm:$0xff] }
 0x26e   :  { %4066 = vmatprep.subr.bf16.mxu0 %v4065_v23  ;;  %v1351_v23 = vmax.f32 %v4617_v21, 0.0 }
 0x26f   :  { %v1356_v26 = vmax.f32 %v4620_v22, 0.0  ;;  %v2018_v22 = vld [vmem:[#allocation13 + $0xf8] sm:$0xff] }
 0x271   :  { %4068 = vmatpush1.bf16.msra.mxu0 %v4067_v29  ;;  %v1360_v29 = vmax.f32 %v4622_v55, 0.0  ;;  %v2024_v55 = vld [vmem:[#allocation13 + $0x128] sm:$0xff] }
 0x272   :  { %4070 = vmatprep.subr.bf16.mxu0 %v4069_v31  ;;  %v4623_v31 = vadd.f32 %v5395_v41, %v628_v14  ;;  %v1748_v41 = vld [vmem:[#allocation10 + $0x148] sm:$0xff] }
 0x273   :  { %v2004_v14 = vld [vmem:[#allocation13 + $0x88] sm:$0xff] }
 0x274   :  { %v1363_v10 = vmax.f32 %v4623_v31, 0.0  ;;  %v2038_v31 = vld [vmem:[#allocation13 + $0x198] sm:$0xff] }
 0x275   :  { %4072 = vmatpush1.bf16.msra.mxu0 %v4071_v38  ;;  %v1735_v38 = vld [vmem:[#allocation10 + $0xe0] sm:$0xff] }
 0x276   :  { %4074 = vmatprep.subr.bf16.mxu0 %v4073_v39  ;;  %v4111_v25 = vpack.c.bf16 %v1735_v38, %v1731_v37  ;;  %v1740_v39 = vld [vmem:[#allocation10 + $0x108] sm:$0xff] }
 0x277   :  { %v4113_v48 = vpack.c.bf16 %v1744_v30, %v1740_v39  ;;  %v2052_v37 = vld [vmem:[#allocation13 + $0x208] sm:$0xff] }
 0x278   :  { %4112 = vmatpush1.bf16.msra.mxu1 %v4111_v25  ;;  %v2060_v38 = vld [vmem:[#allocation13 + $0x248] sm:$0xff]  ;;  %v2067_v25 = vld [vmem:[#allocation13 + $0x280] sm:$0xff]  ;;  %v4307_v39 = vpack.c.bf16 %v2052_v37, %v2045_v36 }
 0x279   :  { %4076 = vmatpush1.bf16.msra.mxu0 %v4075_v45  ;;  %4114 = vmatprep.subr.bf16.mxu1 %v4113_v48  ;;  %v4117_v45 = vpack.c.bf16 %v1752_v44, %v1748_v41  ;;  %v4309_v30 = vpack.c.bf16 %v2067_v25, %v2060_v38  ;;  %v2059_v48 = vld [vmem:[#allocation13 + $0x240] sm:$0xff]  ;;  %v2185_v38 = vld [vmem:[#allocation13 + $0x630] sm:$0xff]  ;;  %v2192_v25 = vld [vmem:[#allocation13 + $0x668] sm:$0xff] }
 0x27a   :  { %4078 = vmatprep.subr.bf16.mxu0 %v4077_v46  ;;  %v1747_v46 = vld [vmem:[#allocation10 + $0x140] sm:$0xff]  ;;  %v4311_v41 = vpack.c.bf16 %v2066_v40, %v2059_v48 }
 0x27b   :  { %v4119_v49 = vpack.c.bf16 %v1751_v47, %v1747_v46  ;;  %v2080_v46 = vld [vmem:[#allocation13 + $0x2e8] sm:$0xff] }
 0x27c   :  { %4116 = vmatpush1.bf16.msra.mxu1 %v4115_v43  ;;  %v2081_v43 = vld [vmem:[#allocation13 + $0x2f0] sm:$0xff]  ;;  %v2088_v47 = vld [vmem:[#allocation13 + $0x328] sm:$0xff] }
 0x27d   :  { %4080 = vmatpush1.bf16.msra.mxu0 %v4079_v52  ;;  %4118 = vmatprep.subr.bf16.mxu1 %v4117_v45  ;;  %v4121_v52 = vpack.c.bf16 %v1760_v51, %v1756_v50  ;;  %v4313_v44 = vpack.c.bf16 %v2081_v43, %v2074_v42  ;;  %v2073_v45 = vld [vmem:[#allocation13 + $0x2b0] sm:$0xff] }
 0x27e   :  { %4082 = vmatprep.subr.bf16.mxu0 %v4081_v57  ;;  %v1755_v57 = vld [vmem:[#allocation10 + $0x180] sm:$0xff]  ;;  %v4315_v50 = vpack.c.bf16 %v2080_v46, %v2073_v45 }
 0x27f   :  { %v4123_v60 = vpack.c.bf16 %v1759_v59, %v1755_v57  ;;  %v2094_v57 = vld [vmem:[#allocation13 + $0x358] sm:$0xff] }
 0x280   :  { %4120 = vmatpush1.bf16.msra.mxu1 %v4119_v49  ;;  %v2095_v49 = vld [vmem:[#allocation13 + $0x360] sm:$0xff]  ;;  %v2102_v59 = vld [vmem:[#allocation13 + $0x398] sm:$0xff] }
 0x281   :  { %4084 = vmatpush1.bf16.msra.mxu0 %v4083_v0  ;;  %4122 = vmatprep.subr.bf16.mxu1 %v4121_v52  ;;  %v4125_v0 = vpack.c.bf16 %v1768_v63, %v1764_v62  ;;  %v4317_v51 = vpack.c.bf16 %v2095_v49, %v2088_v47  ;;  %v2087_v52 = vld [vmem:[#allocation13 + $0x320] sm:$0xff] }
 0x282   :  { %4086 = vmatprep.subr.bf16.mxu0 %v4085_v1  ;;  %v1763_v1 = vld [vmem:[#allocation10 + $0x1c0] sm:$0xff]  ;;  %v4319_v62 = vpack.c.bf16 %v2094_v57, %v2087_v52 }
 0x283   :  { %v4127_v2 = vpack.c.bf16 %v1767_v58, %v1763_v1  ;;  %v2108_v1 = vld [vmem:[#allocation13 + $0x3c8] sm:$0xff] }
 0x284   :  { %4124 = vmatpush1.bf16.msra.mxu1 %v4123_v60  ;;  %v2109_v60 = vld [vmem:[#allocation13 + $0x3d0] sm:$0xff]  ;;  %v2116_v58 = vld [vmem:[#allocation13 + $0x408] sm:$0xff] }
 0x285   :  { %4088 = vmatpush1.bf16.msra.mxu0 %v4087_v5  ;;  %4126 = vmatprep.subr.bf16.mxu1 %v4125_v0  ;;  %v4129_v5 = vpack.c.bf16 %v1714_v4, %v1710_v3  ;;  %v4321_v63 = vpack.c.bf16 %v2109_v60, %v2102_v59  ;;  %v2101_v0 = vld [vmem:[#allocation13 + $0x390] sm:$0xff] }
 0x286   :  { %4090 = vmatprep.subr.bf16.mxu0 %v4089_v7  ;;  %v1990_v7 = vld [vmem:[#allocation13 + $0x18] sm:$0xff]  ;;  %v4323_v3 = vpack.c.bf16 %v2108_v1, %v2101_v0 }
 0x287   :  { %v4289_v9 = vpack.c.bf16 %v1997_v8, %v1990_v7  ;;  %v2122_v7 = vld [vmem:[#allocation13 + $0x438] sm:$0xff] }
 0x288   :  { %4128 = vmatpush1.bf16.msra.mxu1 %v4127_v2  ;;  %v2123_v2 = vld [vmem:[#allocation13 + $0x440] sm:$0xff]  ;;  %v2130_v8 = vld [vmem:[#allocation13 + $0x478] sm:$0xff] }
 0x289   :  { %4092 = vmatpush1.bf16.msra.mxu0 %v4091_v13  ;;  %4130 = vmatprep.subr.bf16.mxu1 %v4129_v5  ;;  %v4291_v13 = vpack.c.bf16 %v1996_v12, %v1989_v11  ;;  %v4325_v4 = vpack.c.bf16 %v2123_v2, %v2116_v58  ;;  %v2115_v5 = vld [vmem:[#allocation13 + $0x400] sm:$0xff] }
 0x28a   :  { %4094 = vmatprep.subr.bf16.mxu0 %v4093_v16  ;;  %v2011_v16 = vld [vmem:[#allocation13 + $0xc0] sm:$0xff]  ;;  %v4327_v11 = vpack.c.bf16 %v2122_v7, %v2115_v5  ;;  %v1683_v7 = vld [vmem:[%s5677_s1] sm:$0xff] }
 0x28b   :  { %v4293_v18 = vpack.c.bf16 %v2011_v16, %v2004_v14  ;;  %v2136_v14 = vld [vmem:[#allocation13 + $0x4a8] sm:$0xff] }
 0x28c   :  { %v2144_v16 = vld [vmem:[#allocation13 + $0x4e8] sm:$0xff] }
 0x28d   :  { %4096 = vmatpush1.bf16.msra.mxu0 %v4095_v20  ;;  %v2010_v20 = vld [vmem:[#allocation13 + $0xb8] sm:$0xff] }
 0x28e   :  { %4290 = vmatprep.subr.bf16.mxu0 %v4289_v9  ;;  %v4295_v21 = vpack.c.bf16 %v2010_v20, %v2003_v19  ;;  %v2137_v9 = vld [vmem:[#allocation13 + $0x4b0] sm:$0xff] }
 0x28f   :  { %v4329_v12 = vpack.c.bf16 %v2137_v9, %v2130_v8  ;;  %v1709_v8 = vld [vmem:[#allocation10 + $0x10] sm:$0xff] }
 0x290   :  { %1659 = vmatmul.mubr.f32.vlgmr.msra.gmra.mrb[8].mxu0 %v1351_v23  ;;  %v2025_v23 = vld [vmem:[#allocation13 + $0x130] sm:$0xff] }
 0x291   :  { %1664 = vmatprep.mubr.f32.mxu0 %v1356_v26  ;;  %4292 = vmatpush1.bf16.msra.mxu0 %v4291_v13  ;;  %v4297_v24 = vpack.c.bf16 %v2025_v23, %v2018_v22  ;;  %v2017_v26 = vld [vmem:[#allocation13 + $0xf0] sm:$0xff]  ;;  %v2150_v22 = vld [vmem:[#allocation13 + $0x518] sm:$0xff] }
 0x292   :  { %4294 = vmatprep.subr.bf16.mxu0 %v4293_v18  ;;  %v4299_v28 = vpack.c.bf16 %v2024_v55, %v2017_v26  ;;  %v2129_v13 = vld [vmem:[#allocation13 + $0x470] sm:$0xff]  ;;  %v2151_v18 = vld [vmem:[#allocation13 + $0x520] sm:$0xff]  ;;  %v2158_v23 = vld [vmem:[#allocation13 + $0x558] sm:$0xff] }
 0x293   :  { %v4331_v19 = vpack.c.bf16 %v2136_v14, %v2129_v13  ;;  %v4333_v20 = vpack.c.bf16 %v2151_v18, %v2144_v16  ;;  %v1713_v9 = vld [vmem:[#allocation10 + $0x30] sm:$0xff]  ;;  %v1718_v13 = vld [vmem:[#allocation10 + $0x58] sm:$0xff] }
 0x294   :  { %1665 = vmatmul.mubr.f32.gmra.mrb[10].mxu0 %v1355_v27  ;;  %v2032_v27 = vld [vmem:[#allocation13 + $0x168] sm:$0xff]  ;;  %v1722_v14 = vld [vmem:[#allocation10 + $0x78] sm:$0xff]  ;;  %v4131_v18 = vpack.c.bf16 %v1713_v9, %v1709_v8 }
 0x295   :  { %1670 = vmatprep.mubr.f32.mxu0 %v1360_v29  ;;  %4296 = vmatpush1.bf16.msra.mxu0 %v4295_v21  ;;  %v2039_v29 = vld [vmem:[#allocation13 + $0x1a0] sm:$0xff]  ;;  %v1765_v8 = vld [vmem:[#allocation10 + $0x1d0] sm:$0xff] }
 0x296   :  { %4298 = vmatprep.subr.bf16.mxu0 %v4297_v24  ;;  %v4301_v61 = vpack.c.bf16 %v2039_v29, %v2032_v27  ;;  %v2143_v21 = vld [vmem:[#allocation13 + $0x4e0] sm:$0xff]  ;;  %v2165_v24 = vld [vmem:[#allocation13 + $0x590] sm:$0xff]  ;;  %v2172_v29 = vld [vmem:[#allocation13 + $0x5c8] sm:$0xff] }
 0x297   :  { %v4335_v26 = vpack.c.bf16 %v2150_v22, %v2143_v21  ;;  %v4337_v55 = vpack.c.bf16 %v2165_v24, %v2158_v23  ;;  %v2157_v27 = vld [vmem:[#allocation13 + $0x550] sm:$0xff]  ;;  %v4133_v21 = vpack.c.bf16 %v1722_v14, %v1718_v13 }
 0x298   :  { %1671 = vmatmul.mubr.f32.gmra.mrb[12].mxu0 %v1359_v17  ;;  %v2031_v17 = vld [vmem:[#allocation13 + $0x160] sm:$0xff]  ;;  %v1717_v22 = vld [vmem:[#allocation10 + $0x50] sm:$0xff] }
 0x299   :  { %1676 = vmatprep.mubr.f32.mxu0 %v1364_v34  ;;  %v2046_v34 = vld [vmem:[#allocation13 + $0x1d8] sm:$0xff]  ;;  %4300 = vmatpush1.bf16.msra.mxu0 %v4299_v28  ;;  %v4303_v33 = vpack.c.bf16 %v2038_v31, %v2031_v17  ;;  %v2164_v28 = vld [vmem:[#allocation13 + $0x588] sm:$0xff] }
 0x29a   :  { %4302 = vmatprep.subr.bf16.mxu0 %v4301_v61  ;;  %v2179_v61 = vld [vmem:[#allocation13 + $0x600] sm:$0xff]  ;;  %v4339_v17 = vpack.c.bf16 %v2164_v28, %v2157_v27  ;;  %v1721_v23 = vld [vmem:[#allocation10 + $0x70] sm:$0xff] }
 0x29b   :  { %v4341_v31 = vpack.c.bf16 %v2179_v61, %v2172_v29  ;;  %v4135_v28 = vpack.c.bf16 %v1721_v23, %v1717_v22  ;;  %v1685_v29 = vld [vmem:[%s5677_s1 + $0x10] sm:$0xff] }
 0x29c   :  { %1677 = vmatmul.mubr.f32.gmra.mrb[14].mxu0 %v1363_v10  ;;  %v2053_v10 = vld [vmem:[#allocation13 + $0x210] sm:$0xff] }
 0x29d   :  { %v4305_v35 = vpack.c.bf16 %v2053_v10, %v2046_v34  ;;  %4304 = vmatpush1.bf16.msra.mxu0 %v4303_v33  ;;  %v2171_v34 = vld [vmem:[#allocation13 + $0x5c0] sm:$0xff]  ;;  %v2178_v10 = vld [vmem:[#allocation13 + $0x5f8] sm:$0xff]  ;;  %v1769_v9 = vld [vmem:[#allocation10 + $0x1f0] sm:$0xff] }
 0x29e   :  { %v2186_v33 = vld [vmem:[#allocation13 + $0x638] sm:$0xff]  ;;  %v4343_v36 = vpack.c.bf16 %v2178_v10, %v2171_v34  ;;  %v1729_v34 = vld [vmem:[#allocation10 + $0xb0] sm:$0xff]  ;;  %v4159_v13 = vpack.c.bf16 %v1769_v9, %v1765_v8 }
 0x29f   :  { %4306 = vmatprep.subr.bf16.mxu0 %v4305_v35  ;;  %v2193_v35 = vld [vmem:[#allocation13 + $0x670] sm:$0xff] }
 0x2a0   :  { %v4345_v37 = vpack.c.bf16 %v2193_v35, %v2186_v33  ;;  %v1734_v33 = vld [vmem:[#allocation10 + $0xd8] sm:$0xff] }
 0x2a1   :  { %4308 = vmatpush1.bf16.msra.mxu0 %v4307_v39  ;;  %v1493_v39 = vld [vmem:[#allocation8] sm:$0x3]  ;;  %v2113_v9 = vld [vmem:[#allocation13 + $0x3f0] sm:$0xff] }
 0x2a2   :  { %4310 = vmatprep.subr.bf16.mxu0 %v4309_v30  ;;  %v4347_v30 = vpack.c.bf16 %v2192_v25, %v2185_v38  ;;  %v1498_v48 = vrot.slane %v1493_v39, %v5367_v54  ;;  %v1502_v40 = vrot.slane %v1493_v39, %v5372_v56  ;;  %v1738_v35 = vld [vmem:[#allocation10 + $0xf8] sm:$0xff] }
 0x2a3   :  { %v1686_v38 = vld [vmem:[%s5677_s1 + $0x18] sm:$0xff]  ;;  %v4141_v39 = vpack.c.bf16 %v1738_v35, %v1734_v33 }
 0x2a5   :  { %4312 = vmatpush1.bf16.msra.mxu0 %v4311_v41 }
 0x2a6   :  { %4314 = vmatprep.subr.bf16.mxu0 %v4313_v44 }
 0x2a9   :  { %4316 = vmatpush1.bf16.msra.mxu0 %v4315_v50 }
 0x2aa   :  { %4318 = vmatprep.subr.bf16.mxu0 %v4317_v51 }
 0x2ad   :  { %4320 = vmatpush1.bf16.msra.mxu0 %v4319_v62 }
 0x2ae   :  { %4322 = vmatprep.subr.bf16.mxu0 %v4321_v63 }
 0x2b1   :  { %4324 = vmatpush1.bf16.msra.mxu0 %v4323_v3 }
 0x2b2   :  { %4326 = vmatprep.subr.bf16.mxu0 %v4325_v4 }
 0x2b5   :  { %4328 = vmatpush1.bf16.msra.mxu0 %v4327_v11 }
 0x2b6   :  { %4330 = vmatprep.subr.bf16.mxu0 %v4329_v12 }
 0x2b9   :  { %4332 = vmatpush1.bf16.msra.mxu0 %v4331_v19  ;;  %v1684_v19 = vld [vmem:[%s5677_s1 + $0x8] sm:$0xff]  ;;  %s5098_s1 = smov [#allocation16]  }
 0x2ba   :  { %4334 = vmatprep.subr.bf16.mxu0 %v4333_v20  ;;  %s3385_s20 = sshll.u32 %s5098_s1, 4  ;;  %s3386_s20 = int_to_ptr.vmem [resolvable:$true] %s3385_s20 }
 0x2bb   :  { %s5049_s14 = scalar_lea.vmem %s3386_s20, 3584  ;;  %p5054_p9 = scmp.lt.s32.totalorder %s3386_s20, %s3386_s20 }
 0x2bc   :  { %p5050_p8 = scmp.ne.s32.totalorder %s3386_s20, %s5049_s14  ;;  %p5055_p10 = scmp.lt.s32.totalorder %s5049_s14, %s5049_s14 }
 0x2bd   :  { %4336 = vmatpush1.bf16.msra.mxu0 %v4335_v26  ;;  %v1726_v26 = vld [vmem:[#allocation10 + $0x98] sm:$0xff] }
 0x2be   :  { %4338 = vmatprep.subr.bf16.mxu0 %v4337_v55  ;;  %v1730_v55 = vld [vmem:[#allocation10 + $0xb8] sm:$0xff]  ;;  %p5056_p11 = por %p5055_p10, %p5054_p9 }
 0x2c0   :  { %p5057_p12 = pnand %p5056_p11, %p5050_p8 }
 0x2c1   :  { %4340 = vmatpush1.bf16.msra.mxu0 %v4339_v17  ;;  %v4137_v17 = vpack.c.bf16 %v1730_v55, %v1726_v26  ;;  %v2008_v26 = vld [vmem:[#allocation13 + $0xa8] sm:$0xff] }
 0x2c2   :  { %4342 = vmatprep.subr.bf16.mxu0 %v4341_v31  ;;  %v1725_v31 = vld [vmem:[#allocation10 + $0x90] sm:$0xff] }
 0x2c3   :  { %v2016_v55 = vld [vmem:[#allocation13 + $0xe8] sm:$0xff] }
 0x2c5   :  { %4344 = vmatpush1.bf16.msra.mxu0 %v4343_v36 }
 0x2c6   :  { %4346 = vmatprep.subr.bf16.mxu0 %v4345_v37  ;;  %v4139_v37 = vpack.c.bf16 %v1729_v34, %v1725_v31  ;;  %v2022_v31 = vld [vmem:[#allocation13 + $0x118] sm:$0xff] }
 0x2c7   :  { %v2030_v34 = vld [vmem:[#allocation13 + $0x158] sm:$0xff] }
 0x2c9   :  { %4348 = vmatpush1.bf16.msra.mxu0 %v4347_v30  ;;  %v1733_v30 = vld [vmem:[#allocation10 + $0xd0] sm:$0xff] }
 0x363   :  { %v1660_v42 = vpop.f32.mrb[8].mxu0 }
 0x364   :  { %v4625_v43 = vadd.f32 %v1660_v42, %v1498_v48  ;;  %v1662_v41 = vpop.f32.mrb[9].mxu0  ;;  %v1742_v42 = vld [vmem:[#allocation10 + $0x118] sm:$0xff] }
 0x365   :  { %v4626_v44 = vadd.f32 %v1662_v41, %v1502_v40 }
 0x366   :  { %3372 = vst [vmem:[%s5687_s11] sm:$0xff] %v4625_v43 }
 0x367   :  { %v1687_v45 = vmul.f32 0.5, %v4626_v44  ;;  %3373 = vst [vmem:[%s5687_s11 + $0x8] sm:$0xff] %v4626_v44  ;;  %v1666_v46 = vpop.f32.mrb[10].mxu0 }
 0x368   :  { %v4627_v47 = vadd.f32 %v1666_v46, %v1498_v48  ;;  %v1668_v49 = vpop.f32.mrb[11].mxu0 }
 0x369   :  { %v1691_v50 = vmul.f32 1.442695, %v1687_v45  ;;  %v4628_v51 = vadd.f32 %v1668_v49, %v1502_v40  ;;  %v1745_v49 = vld [vmem:[#allocation10 + $0x130] sm:$0xff] }
 0x36a   :  { %3374 = vst [vmem:[%s5687_s11 + $0x10] sm:$0xff] %v4627_v47 }
 0x36b   :  { %4753 = vpow2.f32 %v1691_v50  ;;  %v1688_v52 = vmul.f32 0.5, %v4628_v51  ;;  %3375 = vst [vmem:[%s5687_s11 + $0x18] sm:$0xff] %v4628_v51  ;;  %v1672_v57 = vpop.f32.mrb[12].mxu0  ;;  %v1750_v50 = vld [vmem:[#allocation10 + $0x158] sm:$0xff] }
 0x36c   :  { %v4629_v59 = vadd.f32 %v1672_v57, %v1498_v48  ;;  %v1674_v60 = vpop.f32.mrb[13].mxu0  ;;  %v1754_v51 = vld [vmem:[#allocation10 + $0x178] sm:$0xff] }
 0x36d   :  { %v1693_v62 = vmul.f32 1.442695, %v1688_v52  ;;  %v4630_v63 = vadd.f32 %v1674_v60, %v1502_v40  ;;  %v4149_v57 = vpack.c.bf16 %v1754_v51, %v1750_v50  ;;  %v1753_v60 = vld [vmem:[#allocation10 + $0x170] sm:$0xff]  ;;  %v2071_v50 = vld [vmem:[#allocation13 + $0x2a0] sm:$0xff]  ;;  %v2078_v51 = vld [vmem:[#allocation13 + $0x2d8] sm:$0xff] }
 0x36e   :  { %3376 = vst [vmem:[%s5687_s11 + $0x20] sm:$0xff] %v4629_v59 }
 0x36f   :  { %4755 = vpow2.f32 %v1693_v62  ;;  %v1689_v0 = vmul.f32 0.5, %v4630_v63  ;;  %3377 = vst [vmem:[%s5687_s11 + $0x28] sm:$0xff] %v4630_v63  ;;  %v1678_v1 = vpop.f32.mrb[14].mxu0  ;;  %v1758_v62 = vld [vmem:[#allocation10 + $0x198] sm:$0xff] }
 0x370   :  { %v4631_v58 = vadd.f32 %v1678_v1, %v1498_v48  ;;  %v1680_v2 = vpop.f32.mrb[15].mxu0  ;;  %v1737_v48 = vld [vmem:[#allocation10 + $0xf0] sm:$0xff]  ;;  %v1762_v63 = vld [vmem:[#allocation10 + $0x1b8] sm:$0xff] }
 0x371   :  { %v1695_v3 = vmul.f32 1.442695, %v1689_v0  ;;  %v4632_v4 = vadd.f32 %v1680_v2, %v1502_v40  ;;  %v4143_v44 = vpack.c.bf16 %v1737_v48, %v1733_v30  ;;  %v4153_v1 = vpack.c.bf16 %v1762_v63, %v1758_v62  ;;  %v1761_v2 = vld [vmem:[#allocation10 + $0x1b0] sm:$0xff]  ;;  %v2043_v48 = vld [vmem:[#allocation13 + $0x1c0] sm:$0xff] }
 0x372   :  { %3378 = vst [vmem:[%s5687_s11 + $0x30] sm:$0xff] %v4631_v58  ;;  %v2092_v62 = vld [vmem:[#allocation13 + $0x348] sm:$0xff] }
 0x373   :  { %4757 = vpow2.f32 %v1695_v3  ;;  %v1690_v5 = vmul.f32 0.5, %v4632_v4  ;;  %3379 = vst [vmem:[%s5687_s11 + $0x38] sm:$0xff] %v4632_v4  ;;  %v1766_v3 = vld [vmem:[#allocation10 + $0x1d8] sm:$0xff]  ;;  %v2100_v63 = vld [vmem:[#allocation13 + $0x388] sm:$0xff] }
 0x374   :  { %v1770_v4 = vld [vmem:[#allocation10 + $0x1f8] sm:$0xff] }
 0x375   :  { %v4754_v11 = vpop.eup %4753  ;;  %v1697_v12 = vmul.f32 1.442695, %v1690_v5 }
 0x376   :  { %v1699_v16 = vmul.f32 %v4754_v11, %v1683_v7  ;;  %v4157_v7 = vpack.c.bf16 %v1770_v4, %v1766_v3  ;;  %v1988_v11 = vld [vmem:[#allocation13 + $0x8] sm:$0xff]  ;;  %v2106_v3 = vld [vmem:[#allocation13 + $0x3b8] sm:$0xff] }
 0x377   :  { %4759 = vpow2.f32 %v1697_v12  ;;  %v1995_v12 = vld [vmem:[#allocation13 + $0x40] sm:$0xff]  ;;  %v2114_v4 = vld [vmem:[#allocation13 + $0x3f8] sm:$0xff] }
 0x378   :  { %v5447_v20 = vadd.f32 %v4625_v43, %v1699_v16  ;;  %v1746_v43 = vld [vmem:[#allocation10 + $0x138] sm:$0xff]  ;;  %v4161_v14 = vpack.c.bf16 %v1995_v12, %v1988_v11  ;;  %v1987_v16 = vld [vmem:[#allocation13] sm:$0xff]  ;;  %v2120_v11 = vld [vmem:[#allocation13 + $0x428] sm:$0xff] }
 0x379   :  { %v4756_v24 = vpop.eup %4755  ;;  %v4145_v46 = vpack.c.bf16 %v1746_v43, %v1742_v42  ;;  %v2065_v42 = vld [vmem:[#allocation13 + $0x270] sm:$0xff]  ;;  %v2128_v12 = vld [vmem:[#allocation13 + $0x468] sm:$0xff] }
 0x37a   :  { %1858 = vmatmul.mubr.f32.vlgmr.msra.gmra.mrb[8].mxu1 %v5447_v20  ;;  %v1700_v27 = vmul.f32 %v4756_v24, %v1684_v19  ;;  %v2002_v19 = vld [vmem:[#allocation13 + $0x78] sm:$0xff]  ;;  %v2001_v24 = vld [vmem:[#allocation13 + $0x70] sm:$0xff] }
 0x37b   :  { %4132 = vmatpush1.bf16.msra.mxu1 %v4131_v18  ;;  %1863 = vmatprep.mubr.f32.mxu1 %v5097_v32  ;;  %v1994_v18 = vld [vmem:[#allocation13 + $0x38] sm:$0xff] }
 0x37c   :  { %4134 = vmatprep.subr.bf16.mxu1 %v4133_v21  ;;  %v5454_v61 = vadd.f32 %v4627_v47, %v1700_v27  ;;  %v1741_v47 = vld [vmem:[#allocation10 + $0x110] sm:$0xff]  ;;  %v4163_v22 = vpack.c.bf16 %v1994_v18, %v1987_v16  ;;  %v2023_v27 = vld [vmem:[#allocation13 + $0x120] sm:$0xff] }
 0x37d   :  { %v4758_v10 = vpop.eup %4757  ;;  %v4147_v52 = vpack.c.bf16 %v1745_v49, %v1741_v47  ;;  %v2009_v21 = vld [vmem:[#allocation13 + $0xb0] sm:$0xff]  ;;  %v2072_v47 = vld [vmem:[#allocation13 + $0x2a8] sm:$0xff]  ;;  %v2127_v18 = vld [vmem:[#allocation13 + $0x460] sm:$0xff] }
 0x37e   :  { %1864 = vmatmul.mubr.f32.gmra.mrb[10].mxu1 %v5454_v61  ;;  %v1701_v36 = vmul.f32 %v4758_v10, %v1685_v29  ;;  %v4165_v23 = vpack.c.bf16 %v2009_v21, %v2002_v19  ;;  %v4169_v29 = vpack.c.bf16 %v2023_v27, %v2016_v55  ;;  %v2037_v10 = vld [vmem:[#allocation13 + $0x190] sm:$0xff]  ;;  %v2134_v19 = vld [vmem:[#allocation13 + $0x498] sm:$0xff]  ;;  %v2148_v55 = vld [vmem:[#allocation13 + $0x508] sm:$0xff] }
 0x37f   :  { %4136 = vmatpush1.bf16.msra.mxu1 %v4135_v28  ;;  %1869 = vmatprep.mubr.f32.mxu1 %v5097_v32  ;;  %v4167_v28 = vpack.c.bf16 %v2008_v26, %v2001_v24  ;;  %v4173_v35 = vpack.c.bf16 %v2037_v10, %v2030_v34  ;;  %v2142_v21 = vld [vmem:[#allocation13 + $0x4d8] sm:$0xff]  ;;  %v2141_v26 = vld [vmem:[#allocation13 + $0x4d0] sm:$0xff]  ;;  %v2156_v27 = vld [vmem:[#allocation13 + $0x548] sm:$0xff] }
 0x380   :  { %4138 = vmatprep.subr.bf16.mxu1 %v4137_v17  ;;  %v5461_v25 = vadd.f32 %v4629_v59, %v1701_v36  ;;  %v1749_v59 = vld [vmem:[#allocation10 + $0x150] sm:$0xff]  ;;  %v2015_v17 = vld [vmem:[#allocation13 + $0xe0] sm:$0xff]  ;;  %v2162_v34 = vld [vmem:[#allocation13 + $0x578] sm:$0xff] }
 0x381   :  { %v4760_v40 = vpop.eup %4759  ;;  %v4151_v0 = vpack.c.bf16 %v1753_v60, %v1749_v59  ;;  %v4171_v33 = vpack.c.bf16 %v2022_v31, %v2015_v17  ;;  %v2029_v36 = vld [vmem:[#allocation13 + $0x150] sm:$0xff]  ;;  %v4187_v59 = vpack.c.bf16 %v2078_v51, %v2071_v50  ;;  %v2155_v31 = vld [vmem:[#allocation13 + $0x540] sm:$0xff]  ;;  %v2170_v10 = vld [vmem:[#allocation13 + $0x5b8] sm:$0xff] }
 0x382   :  { %1870 = vmatmul.mubr.f32.gmra.mrb[12].mxu1 %v5461_v25  ;;  %v1702_v41 = vmul.f32 %v4760_v40, %v1686_v38  ;;  %v2051_v38 = vld [vmem:[#allocation13 + $0x200] sm:$0xff]  ;;  %v2058_v40 = vld [vmem:[#allocation13 + $0x238] sm:$0xff]  ;;  %v2085_v60 = vld [vmem:[#allocation13 + $0x310] sm:$0xff] }
 0x383   :  { %4140 = vmatpush1.bf16.msra.mxu1 %v4139_v37  ;;  %1875 = vmatprep.mubr.f32.mxu1 %v5097_v32  ;;  %v2044_v37 = vld [vmem:[#allocation13 + $0x1c8] sm:$0xff]  ;;  %v2197_v50 = vld [vmem:[#allocation13 + $0x690] sm:$0xff] }
 0x384   :  { %4142 = vmatprep.subr.bf16.mxu1 %v4141_v39  ;;  %v5465_v45 = vadd.f32 %v4631_v58, %v1702_v41  ;;  %v1757_v58 = vld [vmem:[#allocation10 + $0x190] sm:$0xff]  ;;  %v4177_v30 = vpack.c.bf16 %v2051_v38, %v2044_v37  ;;  %v4181_v41 = vpack.c.bf16 %v2065_v42, %v2058_v40  ;;  %v2190_v40 = vld [vmem:[#allocation13 + $0x658] sm:$0xff] }
 0x385   :  { %v4155_v5 = vpack.c.bf16 %v1761_v2, %v1757_v58  ;;  %v2099_v2 = vld [vmem:[#allocation13 + $0x380] sm:$0xff]  ;;  %v2176_v37 = vld [vmem:[#allocation13 + $0x5e8] sm:$0xff]  ;;  %v2198_v42 = vld [vmem:[#allocation13 + $0x698] sm:$0xff] }
 0x386   :  { %1876 = vmatmul.mubr.f32.gmra.mrb[14].mxu1 %v5465_v45  ;;  %v2184_v38 = vld [vmem:[#allocation13 + $0x628] sm:$0xff] }
 0x387   :  { %4144 = vmatpush1.bf16.msra.mxu1 %v4143_v44  ;;  %1946 = vmatprep.mubr.f32.mxu1 %v5097_v32  ;;  %v2057_v44 = vld [vmem:[#allocation13 + $0x230] sm:$0xff]  ;;  %v2204_v51 = vld [vmem:[#allocation13 + $0x6c8] sm:$0xff] }
 0x388   :  { %4146 = vmatprep.subr.bf16.mxu1 %v4145_v46  ;;  %v2064_v46 = vld [vmem:[#allocation13 + $0x268] sm:$0xff] }
 0x38b   :  { %4148 = vmatpush1.bf16.msra.mxu1 %v4147_v52  ;;  %v2086_v52 = vld [vmem:[#allocation13 + $0x318] sm:$0xff] }
 0x38c   :  { %4150 = vmatprep.subr.bf16.mxu1 %v4149_v57  ;;  %v2093_v57 = vld [vmem:[#allocation13 + $0x350] sm:$0xff] }
 0x38f   :  { %4152 = vmatpush1.bf16.msra.mxu1 %v4151_v0  ;;  %v2107_v0 = vld [vmem:[#allocation13 + $0x3c0] sm:$0xff] }
 0x390   :  { %4154 = vmatprep.subr.bf16.mxu1 %v4153_v1  ;;  %v4191_v1 = vpack.c.bf16 %v2092_v62, %v2085_v60  ;;  %v4193_v58 = vpack.c.bf16 %v2107_v0, %v2100_v63  ;;  %v2221_v60 = vld [vmem:[#allocation13 + $0x750] sm:$0xff]  ;;  %v4223_v62 = vpack.c.bf16 %v2204_v51, %v2197_v50  ;;  %v2256_v50 = vld [vmem:[#allocation13 + $0x868] sm:$0xff]  ;;  %v2263_v51 = vld [vmem:[#allocation13 + $0x8a0] sm:$0xff] }
 0x393   :  { %4156 = vmatpush1.bf16.msra.mxu1 %v4155_v5  ;;  %v2121_v5 = vld [vmem:[#allocation13 + $0x430] sm:$0xff] }
 0x394   :  { %4158 = vmatprep.subr.bf16.mxu1 %v4157_v7  ;;  %v4195_v7 = vpack.c.bf16 %v2106_v3, %v2099_v2  ;;  %v4197_v8 = vpack.c.bf16 %v2121_v5, %v2114_v4  ;;  %v2211_v4 = vld [vmem:[#allocation13 + $0x700] sm:$0xff]  ;;  %v2218_v5 = vld [vmem:[#allocation13 + $0x738] sm:$0xff] }
 0x397   :  { %4160 = vmatpush1.bf16.msra.mxu1 %v4159_v13  ;;  %v2135_v13 = vld [vmem:[#allocation13 + $0x4a0] sm:$0xff] }
 0x398   :  { %4162 = vmatprep.subr.bf16.mxu1 %v4161_v14  ;;  %v4199_v14 = vpack.c.bf16 %v2120_v11, %v2113_v9  ;;  %v4201_v16 = vpack.c.bf16 %v2135_v13, %v2128_v12  ;;  %v2213_v9 = vld [vmem:[#allocation13 + $0x710] sm:$0xff]  ;;  %v2220_v11 = vld [vmem:[#allocation13 + $0x748] sm:$0xff]  ;;  %v2226_v12 = vld [vmem:[#allocation13 + $0x778] sm:$0xff] }
 0x39a   :  { %1947 = vmatmul.mubr.f32.vlgmr.msra.gmra.mrb[16].mxu1 %v5447_v20  ;;  %v2036_v20 = vld [vmem:[#allocation13 + $0x188] sm:$0xff] }
 0x39b   :  { %1952 = vmatprep.mubr.f32.mxu1 %v5097_v32  ;;  %4164 = vmatpush1.bf16.msra.mxu1 %v4163_v22  ;;  %v4175_v39 = vpack.c.bf16 %v2036_v20, %v2029_v36  ;;  %v2149_v22 = vld [vmem:[#allocation13 + $0x510] sm:$0xff] }
 0x39c   :  { %4166 = vmatprep.subr.bf16.mxu1 %v4165_v23  ;;  %v4203_v23 = vpack.c.bf16 %v2134_v19, %v2127_v18  ;;  %v4205_v24 = vpack.c.bf16 %v2149_v22, %v2142_v21  ;;  %v2169_v20 = vld [vmem:[#allocation13 + $0x5b0] sm:$0xff]  ;;  %v2235_v18 = vld [vmem:[#allocation13 + $0x7c0] sm:$0xff]  ;;  %v4227_v22 = vpack.c.bf16 %v2218_v5, %v2211_v4  ;;  %v4365_v5 = vpack.c.bf16 %v2263_v51, %v2256_v50  ;;  %v2310_v50 = vld [vmem:[#allocation13 + $0xa18] sm:$0xff] }
 0x39d   :  { %v2317_v51 = vld [vmem:[#allocation13 + $0xa50] sm:$0xff] }
 0x39e   :  { %1953 = vmatmul.mubr.f32.gmra.mrb[18].mxu1 %v5454_v61  ;;  %v2050_v61 = vld [vmem:[#allocation13 + $0x1f8] sm:$0xff] }
 0x39f   :  { %1958 = vmatprep.mubr.f32.mxu1 %v5097_v32  ;;  %4168 = vmatpush1.bf16.msra.mxu1 %v4167_v28  ;;  %v4179_v43 = vpack.c.bf16 %v2050_v61, %v2043_v48  ;;  %v2163_v28 = vld [vmem:[#allocation13 + $0x580] sm:$0xff] }
 0x3a0   :  { %4170 = vmatprep.subr.bf16.mxu1 %v4169_v29  ;;  %v4207_v29 = vpack.c.bf16 %v2148_v55, %v2141_v26  ;;  %v4209_v17 = vpack.c.bf16 %v2163_v28, %v2156_v27  ;;  %v2183_v61 = vld [vmem:[#allocation13 + $0x620] sm:$0xff]  ;;  %v2232_v26 = vld [vmem:[#allocation13 + $0x7a8] sm:$0xff] }
 0x3a2   :  { %1959 = vmatmul.mubr.f32.gmra.mrb[20].mxu1 %v5461_v25  ;;  %v2079_v25 = vld [vmem:[#allocation13 + $0x2e0] sm:$0xff] }
 0x3a3   :  { %1964 = vmatprep.mubr.f32.mxu1 %v5097_v32  ;;  %4172 = vmatpush1.bf16.msra.mxu1 %v4171_v33  ;;  %v4183_v32 = vpack.c.bf16 %v2064_v46, %v2057_v44  ;;  %v4185_v49 = vpack.c.bf16 %v2079_v25, %v2072_v47  ;;  %v2177_v33 = vld [vmem:[#allocation13 + $0x5f0] sm:$0xff]  ;;  %v2207_v44 = vld [vmem:[#allocation13 + $0x6e0] sm:$0xff]  ;;  %v4219_v46 = vpack.c.bf16 %v2190_v40, %v2183_v61  ;;  %v2246_v61 = vld [vmem:[#allocation13 + $0x818] sm:$0xff] }
 0x3a4   :  { %4174 = vmatprep.subr.bf16.mxu1 %v4173_v35  ;;  %v4211_v35 = vpack.c.bf16 %v2162_v34, %v2155_v31  ;;  %v4213_v36 = vpack.c.bf16 %v2177_v33, %v2170_v10  ;;  %v2199_v25 = vld [vmem:[#allocation13 + $0x6a0] sm:$0xff]  ;;  %v2234_v34 = vld [vmem:[#allocation13 + $0x7b8] sm:$0xff]  ;;  %v2240_v10 = vld [vmem:[#allocation13 + $0x7e8] sm:$0xff] }
 0x3a5   :  { %v2227_v31 = vld [vmem:[#allocation13 + $0x780] sm:$0xff] }
 0x3a6   :  { %1965 = vmatmul.mubr.f32.gmra.mrb[22].mxu1 %v5465_v45  ;;  %v4189_v45 = vpack.c.bf16 %v2093_v57, %v2086_v52  ;;  %v2212_v57 = vld [vmem:[#allocation13 + $0x708] sm:$0xff] }
 0x3a7   :  { %4176 = vmatpush1.bf16.msra.mxu1 %v4175_v39  ;;  %v2191_v39 = vld [vmem:[#allocation13 + $0x660] sm:$0xff] }
 0x3a8   :  { %4178 = vmatprep.subr.bf16.mxu1 %v4177_v30  ;;  %v4215_v30 = vpack.c.bf16 %v2176_v37, %v2169_v20  ;;  %v4217_v48 = vpack.c.bf16 %v2191_v39, %v2184_v38  ;;  %v2249_v20 = vld [vmem:[#allocation13 + $0x830] sm:$0xff] }
 0x3ab   :  { %4180 = vmatpush1.bf16.msra.mxu1 %v4179_v43  ;;  %v2205_v43 = vld [vmem:[#allocation13 + $0x6d0] sm:$0xff] }
 0x3ac   :  { %4182 = vmatprep.subr.bf16.mxu1 %v4181_v41  ;;  %v2200_v41 = vld [vmem:[#allocation13 + $0x6a8] sm:$0xff] }
 0x3ad   :  { %v4349_v47 = vpack.c.bf16 %v2207_v44, %v2200_v41 }
 0x3af   :  { %4184 = vmatpush1.bf16.msra.mxu1 %v4183_v32  ;;  %v2206_v32 = vld [vmem:[#allocation13 + $0x6d8] sm:$0xff]  ;;  %4350 = vmatprep.subr.bf16.mxu0 %v4349_v47  ;;  %v2248_v47 = vld [vmem:[#allocation13 + $0x828] sm:$0xff] }
 0x3b0   :  { %4186 = vmatprep.subr.bf16.mxu1 %v4185_v49  ;;  %v4221_v49 = vpack.c.bf16 %v2205_v43, %v2198_v42  ;;  %v4351_v52 = vpack.c.bf16 %v2206_v32, %v2199_v25  ;;  %v2254_v25 = vld [vmem:[#allocation13 + $0x858] sm:$0xff] }
 0x3b2   :  { %4352 = vmatpush1.bf16.msra.mxu0 %v4351_v52 }
 0x3b3   :  { %4188 = vmatpush1.bf16.msra.mxu1 %v4187_v59  ;;  %v2219_v59 = vld [vmem:[#allocation13 + $0x740] sm:$0xff] }
 0x3b4   :  { %4190 = vmatprep.subr.bf16.mxu1 %v4189_v45  ;;  %v2214_v45 = vld [vmem:[#allocation13 + $0x718] sm:$0xff]  ;;  %v4225_v0 = vpack.c.bf16 %v2219_v59, %v2212_v57 }
 0x3b5   :  { %v4353_v63 = vpack.c.bf16 %v2221_v60, %v2214_v45  ;;  %v2253_v60 = vld [vmem:[#allocation13 + $0x850] sm:$0xff] }
 0x3b7   :  { %4192 = vmatpush1.bf16.msra.mxu1 %v4191_v1  ;;  %4354 = vmatprep.subr.bf16.mxu0 %v4353_v63  ;;  %v5476_v1 = vld [vmem:[#allocation11] sm:$0xf] }
 0x3b8   :  { %4194 = vmatprep.subr.bf16.mxu1 %v4193_v58  ;;  %v5480_v58 = vrot.slane %v5476_v1, %v5367_v54  ;;  %v5484_v2 = vrot.slane %v5476_v1, %v5372_v56 }
 0x3bb   :  { %4196 = vmatpush1.bf16.msra.mxu1 %v4195_v7 }
 0x3bc   :  { %4198 = vmatprep.subr.bf16.mxu1 %v4197_v8 }
 0x3bf   :  { %4200 = vmatpush1.bf16.msra.mxu1 %v4199_v14  ;;  %v2233_v14 = vld [vmem:[#allocation13 + $0x7b0] sm:$0xff] }
 0x3c0   :  { %4202 = vmatprep.subr.bf16.mxu1 %v4201_v16  ;;  %v2228_v16 = vld [vmem:[#allocation13 + $0x788] sm:$0xff] }
 0x3c3   :  { %4204 = vmatpush1.bf16.msra.mxu1 %v4203_v23  ;;  %v4355_v23 = vpack.c.bf16 %v2220_v11, %v2213_v9  ;;  %v2268_v9 = vld [vmem:[#allocation13 + $0x8c8] sm:$0xff] }
 0x3c4   :  { %4206 = vmatprep.subr.bf16.mxu1 %v4205_v24  ;;  %v2225_v24 = vld [vmem:[#allocation13 + $0x770] sm:$0xff] }
 0x3c5   :  { %v4231_v39 = vpack.c.bf16 %v2232_v26, %v2225_v24  ;;  %v2269_v26 = vld [vmem:[#allocation13 + $0x8d0] sm:$0xff] }
 0x3c7   :  { %4208 = vmatpush1.bf16.msra.mxu1 %v4207_v29  ;;  %v4229_v29 = vpack.c.bf16 %v2233_v14, %v2226_v12  ;;  %v2275_v12 = vld [vmem:[#allocation13 + $0x900] sm:$0xff]  ;;  %v2277_v14 = vld [vmem:[#allocation13 + $0x910] sm:$0xff] }
 0x3c8   :  { %4210 = vmatprep.subr.bf16.mxu1 %v4209_v17  ;;  %v4357_v17 = vpack.c.bf16 %v2235_v18, %v2228_v16 }
 0x3cb   :  { %4212 = vmatpush1.bf16.msra.mxu1 %v4211_v35  ;;  %v2247_v35 = vld [vmem:[#allocation13 + $0x820] sm:$0xff] }
 0x3cc   :  { %4214 = vmatprep.subr.bf16.mxu1 %v4213_v36  ;;  %v2242_v36 = vld [vmem:[#allocation13 + $0x7f8] sm:$0xff]  ;;  %v4233_v41 = vpack.c.bf16 %v2247_v35, %v2240_v10  ;;  %v2288_v35 = vld [vmem:[#allocation13 + $0x968] sm:$0xff] }
 0x3cd   :  { %v4361_v44 = vpack.c.bf16 %v2249_v20, %v2242_v36 }
 0x3cf   :  { %4216 = vmatpush1.bf16.msra.mxu1 %v4215_v30  ;;  %v4359_v30 = vpack.c.bf16 %v2234_v34, %v2227_v31  ;;  %v2291_v31 = vld [vmem:[#allocation13 + $0x980] sm:$0xff] }
 0x3d0   :  { %4218 = vmatprep.subr.bf16.mxu1 %v4217_v48  ;;  %v2239_v48 = vld [vmem:[#allocation13 + $0x7e0] sm:$0xff] }
 0x3d1   :  { %v4235_v59 = vpack.c.bf16 %v2246_v61, %v2239_v48  ;;  %v2303_v48 = vld [vmem:[#allocation13 + $0x9e0] sm:$0xff]  ;;  %v2298_v61 = vld [vmem:[#allocation13 + $0x9b8] sm:$0xff] }
 0x3d3   :  { %4220 = vmatpush1.bf16.msra.mxu1 %v4219_v46  ;;  %v2241_v46 = vld [vmem:[#allocation13 + $0x7f0] sm:$0xff] }
 0x3d4   :  { %4222 = vmatprep.subr.bf16.mxu1 %v4221_v49  ;;  %v2261_v49 = vld [vmem:[#allocation13 + $0x890] sm:$0xff]  ;;  %v4363_v45 = vpack.c.bf16 %v2248_v47, %v2241_v46  ;;  %v2302_v46 = vld [vmem:[#allocation13 + $0x9d8] sm:$0xff] }
 0x3d5   :  { %v4237_v4 = vpack.c.bf16 %v2261_v49, %v2254_v25  ;;  %v2304_v49 = vld [vmem:[#allocation13 + $0x9e8] sm:$0xff] }
 0x3d7   :  { %4224 = vmatpush1.bf16.msra.mxu1 %v4223_v62  ;;  %v2260_v62 = vld [vmem:[#allocation13 + $0x888] sm:$0xff] }
 0x3d8   :  { %4226 = vmatprep.subr.bf16.mxu1 %v4225_v0  ;;  %v4239_v16 = vpack.c.bf16 %v2260_v62, %v2253_v60  ;;  %v2309_v62 = vld [vmem:[#allocation13 + $0xa10] sm:$0xff] }
 0x44d   :  { %v1859_v3 = vpop.f32.mrb[8].mxu1 }
 0x44e   :  { %v1860_v7 = vadd.f32 %v1859_v3, %v5480_v58  ;;  %v1861_v8 = vpop.f32.mrb[9].mxu1 }
 0x44f   :  { %v1862_v13 = vadd.f32 %v1861_v8, %v5484_v2  ;;  %v2262_v8 = vld [vmem:[#allocation13 + $0x898] sm:$0xff] }
 0x450   :  { %v5490_v55 = vmax.f32 %v1860_v7, 0.0  ;;  %v2255_v7 = vld [vmem:[#allocation13 + $0x860] sm:$0xff] }
 0x451   :  { %v5488_v19 = vmax.f32 %v1862_v13, 0.0  ;;  %v1865_v21 = vpop.f32.mrb[10].mxu1  ;;  %v2270_v13 = vld [vmem:[#allocation13 + $0x8d8] sm:$0xff]  ;;  %v4367_v18 = vpack.c.bf16 %v2262_v8, %v2255_v7  ;;  %v2324_v8 = vld [vmem:[#allocation13 + $0xa88] sm:$0xff] }
 0x452   :  { %v1866_v27 = vadd.f32 %v1865_v21, %v5480_v58  ;;  %v1867_v28 = vpop.f32.mrb[11].mxu1  ;;  %v2267_v21 = vld [vmem:[#allocation13 + $0x8c0] sm:$0xff]  ;;  %v4369_v24 = vpack.c.bf16 %v2277_v14, %v2270_v13  ;;  %v2318_v7 = vld [vmem:[#allocation13 + $0xa58] sm:$0xff]  ;;  %v2333_v13 = vld [vmem:[#allocation13 + $0xad0] sm:$0xff] }
 0x453   :  { %v1868_v33 = vadd.f32 %v1867_v28, %v5484_v2  ;;  %2536 = vmatprep.mubr.f32.mxu1 %v5488_v19  ;;  %2714 = vmatprep.mubr.f32.mxu0 %v5488_v19  ;;  %v2282_v28 = vld [vmem:[#allocation13 + $0x938] sm:$0xff] }
 0x454   :  { %2537 = vmatmul.mubr.f32.vlgmr.msra.gmra.mrb[24].mxu1 %v5490_v55  ;;  %2715 = vmatmul.mubr.f32.vlgmr.msra.gmra.mrb[16].mxu0 %v5490_v55  ;;  %v5500_v40 = vmax.f32 %v1866_v27, 0.0  ;;  %v2276_v27 = vld [vmem:[#allocation13 + $0x908] sm:$0xff] }
 0x455   :  { %v5498_v37 = vmax.f32 %v1868_v33, 0.0  ;;  %4228 = vmatpush1.bf16.msra.mxu1 %v4227_v22  ;;  %4356 = vmatpush1.bf16.msra.mxu0 %v4355_v23  ;;  %v1871_v38 = vpop.f32.mrb[12].mxu1  ;;  %v2274_v22 = vld [vmem:[#allocation13 + $0x8f8] sm:$0xff]  ;;  %v4241_v23 = vpack.c.bf16 %v2275_v12, %v2268_v9  ;;  %v4371_v10 = vpack.c.bf16 %v2276_v27, %v2269_v26  ;;  %v2281_v33 = vld [vmem:[#allocation13 + $0x930] sm:$0xff]  ;;  %v5528_v9 = vrot.slane %v5476_v1, %v5383_v15 }
 0x456   :  { %v1872_v42 = vadd.f32 %v1871_v38, %v5480_v58  ;;  %v1873_v43 = vpop.f32.mrb[13].mxu1  ;;  %4230 = vmatprep.subr.bf16.mxu1 %v4229_v29  ;;  %4358 = vmatprep.subr.bf16.mxu0 %v4357_v17  ;;  %v2289_v29 = vld [vmem:[#allocation13 + $0x970] sm:$0xff]  ;;  %v2284_v17 = vld [vmem:[#allocation13 + $0x948] sm:$0xff]  ;;  %v4243_v34 = vpack.c.bf16 %v2274_v22, %v2267_v21  ;;  %v2283_v38 = vld [vmem:[#allocation13 + $0x940] sm:$0xff] }
 0x457   :  { %v1874_v32 = vadd.f32 %v1873_v43, %v5484_v2  ;;  %2542 = vmatprep.mubr.f32.mxu1 %v5498_v37  ;;  %2720 = vmatprep.mubr.f32.mxu0 %v5498_v37  ;;  %v4245_v36 = vpack.c.bf16 %v2289_v29, %v2282_v28  ;;  %v4373_v20 = vpack.c.bf16 %v2291_v31, %v2284_v17  ;;  %v2326_v12 = vld [vmem:[#allocation13 + $0xa98] sm:$0xff]  ;;  %v2323_v21 = vld [vmem:[#allocation13 + $0xa80] sm:$0xff]  ;;  %v2325_v27 = vld [vmem:[#allocation13 + $0xa90] sm:$0xff] }
 0x458   :  { %2543 = vmatmul.mubr.f32.gmra.mrb[26].mxu1 %v5500_v40  ;;  %2721 = vmatmul.mubr.f32.gmra.mrb[18].mxu0 %v5500_v40  ;;  %v5510_v63 = vmax.f32 %v1872_v42, 0.0  ;;  %v2305_v42 = vld [vmem:[#allocation13 + $0x9f0] sm:$0xff]  ;;  %v4247_v43 = vpack.c.bf16 %v2288_v35, %v2281_v33  ;;  %v2330_v22 = vld [vmem:[#allocation13 + $0xab8] sm:$0xff]  ;;  %v4385_v26 = vpack.c.bf16 %v2333_v13, %v2326_v12  ;;  %v2332_v28 = vld [vmem:[#allocation13 + $0xac8] sm:$0xff] }
 0x459   :  { %v5508_v52 = vmax.f32 %v1874_v32, 0.0  ;;  %4232 = vmatpush1.bf16.msra.mxu1 %v4231_v39  ;;  %4360 = vmatpush1.bf16.msra.mxu0 %v4359_v30  ;;  %v1877_v57 = vpop.f32.mrb[14].mxu1  ;;  %v2290_v39 = vld [vmem:[#allocation13 + $0x978] sm:$0xff]  ;;  %v2296_v30 = vld [vmem:[#allocation13 + $0x9a8] sm:$0xff]  ;;  %v4377_v25 = vpack.c.bf16 %v2305_v42, %v2298_v61  ;;  %v2297_v32 = vld [vmem:[#allocation13 + $0x9b0] sm:$0xff] }
 0x45a   :  { %v1878_v0 = vadd.f32 %v1877_v57, %v5480_v58  ;;  %v1879_v3 = vpop.f32.mrb[15].mxu1  ;;  %4234 = vmatprep.subr.bf16.mxu1 %v4233_v41  ;;  %4362 = vmatprep.subr.bf16.mxu0 %v4361_v44  ;;  %v4375_v41 = vpack.c.bf16 %v2290_v39, %v2283_v38  ;;  %v2295_v44 = vld [vmem:[#allocation13 + $0x9a0] sm:$0xff]  ;;  %v4249_v47 = vpack.c.bf16 %v2303_v48, %v2296_v30  ;;  %v2312_v57 = vld [vmem:[#allocation13 + $0xa28] sm:$0xff]  ;;  %v2338_v29 = vld [vmem:[#allocation13 + $0xaf8] sm:$0xff] }
 0x45b   :  { %v1880_v11 = vadd.f32 %v1879_v3, %v5484_v2  ;;  %2548 = vmatprep.mubr.f32.mxu1 %v5508_v52  ;;  %2726 = vmatprep.mubr.f32.mxu0 %v5508_v52  ;;  %v4379_v60 = vpack.c.bf16 %v2304_v49, %v2297_v32  ;;  %v4253_v3 = vpack.c.bf16 %v2317_v51, %v2310_v50  ;;  %v2345_v31 = vld [vmem:[#allocation13 + $0xb30] sm:$0xff]  ;;  %v2344_v39 = vld [vmem:[#allocation13 + $0xb28] sm:$0xff]  ;;  %v2339_v42 = vld [vmem:[#allocation13 + $0xb00] sm:$0xff] }
 0x45c   :  { %2549 = vmatmul.mubr.f32.gmra.mrb[28].mxu1 %v5510_v63  ;;  %2727 = vmatmul.mubr.f32.gmra.mrb[20].mxu0 %v5510_v63  ;;  %v5520_v2 = vmax.f32 %v1878_v0, 0.0  ;;  %v2316_v0 = vld [vmem:[#allocation13 + $0xa48] sm:$0xff]  ;;  %v2337_v38 = vld [vmem:[#allocation13 + $0xaf0] sm:$0xff]  ;;  %v4261_v48 = vpack.c.bf16 %v2345_v31, %v2338_v29  ;;  %v2351_v50 = vld [vmem:[#allocation13 + $0xb60] sm:$0xff] }
 0x45d   :  { %v5518_v58 = vmax.f32 %v1880_v11, 0.0  ;;  %4236 = vmatpush1.bf16.msra.mxu1 %v4235_v59  ;;  %4364 = vmatpush1.bf16.msra.mxu0 %v4363_v45  ;;  %v2319_v59 = vld [vmem:[#allocation13 + $0xa60] sm:$0xff]  ;;  %v4251_v45 = vpack.c.bf16 %v2302_v46, %v2295_v44  ;;  %v2354_v46 = vld [vmem:[#allocation13 + $0xb78] sm:$0xff]  ;;  %v4263_v32 = vpack.c.bf16 %v2344_v39, %v2337_v38  ;;  %v2365_v12 = vld [vmem:[#allocation13 + $0xbd0] sm:$0xff] }
 0x45e   :  { %4238 = vmatprep.subr.bf16.mxu1 %v4237_v4  ;;  %4366 = vmatprep.subr.bf16.mxu0 %v4365_v5  ;;  %v4381_v4 = vpack.c.bf16 %v2319_v59, %v2312_v57  ;;  %v2311_v5 = vld [vmem:[#allocation13 + $0xa20] sm:$0xff]  ;;  %v2358_v51 = vld [vmem:[#allocation13 + $0xb98] sm:$0xff]  ;;  %v2372_v13 = vld [vmem:[#allocation13 + $0xc08] sm:$0xff] }
 0x45f   :  { %2554 = vmatprep.mubr.f32.mxu1 %v5518_v58  ;;  %2732 = vmatprep.mubr.f32.mxu0 %v5518_v58  ;;  %v2331_v11 = vld [vmem:[#allocation13 + $0xac0] sm:$0xff]  ;;  %v4271_v29 = vpack.c.bf16 %v2372_v13, %v2365_v12  ;;  %v2388_v38 = vld [vmem:[#allocation13 + $0xc88] sm:$0xff]  ;;  %v2394_v39 = vld [vmem:[#allocation13 + $0xcb8] sm:$0xff] }
 0x460   :  { %2555 = vmatmul.mubr.f32.gmra.mrb[30].mxu1 %v5520_v2  ;;  %2733 = vmatmul.mubr.f32.gmra.mrb[22].mxu0 %v5520_v2  ;;  %v2359_v44 = vld [vmem:[#allocation13 + $0xba0] sm:$0xff]  ;;  %v2416_v12 = vld [vmem:[#allocation13 + $0xd68] sm:$0xff]  ;;  %v2422_v13 = vld [vmem:[#allocation13 + $0xd98] sm:$0xff] }
 0x461   :  { %4240 = vmatpush1.bf16.msra.mxu1 %v4239_v16  ;;  %4368 = vmatpush1.bf16.msra.mxu0 %v4367_v18  ;;  %v4255_v16 = vpack.c.bf16 %v2316_v0, %v2309_v62  ;;  %v4383_v18 = vpack.c.bf16 %v2318_v7, %v2311_v5  ;;  %v2360_v62 = vld [vmem:[#allocation13 + $0xba8] sm:$0xff]  ;;  %v2366_v0 = vld [vmem:[#allocation13 + $0xbd8] sm:$0xff]  ;;  %v2375_v5 = vld [vmem:[#allocation13 + $0xc20] sm:$0xff] }
 0x462   :  { %4242 = vmatprep.subr.bf16.mxu1 %v4241_v23  ;;  %4370 = vmatprep.subr.bf16.mxu0 %v4369_v24  ;;  %v4257_v24 = vpack.c.bf16 %v2331_v11, %v2324_v8  ;;  %v4267_v8 = vpack.c.bf16 %v2358_v51, %v2351_v50  ;;  %v2379_v31 = vld [vmem:[#allocation13 + $0xc40] sm:$0xff]  ;;  %v2402_v50 = vld [vmem:[#allocation13 + $0xcf8] sm:$0xff]  ;;  %v2408_v51 = vld [vmem:[#allocation13 + $0xd28] sm:$0xff] }
 0x465   :  { %4244 = vmatpush1.bf16.msra.mxu1 %v4243_v34  ;;  %4372 = vmatpush1.bf16.msra.mxu0 %v4371_v10  ;;  %v2340_v34 = vld [vmem:[#allocation13 + $0xb08] sm:$0xff]  ;;  %v2347_v10 = vld [vmem:[#allocation13 + $0xb40] sm:$0xff] }
 0x466   :  { %4246 = vmatprep.subr.bf16.mxu1 %v4245_v36  ;;  %4374 = vmatprep.subr.bf16.mxu0 %v4373_v20  ;;  %v4259_v36 = vpack.c.bf16 %v2330_v22, %v2323_v21  ;;  %v4387_v20 = vpack.c.bf16 %v2332_v28, %v2325_v27  ;;  %v4389_v61 = vpack.c.bf16 %v2347_v10, %v2340_v34  ;;  %v2367_v22 = vld [vmem:[#allocation13 + $0xbe0] sm:$0xff]  ;;  %v2382_v27 = vld [vmem:[#allocation13 + $0xc58] sm:$0xff]  ;;  %v2389_v28 = vld [vmem:[#allocation13 + $0xc90] sm:$0xff] }
 0x467   :  { %v2386_v34 = vld [vmem:[#allocation13 + $0xc78] sm:$0xff] }
 0x469   :  { %4248 = vmatpush1.bf16.msra.mxu1 %v4247_v43  ;;  %4376 = vmatpush1.bf16.msra.mxu0 %v4375_v41  ;;  %v2346_v43 = vld [vmem:[#allocation13 + $0xb38] sm:$0xff]  ;;  %v2352_v41 = vld [vmem:[#allocation13 + $0xb68] sm:$0xff] }
 0x46a   :  { %4250 = vmatprep.subr.bf16.mxu1 %v4249_v47  ;;  %4378 = vmatprep.subr.bf16.mxu0 %v4377_v25  ;;  %v2361_v47 = vld [vmem:[#allocation13 + $0xbb0] sm:$0xff]  ;;  %v4391_v49 = vpack.c.bf16 %v2346_v43, %v2339_v42  ;;  %v4265_v59 = vpack.c.bf16 %v2359_v44, %v2352_v41  ;;  %v2403_v42 = vld [vmem:[#allocation13 + $0xd00] sm:$0xff]  ;;  %v4275_v43 = vpack.c.bf16 %v2386_v34, %v2379_v31  ;;  %v2430_v34 = vld [vmem:[#allocation13 + $0xdd8] sm:$0xff] }
 0x46b   :  { %v2393_v44 = vld [vmem:[#allocation13 + $0xcb0] sm:$0xff]  ;;  %v2423_v31 = vld [vmem:[#allocation13 + $0xda0] sm:$0xff] }
 0x46d   :  { %v5530_v14 = vpop.f32.mrb[16].mxu1  ;;  %4252 = vmatpush1.bf16.msra.mxu1 %v4251_v45  ;;  %4380 = vmatpush1.bf16.msra.mxu0 %v4379_v60  ;;  %v4393_v45 = vpack.c.bf16 %v2361_v47, %v2354_v46  ;;  %v2353_v60 = vld [vmem:[#allocation13 + $0xb70] sm:$0xff]  ;;  %v2400_v46 = vld [vmem:[#allocation13 + $0xce8] sm:$0xff] }
 0x46e   :  { %v1950_v23 = vpop.f32.mrb[17].mxu1  ;;  %4254 = vmatprep.subr.bf16.mxu1 %v4253_v3  ;;  %4382 = vmatprep.subr.bf16.mxu0 %v4381_v4  ;;  %v2373_v3 = vld [vmem:[#allocation13 + $0xc10] sm:$0xff]  ;;  %v2368_v4 = vld [vmem:[#allocation13 + $0xbe8] sm:$0xff]  ;;  %v4395_v11 = vpack.c.bf16 %v2360_v62, %v2353_v60  ;;  %v4279_v62 = vpack.c.bf16 %v2400_v46, %v2393_v44 }
 0x46f   :  { %v1951_v17 = vadd.f32 %v1950_v23, %v5528_v9  ;;  %v4397_v21 = vpack.c.bf16 %v2375_v5, %v2368_v4  ;;  %v2374_v23 = vld [vmem:[#allocation13 + $0xc18] sm:$0xff]  ;;  %v2417_v60 = vld [vmem:[#allocation13 + $0xd70] sm:$0xff] }
 0x470   :  { %v2414_v4 = vld [vmem:[#allocation13 + $0xd58] sm:$0xff]  ;;  %v1993_v46 = vld [vmem:[#allocation13 + $0x30] sm:$0xff] }
 0x471   :  { %v5533_v33 = vmax.f32 %v1951_v17, 0.0  ;;  %v5535_v35 = vpop.f32.mrb[18].mxu1  ;;  %4256 = vmatpush1.bf16.msra.mxu1 %v4255_v16  ;;  %4384 = vmatpush1.bf16.msra.mxu0 %v4383_v18  ;;  %v4269_v18 = vpack.c.bf16 %v2373_v3, %v2366_v0  ;;  %v4399_v17 = vpack.c.bf16 %v2374_v23, %v2367_v22  ;;  %v2407_v3 = vld [vmem:[#allocation13 + $0xd20] sm:$0xff] }
 0x472   :  { %v5537_v30 = vpop.f32.mrb[19].mxu1  ;;  %4258 = vmatprep.subr.bf16.mxu1 %v4257_v24  ;;  %4386 = vmatprep.subr.bf16.mxu0 %v4385_v26  ;;  %v2380_v24 = vld [vmem:[#allocation13 + $0xc48] sm:$0xff]  ;;  %v2387_v26 = vld [vmem:[#allocation13 + $0xc80] sm:$0xff]  ;;  %v4283_v23 = vpack.c.bf16 %v2414_v4, %v2407_v3 }
 0x473   :  { %2625 = vmatprep.mubr.f32.mxu1 %v5533_v33  ;;  %2803 = vmatprep.mubr.f32.mxu0 %v5533_v33  ;;  %v4273_v10 = vpack.c.bf16 %v2387_v26, %v2380_v24  ;;  %v2431_v22 = vld [vmem:[#allocation13 + $0xde0] sm:$0xff]  ;;  %v2421_v26 = vld [vmem:[#allocation13 + $0xd90] sm:$0xff]  ;;  %v1957_v44 = vadd.f32 %v5537_v30, %v5528_v9 }
 0x475   :  { %v5541_v25 = vpop.f32.mrb[20].mxu1  ;;  %4260 = vmatpush1.bf16.msra.mxu1 %v4259_v36  ;;  %4388 = vmatpush1.bf16.msra.mxu0 %v4387_v20  ;;  %v4401_v36 = vpack.c.bf16 %v2389_v28, %v2382_v27  ;;  %v2381_v20 = vld [vmem:[#allocation13 + $0xc50] sm:$0xff]  ;;  %v2428_v27 = vld [vmem:[#allocation13 + $0xdc8] sm:$0xff]  ;;  %v5551_v28 = vrot.slane %v5476_v1, %v5401_v6  ;;  %v5561_v30 = vmax.f32 %v1957_v44, 0.0  ;;  %v2035_v44 = vld [vmem:[#allocation13 + $0x180] sm:$0xff] }
 0x476   :  { %v5543_v57 = vpop.f32.mrb[21].mxu1  ;;  %4262 = vmatprep.subr.bf16.mxu1 %v4261_v48  ;;  %4390 = vmatprep.subr.bf16.mxu0 %v4389_v61  ;;  %v2401_v48 = vld [vmem:[#allocation13 + $0xcf0] sm:$0xff]  ;;  %v2396_v61 = vld [vmem:[#allocation13 + $0xcc8] sm:$0xff]  ;;  %v4403_v41 = vpack.c.bf16 %v2388_v38, %v2381_v20 }
 0x477   :  { %v4277_v47 = vpack.c.bf16 %v2401_v48, %v2394_v39  ;;  %v2105_v20 = vld [vmem:[#allocation13 + $0x3b0] sm:$0xff]  ;;  %v2112_v38 = vld [vmem:[#allocation13 + $0x3e8] sm:$0xff]  ;;  %v4287_v39 = vpack.c.bf16 %v2428_v27, %v2421_v26  ;;  %v4415_v48 = vpack.c.bf16 %v2430_v34, %v2423_v31  ;;  %v1963_v3 = vadd.f32 %v5543_v57, %v5528_v9  ;;  %v2026_v26 = vld [vmem:[#allocation13 + $0x138] sm:$0xff] }
 0x478   :  { %v1961_v57 = vadd.f32 %v5541_v25, %v5551_v28  ;;  %v2021_v34 = vld [vmem:[#allocation13 + $0x110] sm:$0xff] }
 0x479   :  { %v5545_v7 = vpop.f32.mrb[22].mxu1  ;;  %4264 = vmatpush1.bf16.msra.mxu1 %v4263_v32  ;;  %4392 = vmatpush1.bf16.msra.mxu0 %v4391_v49  ;;  %v4405_v32 = vpack.c.bf16 %v2403_v42, %v2396_v61  ;;  %v2395_v49 = vld [vmem:[#allocation13 + $0xcc0] sm:$0xff]  ;;  %v1949_v61 = vadd.f32 %v5530_v14, %v5551_v28  ;;  %v4545_v42 = vpack.c.bf16 %v2112_v38, %v2105_v20  ;;  %v5573_v27 = vmax.f32 %v1963_v3, 0.0  ;;  %v2041_v25 = vld [vmem:[#allocation13 + $0x1b0] sm:$0xff]  ;;  %v2154_v38 = vld [vmem:[#allocation13 + $0x538] sm:$0xff] }
 0x47a   :  { %v5547_v16 = vpop.f32.mrb[23].mxu1  ;;  %4266 = vmatprep.subr.bf16.mxu1 %v4265_v59  ;;  %4394 = vmatprep.subr.bf16.mxu0 %v4393_v45  ;;  %v2415_v59 = vld [vmem:[#allocation13 + $0xd60] sm:$0xff]  ;;  %v2410_v45 = vld [vmem:[#allocation13 + $0xd38] sm:$0xff]  ;;  %v4407_v0 = vpack.c.bf16 %v2402_v50, %v2395_v49  ;;  %v2013_v49 = vld [vmem:[#allocation13 + $0xd0] sm:$0xff]  ;;  %v1955_v14 = vadd.f32 %v5535_v35, %v5551_v28 }
 0x47b   :  { %v4281_v5 = vpack.c.bf16 %v2415_v59, %v2408_v51  ;;  %v2119_v50 = vld [vmem:[#allocation13 + $0x420] sm:$0xff]  ;;  %v2126_v51 = vld [vmem:[#allocation13 + $0x458] sm:$0xff]  ;;  %v5557_v59 = vmax.f32 %v1949_v61, 0.0  ;;  %v2033_v61 = vld [vmem:[#allocation13 + $0x170] sm:$0xff] }
 0x47c   :  { %v2027_v35 = vld [vmem:[#allocation13 + $0x140] sm:$0xff]  ;;  %v2056_v3 = vld [vmem:[#allocation13 + $0x228] sm:$0xff] }
 0x47d   :  { %4268 = vmatpush1.bf16.msra.mxu1 %v4267_v8  ;;  %4396 = vmatpush1.bf16.msra.mxu0 %v4395_v11  ;;  %v4409_v8 = vpack.c.bf16 %v2417_v60, %v2410_v45  ;;  %v2409_v11 = vld [vmem:[#allocation13 + $0xd30] sm:$0xff]  ;;  %v2147_v20 = vld [vmem:[#allocation13 + $0x500] sm:$0xff] }
 0x47e   :  { %4270 = vmatprep.subr.bf16.mxu1 %v4269_v18  ;;  %4398 = vmatprep.subr.bf16.mxu0 %v4397_v21  ;;  %v2429_v18 = vld [vmem:[#allocation13 + $0xdd0] sm:$0xff]  ;;  %v2424_v21 = vld [vmem:[#allocation13 + $0xda8] sm:$0xff]  ;;  %v4411_v24 = vpack.c.bf16 %v2416_v12, %v2409_v11  ;;  %v2014_v11 = vld [vmem:[#allocation13 + $0xd8] sm:$0xff] }
 0x47f   :  { %v2020_v12 = vld [vmem:[#allocation13 + $0x108] sm:$0xff] }
 0x481   :  { %4272 = vmatpush1.bf16.msra.mxu1 %v4271_v29  ;;  %4400 = vmatpush1.bf16.msra.mxu0 %v4399_v17  ;;  %v4285_v29 = vpack.c.bf16 %v2429_v18, %v2422_v13  ;;  %v4413_v17 = vpack.c.bf16 %v2431_v22, %v2424_v21  ;;  %v2133_v13 = vld [vmem:[#allocation13 + $0x490] sm:$0xff]  ;;  %v2140_v18 = vld [vmem:[#allocation13 + $0x4c8] sm:$0xff]  ;;  %v5569_v21 = vmax.f32 %v1955_v14, 0.0  ;;  %v2047_v14 = vld [vmem:[#allocation13 + $0x1e0] sm:$0xff] }
 0x482   :  { %4274 = vmatprep.subr.bf16.mxu1 %v4273_v10  ;;  %4402 = vmatprep.subr.bf16.mxu0 %v4401_v36  ;;  %v1992_v10 = vld [vmem:[#allocation13 + $0x28] sm:$0xff]  ;;  %v1999_v36 = vld [vmem:[#allocation13 + $0x60] sm:$0xff]  ;;  %v4553_v31 = vpack.c.bf16 %v2140_v18, %v2133_v13  ;;  %v2061_v13 = vld [vmem:[#allocation13 + $0x250] sm:$0xff] }
 0x483   :  { %v4417_v1 = vpack.c.bf16 %v1999_v36, %v1992_v10  ;;  %v2028_v10 = vld [vmem:[#allocation13 + $0x148] sm:$0xff]  ;;  %v2034_v36 = vld [vmem:[#allocation13 + $0x178] sm:$0xff] }
 0x484   :  { %v2068_v18 = vld [vmem:[#allocation13 + $0x288] sm:$0xff] }
 0x485   :  { %4276 = vmatpush1.bf16.msra.mxu1 %v4275_v43  ;;  %4404 = vmatpush1.bf16.msra.mxu0 %v4403_v41  ;;  %v1991_v43 = vld [vmem:[#allocation13 + $0x20] sm:$0xff]  ;;  %v1998_v41 = vld [vmem:[#allocation13 + $0x58] sm:$0xff] }
 0x486   :  { %4278 = vmatprep.subr.bf16.mxu1 %v4277_v47  ;;  %4406 = vmatprep.subr.bf16.mxu0 %v4405_v32  ;;  %v2000_v47 = vld [vmem:[#allocation13 + $0x68] sm:$0xff]  ;;  %v2006_v32 = vld [vmem:[#allocation13 + $0x98] sm:$0xff]  ;;  %v4419_v45 = vpack.c.bf16 %v1998_v41, %v1991_v43  ;;  %v4429_v43 = vpack.c.bf16 %v2041_v25, %v2034_v36  ;;  %v4557_v41 = vpack.c.bf16 %v2154_v38, %v2147_v20  ;;  %v2077_v38 = vld [vmem:[#allocation13 + $0x2d0] sm:$0xff] }
 0x487   :  { %v4547_v60 = vpack.c.bf16 %v2000_v47, %v1993_v46  ;;  %v4421_v4 = vpack.c.bf16 %v2013_v49, %v2006_v32  ;;  %v2042_v46 = vld [vmem:[#allocation13 + $0x1b8] sm:$0xff]  ;;  %v2048_v47 = vld [vmem:[#allocation13 + $0x1e8] sm:$0xff] }
 0x488   :  { %v2168_v32 = vld [vmem:[#allocation13 + $0x5a8] sm:$0xff]  ;;  %v2082_v36 = vld [vmem:[#allocation13 + $0x2f8] sm:$0xff] }
 0x489   :  { %4280 = vmatpush1.bf16.msra.mxu1 %v4279_v62  ;;  %4408 = vmatpush1.bf16.msra.mxu0 %v4407_v0  ;;  %v2005_v62 = vld [vmem:[#allocation13 + $0x90] sm:$0xff]  ;;  %v2012_v0 = vld [vmem:[#allocation13 + $0xc8] sm:$0xff] }
 0x48a   :  { %4282 = vmatprep.subr.bf16.mxu1 %v4281_v5  ;;  %4410 = vmatprep.subr.bf16.mxu0 %v4409_v8  ;;  %v4549_v5 = vpack.c.bf16 %v2126_v51, %v2119_v50  ;;  %v2007_v8 = vld [vmem:[#allocation13 + $0xa0] sm:$0xff]  ;;  %v4423_v22 = vpack.c.bf16 %v2012_v0, %v2005_v62  ;;  %v4559_v51 = vpack.c.bf16 %v2042_v46, %v2035_v44  ;;  %v2049_v0 = vld [vmem:[#allocation13 + $0x1f0] sm:$0xff]  ;;  %v2096_v46 = vld [vmem:[#allocation13 + $0x368] sm:$0xff] }
 0x48b   :  { %v2089_v44 = vld [vmem:[#allocation13 + $0x330] sm:$0xff] }
 0x48d   :  { %4284 = vmatpush1.bf16.msra.mxu1 %v4283_v23  ;;  %4412 = vmatpush1.bf16.msra.mxu0 %v4411_v24  ;;  %v4551_v23 = vpack.c.bf16 %v2014_v11, %v2007_v8  ;;  %v2019_v24 = vld [vmem:[#allocation13 + $0x100] sm:$0xff]  ;;  %v2182_v11 = vld [vmem:[#allocation13 + $0x618] sm:$0xff] }
 0x48e   :  { %4286 = vmatprep.subr.bf16.mxu1 %v4285_v29  ;;  %4414 = vmatprep.subr.bf16.mxu0 %v4413_v17  ;;  %v1969_v29 = vadd.f32 %v5547_v16, %v5528_v9  ;;  %v4425_v17 = vpack.c.bf16 %v2027_v35, %v2020_v12  ;;  %v1967_v9 = vadd.f32 %v5545_v7, %v5551_v28  ;;  %v2055_v7 = vld [vmem:[#allocation13 + $0x220] sm:$0xff]  ;;  %v2161_v28 = vld [vmem:[#allocation13 + $0x570] sm:$0xff] }
 0x48f   :  { %v4427_v16 = vpack.c.bf16 %v2026_v26, %v2019_v24  ;;  %v4561_v62 = vpack.c.bf16 %v2168_v32, %v2161_v28  ;;  %v2175_v8 = vld [vmem:[#allocation13 + $0x5e0] sm:$0xff]  ;;  %v4563_v35 = vpack.c.bf16 %v2056_v3, %v2049_v0  ;;  %v2070_v24 = vld [vmem:[#allocation13 + $0x298] sm:$0xff]  ;;  %v2076_v26 = vld [vmem:[#allocation13 + $0x2c8] sm:$0xff] }
 0x490   :  { %v5591_v49 = vmax.f32 %v1967_v9, 0.0  ;;  %v2084_v9 = vld [vmem:[#allocation13 + $0x308] sm:$0xff]  ;;  %v2091_v28 = vld [vmem:[#allocation13 + $0x340] sm:$0xff]  ;;  %v2098_v32 = vld [vmem:[#allocation13 + $0x378] sm:$0xff] }
 0x491   :  { %4288 = vmatpush1.bf16.msra.mxu1 %v4287_v39  ;;  %4416 = vmatpush1.bf16.msra.mxu0 %v4415_v48  ;;  %v5581_v39 = vmax.f32 %v1961_v57, 0.0  ;;  %v4555_v48 = vpack.c.bf16 %v2028_v10, %v2021_v34  ;;  %v4439_v34 = vpack.c.bf16 %v2068_v18, %v2061_v13  ;;  %v2075_v10 = vld [vmem:[#allocation13 + $0x2c0] sm:$0xff]  ;;  %v2350_v18 = vld [vmem:[#allocation13 + $0xb58] sm:$0xff] }
 0x492   :  { %4418 = vmatprep.subr.bf16.mxu1 %v4417_v1  ;;  %4546 = vmatprep.subr.bf16.mxu0 %v4545_v42  ;;  %v2040_v1 = vld [vmem:[#allocation13 + $0x1a8] sm:$0xff]  ;;  %v5585_v42 = vmax.f32 %v1969_v29, 0.0  ;;  %v2083_v29 = vld [vmem:[#allocation13 + $0x300] sm:$0xff] }
 0x493   :  { %v4431_v50 = vpack.c.bf16 %v2040_v1, %v2033_v61  ;;  %v4441_v25 = vpack.c.bf16 %v2083_v29, %v2076_v26  ;;  %v2203_v61 = vld [vmem:[#allocation13 + $0x6c0] sm:$0xff]  ;;  %v2210_v1 = vld [vmem:[#allocation13 + $0x6f8] sm:$0xff]  ;;  %v2124_v26 = vld [vmem:[#allocation13 + $0x448] sm:$0xff] }
 0x494   :  { %2626 = vmatmul.mubr.f32.vlgmr.msra.gmra.mrb[24].mxu1 %v5557_v59  ;;  %2804 = vmatmul.mubr.f32.vlgmr.msra.gmra.mrb[16].mxu0 %v5557_v59  ;;  %v2343_v13 = vld [vmem:[#allocation13 + $0xb20] sm:$0xff] }
 0x495   :  { %2631 = vmatprep.mubr.f32.mxu1 %v5561_v30  ;;  %2809 = vmatprep.mubr.f32.mxu0 %v5561_v30  ;;  %v2231_v29 = vld [vmem:[#allocation13 + $0x7a0] sm:$0xff] }
 0x496   :  { %4420 = vmatpush1.bf16.msra.mxu1 %v4419_v45  ;;  %4548 = vmatpush3.bf16.msra.mxu0 %v4547_v60  ;;  %v2054_v45 = vld [vmem:[#allocation13 + $0x218] sm:$0xff]  ;;  %v4433_v60 = vpack.c.bf16 %v2055_v7, %v2048_v47  ;;  %v4573_v7 = vpack.c.bf16 %v2210_v1, %v2203_v61  ;;  %v2252_v1 = vld [vmem:[#allocation13 + $0x848] sm:$0xff] }
 0x497   :  { %4422 = vmatprep.subr.bf16.mxu1 %v4421_v4  ;;  %4550 = vmatprep.subr.bf16.mxu0 %v4549_v5  ;;  %v2062_v4 = vld [vmem:[#allocation13 + $0x258] sm:$0xff]  ;;  %v2069_v5 = vld [vmem:[#allocation13 + $0x290] sm:$0xff]  ;;  %v4435_v12 = vpack.c.bf16 %v2054_v45, %v2047_v14  ;;  %v2336_v45 = vld [vmem:[#allocation13 + $0xae8] sm:$0xff] }
 0x498   :  { %2632 = vmatmul.mubr.f32.gmra.mrb[26].mxu1 %v5569_v21  ;;  %2810 = vmatmul.mubr.f32.gmra.mrb[18].mxu0 %v5569_v21  ;;  %v4437_v57 = vpack.c.bf16 %v2069_v5, %v2062_v4  ;;  %v2329_v14 = vld [vmem:[#allocation13 + $0xab0] sm:$0xff]  ;;  %v2103_v4 = vld [vmem:[#allocation13 + $0x3a0] sm:$0xff]  ;;  %v2110_v5 = vld [vmem:[#allocation13 + $0x3d8] sm:$0xff] }
 0x499   :  { %2637 = vmatprep.mubr.f32.mxu1 %v5573_v27  ;;  %2815 = vmatprep.mubr.f32.mxu0 %v5573_v27  ;;  %v4577_v3 = vpack.c.bf16 %v2336_v45, %v2329_v14  ;;  %v2266_v45 = vld [vmem:[#allocation13 + $0x8b8] sm:$0xff] }
 0x49a   :  { %4424 = vmatpush1.bf16.msra.mxu1 %v4423_v22  ;;  %4552 = vmatpush3.bf16.msra.mxu0 %v4551_v23  ;;  %v4565_v22 = vpack.c.bf16 %v2182_v11, %v2175_v8  ;;  %v2063_v23 = vld [vmem:[#allocation13 + $0x260] sm:$0xff]  ;;  %v2217_v8 = vld [vmem:[#allocation13 + $0x730] sm:$0xff]  ;;  %v2224_v11 = vld [vmem:[#allocation13 + $0x768] sm:$0xff] }
 0x49b   :  { %4426 = vmatprep.subr.bf16.mxu1 %v4425_v17  ;;  %4554 = vmatprep.subr.bf16.mxu0 %v4553_v31  ;;  %v2189_v17 = vld [vmem:[#allocation13 + $0x650] sm:$0xff]  ;;  %v2196_v31 = vld [vmem:[#allocation13 + $0x688] sm:$0xff] }
 0x49c   :  { %2638 = vmatmul.mubr.f32.gmra.mrb[28].mxu1 %v5581_v39  ;;  %2816 = vmatmul.mubr.f32.gmra.mrb[20].mxu0 %v5581_v39  ;;  %v4569_v20 = vpack.c.bf16 %v2196_v31, %v2189_v17  ;;  %v4581_v17 = vpack.c.bf16 %v2350_v18, %v2343_v13  ;;  %v2238_v31 = vld [vmem:[#allocation13 + $0x7d8] sm:$0xff]  ;;  %v2280_v18 = vld [vmem:[#allocation13 + $0x928] sm:$0xff] }
 0x49d   :  { %2643 = vmatprep.mubr.f32.mxu1 %v5585_v42  ;;  %2821 = vmatprep.mubr.f32.mxu0 %v5585_v42 }
 0x49e   :  { %4428 = vmatpush1.bf16.msra.mxu1 %v4427_v16  ;;  %4556 = vmatpush3.bf16.msra.mxu0 %v4555_v48  ;;  %v2090_v16 = vld [vmem:[#allocation13 + $0x338] sm:$0xff]  ;;  %v2097_v48 = vld [vmem:[#allocation13 + $0x370] sm:$0xff] }
 0x49f   :  { %4430 = vmatprep.subr.bf16.mxu1 %v4429_v43  ;;  %4558 = vmatprep.subr.bf16.mxu0 %v4557_v41  ;;  %v4443_v43 = vpack.c.bf16 %v2082_v36, %v2075_v10  ;;  %v4571_v41 = vpack.c.bf16 %v2084_v9, %v2077_v38  ;;  %v4445_v47 = vpack.c.bf16 %v2097_v48, %v2090_v16  ;;  %v2357_v10 = vld [vmem:[#allocation13 + $0xb90] sm:$0xff]  ;;  %v2364_v36 = vld [vmem:[#allocation13 + $0xbc8] sm:$0xff]  ;;  %v2131_v9 = vld [vmem:[#allocation13 + $0x480] sm:$0xff] }
 0x4a0   :  { %2644 = vmatmul.mubr.f32.gmra.mrb[30].mxu1 %v5591_v49  ;;  %2822 = vmatmul.mubr.f32.gmra.mrb[22].mxu0 %v5591_v49  ;;  %v2138_v16 = vld [vmem:[#allocation13 + $0x4b8] sm:$0xff]  ;;  %v2245_v48 = vld [vmem:[#allocation13 + $0x810] sm:$0xff]  ;;  %v4585_v61 = vpack.c.bf16 %v2364_v36, %v2357_v10 }
 0x4a1   :  { %2892 = vmatprep.mubr.f32.mxu1 %v5488_v19  ;;  %3070 = vmatprep.mubr.f32.mxu0 %v5488_v19  ;;  %v4567_v19 = vpack.c.bf16 %v2070_v24, %v2063_v23  ;;  %v2117_v24 = vld [vmem:[#allocation13 + $0x410] sm:$0xff]  ;;  %v2294_v36 = vld [vmem:[#allocation13 + $0x998] sm:$0xff] }
 0x4a2   :  { %4432 = vmatpush1.bf16.msra.mxu1 %v4431_v50  ;;  %4560 = vmatpush3.bf16.msra.mxu0 %v4559_v51  ;;  %v2104_v50 = vld [vmem:[#allocation13 + $0x3a8] sm:$0xff]  ;;  %v2111_v51 = vld [vmem:[#allocation13 + $0x3e0] sm:$0xff] }
 0x4a3   :  { %4434 = vmatprep.subr.bf16.mxu1 %v4433_v60  ;;  %4562 = vmatprep.subr.bf16.mxu0 %v4561_v62  ;;  %v4447_v60 = vpack.c.bf16 %v2096_v46, %v2089_v44  ;;  %v4575_v62 = vpack.c.bf16 %v2098_v32, %v2091_v28  ;;  %v4449_v0 = vpack.c.bf16 %v2111_v51, %v2104_v50  ;;  %v2371_v44 = vld [vmem:[#allocation13 + $0xc00] sm:$0xff]  ;;  %v2378_v46 = vld [vmem:[#allocation13 + $0xc38] sm:$0xff]  ;;  %v2145_v32 = vld [vmem:[#allocation13 + $0x4f0] sm:$0xff] }
 0x4a4   :  { %v2152_v50 = vld [vmem:[#allocation13 + $0x528] sm:$0xff]  ;;  %v2259_v51 = vld [vmem:[#allocation13 + $0x880] sm:$0xff]  ;;  %v4589_v14 = vpack.c.bf16 %v2378_v46, %v2371_v44 }
 0x4a5   :  { %v2308_v46 = vld [vmem:[#allocation13 + $0xa08] sm:$0xff] }
 0x4a6   :  { %4436 = vmatpush1.bf16.msra.mxu1 %v4435_v12  ;;  %4564 = vmatpush3.bf16.msra.mxu0 %v4563_v35  ;;  %v2118_v12 = vld [vmem:[#allocation13 + $0x418] sm:$0xff]  ;;  %v2125_v35 = vld [vmem:[#allocation13 + $0x450] sm:$0xff] }
 0x4a7   :  { %4438 = vmatprep.subr.bf16.mxu1 %v4437_v57  ;;  %4566 = vmatprep.subr.bf16.mxu0 %v4565_v22  ;;  %v4451_v57 = vpack.c.bf16 %v2110_v5, %v2103_v4  ;;  %v4579_v22 = vpack.c.bf16 %v2224_v11, %v2217_v8  ;;  %v4453_v23 = vpack.c.bf16 %v2125_v35, %v2118_v12  ;;  %v2159_v11 = vld [vmem:[#allocation13 + $0x560] sm:$0xff]  ;;  %v2166_v12 = vld [vmem:[#allocation13 + $0x598] sm:$0xff]  ;;  %v2273_v35 = vld [vmem:[#allocation13 + $0x8f0] sm:$0xff] }
 0x4a8   :  { %v4463_v4 = vpack.c.bf16 %v2152_v50, %v2145_v32  ;;  %v4591_v5 = vpack.c.bf16 %v2266_v45, %v2259_v51  ;;  %v2434_v32 = vld [vmem:[#allocation13 + $0xdf8] sm:$0xff]  ;;  %v2201_v45 = vld [vmem:[#allocation13 + $0x6b0] sm:$0xff] }
 0x4aa   :  { %4440 = vmatpush1.bf16.msra.mxu1 %v4439_v34  ;;  %4568 = vmatpush3.bf16.msra.mxu0 %v4567_v19  ;;  %v2132_v34 = vld [vmem:[#allocation13 + $0x488] sm:$0xff]  ;;  %v2139_v19 = vld [vmem:[#allocation13 + $0x4c0] sm:$0xff] }
 0x4ab   :  { %4442 = vmatprep.subr.bf16.mxu1 %v4441_v25  ;;  %4570 = vmatprep.subr.bf16.mxu0 %v4569_v20  ;;  %v4455_v25 = vpack.c.bf16 %v2124_v26, %v2117_v24  ;;  %v4583_v20 = vpack.c.bf16 %v2238_v31, %v2231_v29  ;;  %v4457_v38 = vpack.c.bf16 %v2139_v19, %v2132_v34  ;;  %v2406_v24 = vld [vmem:[#allocation13 + $0xd18] sm:$0xff]  ;;  %v2173_v31 = vld [vmem:[#allocation13 + $0x5d0] sm:$0xff]  ;;  %v2180_v34 = vld [vmem:[#allocation13 + $0x608] sm:$0xff] }
 0x4ac   :  { %v4467_v26 = vpack.c.bf16 %v2166_v12, %v2159_v11  ;;  %v4595_v29 = vpack.c.bf16 %v2280_v18, %v2273_v35  ;;  %v2287_v19 = vld [vmem:[#allocation13 + $0x960] sm:$0xff]  ;;  %v2230_v18 = vld [vmem:[#allocation13 + $0x798] sm:$0xff] }
 0x4ad   :  { %v2215_v35 = vld [vmem:[#allocation13 + $0x720] sm:$0xff] }
 0x4ae   :  { %4444 = vmatpush1.bf16.msra.mxu1 %v4443_v43  ;;  %4572 = vmatpush3.bf16.msra.mxu0 %v4571_v41  ;;  %v2146_v43 = vld [vmem:[#allocation13 + $0x4f8] sm:$0xff]  ;;  %v2153_v41 = vld [vmem:[#allocation13 + $0x530] sm:$0xff] }
 0x4af   :  { %4446 = vmatprep.subr.bf16.mxu1 %v4445_v47  ;;  %4574 = vmatprep.subr.bf16.mxu0 %v4573_v7  ;;  %v4459_v47 = vpack.c.bf16 %v2138_v16, %v2131_v9  ;;  %v4587_v7 = vpack.c.bf16 %v2252_v1, %v2245_v48  ;;  %v4461_v28 = vpack.c.bf16 %v2153_v41, %v2146_v43  ;;  %v2420_v9 = vld [vmem:[#allocation13 + $0xd88] sm:$0xff]  ;;  %v2187_v1 = vld [vmem:[#allocation13 + $0x640] sm:$0xff]  ;;  %v2194_v43 = vld [vmem:[#allocation13 + $0x678] sm:$0xff] }
 0x4b0   :  { %v4471_v16 = vpack.c.bf16 %v2180_v34, %v2173_v31  ;;  %v4599_v48 = vpack.c.bf16 %v2294_v36, %v2287_v19  ;;  %v2301_v41 = vld [vmem:[#allocation13 + $0x9d0] sm:$0xff]  ;;  %v4475_v50 = vpack.c.bf16 %v2194_v43, %v2187_v1  ;;  %v2243_v19 = vld [vmem:[#allocation13 + $0x800] sm:$0xff]  ;;  %v2258_v36 = vld [vmem:[#allocation13 + $0x878] sm:$0xff] }
 0x4b1   :  { %v4603_v51 = vpack.c.bf16 %v2308_v46, %v2301_v41  ;;  %v2286_v1 = vld [vmem:[#allocation13 + $0x958] sm:$0xff]  ;;  %v2293_v43 = vld [vmem:[#allocation13 + $0x990] sm:$0xff]  ;;  %v2300_v46 = vld [vmem:[#allocation13 + $0x9c8] sm:$0xff] }
 0x4b2   :  { %4448 = vmatpush1.bf16.msra.mxu1 %v4447_v60  ;;  %4576 = vmatpush3.bf16.msra.mxu0 %v4575_v62  ;;  %v2160_v60 = vld [vmem:[#allocation13 + $0x568] sm:$0xff]  ;;  %v2167_v62 = vld [vmem:[#allocation13 + $0x5a0] sm:$0xff]  ;;  %v2285_v41 = vld [vmem:[#allocation13 + $0x950] sm:$0xff] }
 0x4b3   :  { %4450 = vmatprep.subr.bf16.mxu1 %v4449_v0  ;;  %4578 = vmatprep.subr.bf16.mxu0 %v4577_v3  ;;  %v2385_v0 = vld [vmem:[#allocation13 + $0xc70] sm:$0xff]  ;;  %v2392_v3 = vld [vmem:[#allocation13 + $0xca8] sm:$0xff]  ;;  %v4465_v8 = vpack.c.bf16 %v2167_v62, %v2160_v60  ;;  %v2315_v62 = vld [vmem:[#allocation13 + $0xa40] sm:$0xff] }
 0x4b4   :  { %v4593_v13 = vpack.c.bf16 %v2392_v3, %v2385_v0  ;;  %v2208_v60 = vld [vmem:[#allocation13 + $0x6e8] sm:$0xff]  ;;  %v2322_v3 = vld [vmem:[#allocation13 + $0xa78] sm:$0xff] }
 0x4b5   :  { %3071 = vmatmul.mubr.f32.vlgmr.msra.gmra.mrb[24].mxu0 %v5490_v55  ;;  %v4607_v11 = vpack.c.bf16 %v2322_v3, %v2315_v62  ;;  %v2328_v62 = vld [vmem:[#allocation13 + $0xaa8] sm:$0xff] }
 0x4b6   :  { %4452 = vmatpush1.bf16.msra.mxu1 %v4451_v57  ;;  %3075 = vmatprep.mubr.f32.mxu0 %v5498_v37  ;;  %v2174_v57 = vld [vmem:[#allocation13 + $0x5d8] sm:$0xff] }
 0x4b7   :  { %4580 = vmatpush3.bf16.msra.mxu0 %v4579_v22  ;;  %4454 = vmatprep.subr.bf16.mxu1 %v4453_v23  ;;  %v2181_v22 = vld [vmem:[#allocation13 + $0x610] sm:$0xff]  ;;  %v2399_v23 = vld [vmem:[#allocation13 + $0xce0] sm:$0xff] }
 0x4b8   :  { %4582 = vmatprep.subr.bf16.mxu0 %v4581_v17  ;;  %v4469_v17 = vpack.c.bf16 %v2181_v22, %v2174_v57  ;;  %v4597_v10 = vpack.c.bf16 %v2406_v24, %v2399_v23  ;;  %v2237_v57 = vld [vmem:[#allocation13 + $0x7d0] sm:$0xff] }
 0x4b9   :  { %3076 = vmatmul.mubr.f32.gmra.mrb[26].mxu0 %v5500_v40  ;;  %v4485_v23 = vpack.c.bf16 %v2237_v57, %v2230_v18  ;;  %v2229_v24 = vld [vmem:[#allocation13 + $0x790] sm:$0xff]  ;;  %v2348_v57 = vld [vmem:[#allocation13 + $0xb48] sm:$0xff] }
 0x4ba   :  { %4456 = vmatpush1.bf16.msra.mxu1 %v4455_v25  ;;  %3080 = vmatprep.mubr.f32.mxu0 %v5508_v52  ;;  %v2188_v25 = vld [vmem:[#allocation13 + $0x648] sm:$0xff]  ;;  %v2341_v18 = vld [vmem:[#allocation13 + $0xb10] sm:$0xff] }
 0x4bb   :  { %4584 = vmatpush3.bf16.msra.mxu0 %v4583_v20  ;;  %4458 = vmatprep.subr.bf16.mxu1 %v4457_v38  ;;  %v2195_v20 = vld [vmem:[#allocation13 + $0x680] sm:$0xff]  ;;  %v2413_v38 = vld [vmem:[#allocation13 + $0xd50] sm:$0xff] }
 0x4bc   :  { %4586 = vmatprep.subr.bf16.mxu0 %v4585_v61  ;;  %v4473_v61 = vpack.c.bf16 %v2195_v20, %v2188_v25  ;;  %v4601_v44 = vpack.c.bf16 %v2420_v9, %v2413_v38  ;;  %v2265_v25 = vld [vmem:[#allocation13 + $0x8b0] sm:$0xff]  ;;  %v2264_v38 = vld [vmem:[#allocation13 + $0x8a8] sm:$0xff] }
 0x4bd   :  { %3081 = vmatmul.mubr.f32.gmra.mrb[28].mxu0 %v5510_v63  ;;  %v2257_v20 = vld [vmem:[#allocation13 + $0x870] sm:$0xff]  ;;  %v2272_v9 = vld [vmem:[#allocation13 + $0x8e8] sm:$0xff] }
 0x4be   :  { %4460 = vmatpush1.bf16.msra.mxu1 %v4459_v47  ;;  %3085 = vmatprep.mubr.f32.mxu0 %v5518_v58  ;;  %v2202_v47 = vld [vmem:[#allocation13 + $0x6b8] sm:$0xff] }
 0x4bf   :  { %4588 = vmatpush3.bf16.msra.mxu0 %v4587_v7  ;;  %4462 = vmatprep.subr.bf16.mxu1 %v4461_v28  ;;  %v2209_v7 = vld [vmem:[#allocation13 + $0x6f0] sm:$0xff]  ;;  %v2427_v28 = vld [vmem:[#allocation13 + $0xdc0] sm:$0xff] }
 0x4c0   :  { %4590 = vmatprep.subr.bf16.mxu0 %v4589_v14  ;;  %v4477_v14 = vpack.c.bf16 %v2209_v7, %v2202_v47  ;;  %v4605_v0 = vpack.c.bf16 %v2434_v32, %v2427_v28  ;;  %v2307_v47 = vld [vmem:[#allocation13 + $0xa00] sm:$0xff] }
 0x4c1   :  { %3086 = vmatmul.mubr.f32.gmra.mrb[30].mxu0 %v5520_v2  ;;  %v4505_v28 = vpack.c.bf16 %v2307_v47, %v2300_v46  ;;  %v2299_v32 = vld [vmem:[#allocation13 + $0x9c0] sm:$0xff]  ;;  %v2418_v47 = vld [vmem:[#allocation13 + $0xd78] sm:$0xff] }
 0x4c2   :  { %4464 = vmatpush1.bf16.msra.mxu1 %v4463_v4  ;;  %3155 = vmatprep.mubr.f32.mxu0 %v5533_v33  ;;  %v2216_v4 = vld [vmem:[#allocation13 + $0x728] sm:$0xff]  ;;  %v2411_v46 = vld [vmem:[#allocation13 + $0xd40] sm:$0xff] }
 0x4c3   :  { %4592 = vmatpush3.bf16.msra.mxu0 %v4591_v5  ;;  %4466 = vmatprep.subr.bf16.mxu1 %v4465_v8  ;;  %v2223_v5 = vld [vmem:[#allocation13 + $0x760] sm:$0xff]  ;;  %v4479_v8 = vpack.c.bf16 %v2208_v60, %v2201_v45  ;;  %v2313_v45 = vld [vmem:[#allocation13 + $0xa30] sm:$0xff]  ;;  %v2320_v60 = vld [vmem:[#allocation13 + $0xa68] sm:$0xff] }
 0x4c4   :  { %4594 = vmatprep.subr.bf16.mxu0 %v4593_v13  ;;  %v4481_v12 = vpack.c.bf16 %v2223_v5, %v2216_v4  ;;  %v2222_v13 = vld [vmem:[#allocation13 + $0x758] sm:$0xff]  ;;  %v4511_v3 = vpack.c.bf16 %v2320_v60, %v2313_v45  ;;  %v2327_v5 = vld [vmem:[#allocation13 + $0xaa0] sm:$0xff] }
 0x4c5   :  { %v4483_v22 = vpack.c.bf16 %v2222_v13, %v2215_v35 }
 0x4c6   :  { %4468 = vmatpush1.bf16.msra.mxu1 %v4467_v26  ;;  %v2236_v26 = vld [vmem:[#allocation13 + $0x7c8] sm:$0xff] }
 0x4c7   :  { %4596 = vmatpush3.bf16.msra.mxu0 %v4595_v29  ;;  %4470 = vmatprep.subr.bf16.mxu1 %v4469_v17  ;;  %v2244_v29 = vld [vmem:[#allocation13 + $0x808] sm:$0xff]  ;;  %v2251_v17 = vld [vmem:[#allocation13 + $0x840] sm:$0xff]  ;;  %v4487_v31 = vpack.c.bf16 %v2236_v26, %v2229_v24  ;;  %v4519_v24 = vpack.c.bf16 %v2348_v57, %v2341_v18 }
 0x4c8   :  { %4598 = vmatprep.subr.bf16.mxu0 %v4597_v10  ;;  %v4489_v34 = vpack.c.bf16 %v2251_v17, %v2244_v29  ;;  %v2250_v10 = vld [vmem:[#allocation13 + $0x838] sm:$0xff]  ;;  %v2355_v29 = vld [vmem:[#allocation13 + $0xb80] sm:$0xff] }
 0x4c9   :  { %v2362_v17 = vld [vmem:[#allocation13 + $0xbb8] sm:$0xff] }
 0x4ca   :  { %4472 = vmatpush1.bf16.msra.mxu1 %v4471_v16  ;;  %v2279_v16 = vld [vmem:[#allocation13 + $0x920] sm:$0xff] }
 0x4cb   :  { %4600 = vmatpush3.bf16.msra.mxu0 %v4599_v48  ;;  %4474 = vmatprep.subr.bf16.mxu1 %v4473_v61  ;;  %v2271_v48 = vld [vmem:[#allocation13 + $0x8e0] sm:$0xff]  ;;  %v2278_v61 = vld [vmem:[#allocation13 + $0x918] sm:$0xff] }
 0x4cc   :  { %4602 = vmatprep.subr.bf16.mxu0 %v4601_v44  ;;  %v2292_v44 = vld [vmem:[#allocation13 + $0x988] sm:$0xff] }
 0x4cd   :  { %v4503_v7 = vpack.c.bf16 %v2292_v44, %v2285_v41 }
 0x4ce   :  { %4476 = vmatpush1.bf16.msra.mxu1 %v4475_v50  ;;  %v2314_v50 = vld [vmem:[#allocation13 + $0xa38] sm:$0xff] }
 0x4cf   :  { %4604 = vmatpush3.bf16.msra.mxu0 %v4603_v51  ;;  %4478 = vmatprep.subr.bf16.mxu1 %v4477_v14  ;;  %v2321_v51 = vld [vmem:[#allocation13 + $0xa70] sm:$0xff] }
 0x4d0   :  { %4606 = vmatprep.subr.bf16.mxu0 %v4605_v0  ;;  %v2335_v0 = vld [vmem:[#allocation13 + $0xae0] sm:$0xff] }
 0x4d1   :  { %v4513_v4 = vpack.c.bf16 %v2335_v0, %v2328_v62 }
 0x4d2   :  { %4480 = vmatpush1.bf16.msra.mxu1 %v4479_v8  ;;  %v2334_v8 = vld [vmem:[#allocation13 + $0xad8] sm:$0xff] }
 0x4d3   :  { %4608 = vmatpush3.bf16.msra.mxu0 %v4607_v11  ;;  %4482 = vmatprep.subr.bf16.mxu1 %v4481_v12  ;;  %v2342_v11 = vld [vmem:[#allocation13 + $0xb18] sm:$0xff]  ;;  %v2349_v12 = vld [vmem:[#allocation13 + $0xb50] sm:$0xff]  ;;  %v4515_v35 = vpack.c.bf16 %v2334_v8, %v2327_v5 }
 0x4d4   :  { %v4517_v13 = vpack.c.bf16 %v2349_v12, %v2342_v11 }
 0x4d5   :  { %2893 = vmatmul.mubr.f32.vlgmr.msra.gmra.mrb[32].mxu1 %v5490_v55  ;;  %v4491_v55 = vpack.c.bf16 %v2250_v10, %v2243_v19  ;;  %v4523_v19 = vpack.c.bf16 %v2362_v17, %v2355_v29 }
 0x4d6   :  { %3156 = vmatmul.mubr.f32.vlgmr.msra.gmra.mrb[32].mxu0 %v5557_v59  ;;  %2898 = vmatprep.mubr.f32.mxu1 %v5498_v37  ;;  %v4493_v37 = vpack.c.bf16 %v2265_v25, %v2258_v36  ;;  %v2369_v36 = vld [vmem:[#allocation13 + $0xbf0] sm:$0xff]  ;;  %v2376_v25 = vld [vmem:[#allocation13 + $0xc28] sm:$0xff] }
 0x4d7   :  { %4484 = vmatpush1.bf16.msra.mxu1 %v4483_v22  ;;  %3160 = vmatprep.mubr.f32.mxu0 %v5561_v30  ;;  %v2356_v22 = vld [vmem:[#allocation13 + $0xb88] sm:$0xff] }
 0x4d8   :  { %4486 = vmatprep.subr.bf16.mxu1 %v4485_v23  ;;  %v2363_v23 = vld [vmem:[#allocation13 + $0xbc0] sm:$0xff] }
 0x4d9   :  { %2899 = vmatmul.mubr.f32.gmra.mrb[34].mxu1 %v5500_v40  ;;  %v4495_v40 = vpack.c.bf16 %v2264_v38, %v2257_v20  ;;  %v4521_v26 = vpack.c.bf16 %v2363_v23, %v2356_v22  ;;  %v4527_v20 = vpack.c.bf16 %v2376_v25, %v2369_v36 }
 0x4da   :  { %3161 = vmatmul.mubr.f32.gmra.mrb[34].mxu0 %v5569_v21  ;;  %2904 = vmatprep.mubr.f32.mxu1 %v5508_v52  ;;  %v4497_v52 = vpack.c.bf16 %v2279_v16, %v2272_v9  ;;  %v2383_v9 = vld [vmem:[#allocation13 + $0xc60] sm:$0xff]  ;;  %v2390_v16 = vld [vmem:[#allocation13 + $0xc98] sm:$0xff] }
 0x4db   :  { %4488 = vmatpush1.bf16.msra.mxu1 %v4487_v31  ;;  %3165 = vmatprep.mubr.f32.mxu0 %v5573_v27  ;;  %v2370_v31 = vld [vmem:[#allocation13 + $0xbf8] sm:$0xff] }
 0x4dc   :  { %4490 = vmatprep.subr.bf16.mxu1 %v4489_v34  ;;  %v2377_v34 = vld [vmem:[#allocation13 + $0xc30] sm:$0xff] }
 0x4dd   :  { %2905 = vmatmul.mubr.f32.gmra.mrb[36].mxu1 %v5510_v63  ;;  %v4499_v63 = vpack.c.bf16 %v2278_v61, %v2271_v48  ;;  %v4525_v10 = vpack.c.bf16 %v2377_v34, %v2370_v31  ;;  %v4531_v48 = vpack.c.bf16 %v2390_v16, %v2383_v9 }
 0x4de   :  { %3166 = vmatmul.mubr.f32.gmra.mrb[36].mxu0 %v5581_v39  ;;  %2910 = vmatprep.mubr.f32.mxu1 %v5518_v58  ;;  %v4501_v58 = vpack.c.bf16 %v2293_v43, %v2286_v1  ;;  %v2397_v1 = vld [vmem:[#allocation13 + $0xcd0] sm:$0xff]  ;;  %v2404_v43 = vld [vmem:[#allocation13 + $0xd08] sm:$0xff] }
 0x4df   :  { %4492 = vmatpush1.bf16.msra.mxu1 %v4491_v55  ;;  %3170 = vmatprep.mubr.f32.mxu0 %v5585_v42  ;;  %v2384_v55 = vld [vmem:[#allocation13 + $0xc68] sm:$0xff]  ;;  %v4535_v41 = vpack.c.bf16 %v2404_v43, %v2397_v1 }
 0x4e0   :  { %4494 = vmatprep.subr.bf16.mxu1 %v4493_v37  ;;  %v2391_v37 = vld [vmem:[#allocation13 + $0xca0] sm:$0xff] }
 0x4e1   :  { %2911 = vmatmul.mubr.f32.gmra.mrb[38].mxu1 %v5520_v2  ;;  %v2306_v2 = vld [vmem:[#allocation13 + $0x9f8] sm:$0xff]  ;;  %v4529_v38 = vpack.c.bf16 %v2391_v37, %v2384_v55 }
 0x4e2   :  { %3171 = vmatmul.mubr.f32.gmra.mrb[38].mxu0 %v5591_v49  ;;  %2981 = vmatprep.mubr.f32.mxu1 %v5533_v33  ;;  %v4507_v14 = vpack.c.bf16 %v2306_v2, %v2299_v32  ;;  %v4509_v33 = vpack.c.bf16 %v2321_v51, %v2314_v50  ;;  %v4539_v32 = vpack.c.bf16 %v2418_v47, %v2411_v46  ;;  %v2425_v50 = vld [vmem:[#allocation13 + $0xdb0] sm:$0xff]  ;;  %v2432_v51 = vld [vmem:[#allocation13 + $0xde8] sm:$0xff] }
 0x4e3   :  { %4496 = vmatpush1.bf16.msra.mxu1 %v4495_v40  ;;  %v2398_v40 = vld [vmem:[#allocation13 + $0xcd8] sm:$0xff] }
 0x4e4   :  { %4498 = vmatprep.subr.bf16.mxu1 %v4497_v52  ;;  %v2405_v52 = vld [vmem:[#allocation13 + $0xd10] sm:$0xff] }
 0x4e5   :  { %v4533_v61 = vpack.c.bf16 %v2405_v52, %v2398_v40 }
 0x4e7   :  { %4500 = vmatpush1.bf16.msra.mxu1 %v4499_v63  ;;  %v2412_v63 = vld [vmem:[#allocation13 + $0xd48] sm:$0xff] }
 0x4e8   :  { %4502 = vmatprep.subr.bf16.mxu1 %v4501_v58  ;;  %v2419_v58 = vld [vmem:[#allocation13 + $0xd80] sm:$0xff] }
 0x4e9   :  { %v4537_v44 = vpack.c.bf16 %v2419_v58, %v2412_v63 }
 0x4eb   :  { %4504 = vmatpush1.bf16.msra.mxu1 %v4503_v7  ;;  %v2426_v7 = vld [vmem:[#allocation13 + $0xdb8] sm:$0xff] }
 0x4ec   :  { %4506 = vmatprep.subr.bf16.mxu1 %v4505_v28  ;;  %v2433_v28 = vld [vmem:[#allocation13 + $0xdf0] sm:$0xff] }
 0x4ed   :  { %v4541_v2 = vpack.c.bf16 %v2433_v28, %v2426_v7 }
 0x4ef   :  { %4508 = vmatpush1.bf16.msra.mxu1 %v4507_v14  ;;  %v4543_v14 = vpack.c.bf16 %v2432_v51, %v2425_v50 }
 0x4f0   :  { %4510 = vmatprep.subr.bf16.mxu1 %v4509_v33  ;;  %v5627_v33 = vld [vmem:[#allocation14] sm:$0xff] }
 0x4f1   :  { %v2440_v45 = vrot.slane %v5627_v33, %v5367_v54 }
 0x4f3   :  { %4512 = vmatpush1.bf16.msra.mxu1 %v4511_v3 }
 0x4f4   :  { %4514 = vmatprep.subr.bf16.mxu1 %v4513_v4 }
 0x4f7   :  { %4516 = vmatpush1.bf16.msra.mxu1 %v4515_v35 }
 0x4f8   :  { %4518 = vmatprep.subr.bf16.mxu1 %v4517_v13 }
 0x4fb   :  { %4520 = vmatpush1.bf16.msra.mxu1 %v4519_v24 }
 0x4fc   :  { %4522 = vmatprep.subr.bf16.mxu1 %v4521_v26 }
 0x4ff   :  { %4524 = vmatpush1.bf16.msra.mxu1 %v4523_v19 }
 0x500   :  { %4526 = vmatprep.subr.bf16.mxu1 %v4525_v10 }
 0x503   :  { %4528 = vmatpush1.bf16.msra.mxu1 %v4527_v20 }
 0x504   :  { %4530 = vmatprep.subr.bf16.mxu1 %v4529_v38 }
 0x507   :  { %4532 = vmatpush1.bf16.msra.mxu1 %v4531_v48 }
 0x508   :  { %4534 = vmatprep.subr.bf16.mxu1 %v4533_v61 }
 0x50b   :  { %4536 = vmatpush1.bf16.msra.mxu1 %v4535_v41 }
 0x50c   :  { %4538 = vmatprep.subr.bf16.mxu1 %v4537_v44 }
 0x50f   :  { %4540 = vmatpush1.bf16.msra.mxu1 %v4539_v32 }
 0x510   :  { %4542 = vmatprep.subr.bf16.mxu1 %v4541_v2 }
 0x513   :  { %4544 = vmatpush1.bf16.msra.mxu1 %v4543_v14 }
 0x516   :  { %2982 = vmatmul.mubr.f32.vlgmr.msra.gmra.mrb[32].mxu1 %v5557_v59  ;;  %v5633_v59 = vrot.slane %v5627_v33, %v5401_v6 }
 0x517   :  { %2987 = vmatprep.mubr.f32.mxu1 %v5561_v30  ;;  %v5637_v30 = vrot.slane %v5627_v33, %v5372_v56 }
 0x51a   :  { %2988 = vmatmul.mubr.f32.gmra.mrb[34].mxu1 %v5569_v21  ;;  %v5641_v21 = vrot.slane %v5627_v33, %v5383_v15 }
 0x51b   :  { %2993 = vmatprep.mubr.f32.mxu1 %v5573_v27 }
 0x51e   :  { %2994 = vmatmul.mubr.f32.gmra.mrb[36].mxu1 %v5581_v39 }
 0x51f   :  { %2999 = vmatprep.mubr.f32.mxu1 %v5585_v42 }
 0x522   :  { %3000 = vmatmul.mubr.f32.gmra.mrb[38].mxu1 %v5591_v49 }
 0x567   :  { %v2627_v27 = vpop.f32.mrb[24].mxu1  ;;  %v2805_v39 = vpop.f32.mrb[16].mxu0 }
 0x568   :  { %v4633_v42 = vadd.f32 %v2627_v27, %v2440_v45  ;;  %v4641_v49 = vadd.f32 %v2805_v39, %v5633_v59  ;;  %v2629_v60 = vpop.f32.mrb[25].mxu1  ;;  %v2807_v62 = vpop.f32.mrb[17].mxu0 }
 0x569   :  { %v4634_v54 = vadd.f32 %v2629_v60, %v5637_v30  ;;  %v4642_v6 = vadd.f32 %v2807_v62, %v5641_v21 }
 0x56a   :  { %v3405_v0 = vmul.f32 -1.442695, %v4633_v42  ;;  %v3407_v3 = vmul.f32 -1.442695, %v4641_v49 }
 0x56b   :  { %v3406_v4 = vmul.f32 -1.442695, %v4634_v54  ;;  %v3408_v56 = vmul.f32 -1.442695, %v4642_v6  ;;  %v2633_v5 = vpop.f32.mrb[26].mxu1  ;;  %v2811_v8 = vpop.f32.mrb[18].mxu0 }
 0x56c   :  { %4761 = vpow2.f32 %v3405_v0  ;;  %v4635_v15 = vadd.f32 %v2633_v5, %v2440_v45  ;;  %v4643_v11 = vadd.f32 %v2811_v8, %v5633_v59  ;;  %v2635_v12 = vpop.f32.mrb[27].mxu1  ;;  %v2813_v35 = vpop.f32.mrb[19].mxu0 }
 0x56d   :  { %4763 = vpow2.f32 %v3407_v3  ;;  %v4636_v13 = vadd.f32 %v2635_v12, %v5637_v30  ;;  %v4644_v18 = vadd.f32 %v2813_v35, %v5641_v21 }
 0x56e   :  { %4765 = vpow2.f32 %v3406_v4  ;;  %v3412_v57 = vmul.f32 -1.442695, %v4635_v15  ;;  %v3414_v22 = vmul.f32 -1.442695, %v4643_v11 }
 0x56f   :  { %4767 = vpow2.f32 %v3408_v56  ;;  %v3413_v23 = vmul.f32 -1.442695, %v4636_v13  ;;  %v3415_v24 = vmul.f32 -1.442695, %v4644_v18  ;;  %v2639_v26 = vpop.f32.mrb[28].mxu1  ;;  %v2817_v29 = vpop.f32.mrb[20].mxu0 }
 0x570   :  { %4769 = vpow2.f32 %v3412_v57  ;;  %v4637_v17 = vadd.f32 %v2639_v26, %v2440_v45  ;;  %v4645_v31 = vadd.f32 %v2817_v29, %v5633_v59  ;;  %v2641_v34 = vpop.f32.mrb[29].mxu1  ;;  %v2819_v19 = vpop.f32.mrb[21].mxu0 }
 0x571   :  { %4771 = vpow2.f32 %v3414_v22  ;;  %v4638_v10 = vadd.f32 %v2641_v34, %v5637_v30  ;;  %v4646_v36 = vadd.f32 %v2819_v19, %v5641_v21 }
 0x572   :  { %4773 = vpow2.f32 %v3413_v23  ;;  %v3419_v25 = vmul.f32 -1.442695, %v4637_v17  ;;  %v3421_v55 = vmul.f32 -1.442695, %v4645_v31 }
 0x573   :  { %4775 = vpow2.f32 %v3415_v24  ;;  %v3420_v37 = vmul.f32 -1.442695, %v4638_v10  ;;  %v3422_v20 = vmul.f32 -1.442695, %v4646_v36  ;;  %v2645_v38 = vpop.f32.mrb[30].mxu1  ;;  %v2823_v9 = vpop.f32.mrb[22].mxu0 }
 0x574   :  { %4777 = vpow2.f32 %v3419_v25  ;;  %v4639_v16 = vadd.f32 %v2645_v38, %v2440_v45  ;;  %v2647_v40 = vpop.f32.mrb[31].mxu1  ;;  %v2825_v52 = vpop.f32.mrb[23].mxu0  ;;  %v4647_v27 = vadd.f32 %v2823_v9, %v5633_v59 }
 0x575   :  { %4779 = vpow2.f32 %v3421_v55  ;;  %v4640_v49 = vadd.f32 %v2647_v40, %v5637_v30  ;;  %v4648_v54 = vadd.f32 %v2825_v52, %v5641_v21 }
 0x576   :  { %v4762_v48 = vpop.eup %4761  ;;  %4781 = vpow2.f32 %v3420_v37  ;;  %v3426_v61 = vmul.f32 -1.442695, %v4639_v16  ;;  %v3428_v56 = vmul.f32 -1.442695, %v4647_v27 }
 0x577   :  { %v4764_v1 = vpop.eup %4763  ;;  %v3260_v43 = vadd.f32 1.0, %v4762_v48  ;;  %4783 = vpow2.f32 %v3422_v20  ;;  %v3427_v8 = vmul.f32 -1.442695, %v4640_v49  ;;  %v3429_v30 = vmul.f32 -1.442695, %v4648_v54 }
 0x578   :  { %v4766_v63 = vpop.eup %4765  ;;  %v3262_v58 = vadd.f32 1.0, %v4764_v1  ;;  %4785 = vpow2.f32 %v3426_v61 }
 0x579   :  { %v4768_v41 = vpop.eup %4767  ;;  %4787 = vrcp.f32 %v3260_v43  ;;  %v3261_v44 = vadd.f32 1.0, %v4766_v63 }
 0x57a   :  { %v4770_v46 = vpop.eup %4769  ;;  %4789 = vrcp.f32 %v3262_v58  ;;  %v3263_v47 = vadd.f32 1.0, %v4768_v41  ;;  %v2463_v58 = vsub.s32 6, %v5364_v53 }
 0x57b   :  { %v4772_v7 = vpop.eup %4771  ;;  %4791 = vrcp.f32 %v3261_v44  ;;  %v3267_v28 = vadd.f32 1.0, %v4770_v46 }
 0x57c   :  { %v4774_v32 = vpop.eup %4773  ;;  %4793 = vrcp.f32 %v3263_v47  ;;  %v3269_v2 = vadd.f32 1.0, %v4772_v7  ;;  %v2464_v41 = vrot.slane %v5627_v33, %v2463_v58 }
 0x57d   :  { %v4776_v50 = vpop.eup %4775  ;;  %4795 = vrcp.f32 %v3267_v28  ;;  %v3268_v51 = vadd.f32 1.0, %v4774_v32 }
 0x57e   :  { %v4778_v14 = vpop.eup %4777  ;;  %4797 = vrcp.f32 %v3269_v2  ;;  %v3270_v45 = vadd.f32 1.0, %v4776_v50 }
 0x57f   :  { %v4780_v39 = vpop.eup %4779  ;;  %4799 = vrcp.f32 %v3268_v51  ;;  %v3274_v42 = vadd.f32 1.0, %v4778_v14 }
 0x580   :  { %v4782_v60 = vpop.eup %4781  ;;  %4801 = vrcp.f32 %v3270_v45  ;;  %v3276_v62 = vadd.f32 1.0, %v4780_v39 }
 0x581   :  { %v4784_v6 = vpop.eup %4783  ;;  %4803 = vrcp.f32 %v3274_v42  ;;  %v3275_v0 = vadd.f32 1.0, %v4782_v60 }
 0x582   :  { %v4786_v3 = vpop.eup %4785  ;;  %4805 = vrcp.f32 %v3276_v62  ;;  %v3277_v4 = vadd.f32 1.0, %v4784_v6 }
 0x583   :  { %v4788_v5 = vpop.eup %4787  ;;  %4807 = vrcp.f32 %v3275_v0  ;;  %v3281_v59 = vadd.f32 1.0, %v4786_v3 }
 0x584   :  { %v4790_v15 = vpop.eup %4789  ;;  %3344 = vst [vmem:[#allocation16] sm:$0xff] %v4788_v5  ;;  %4809 = vrcp.f32 %v3277_v4 }
 0x585   :  { %v4792_v11 = vpop.eup %4791  ;;  %3346 = vst [vmem:[#allocation16 + $0x10] sm:$0xff] %v4790_v15  ;;  %4811 = vrcp.f32 %v3281_v59 }
 0x586   :  { %v4794_v12 = vpop.eup %4793  ;;  %3345 = vst [vmem:[#allocation16 + $0x8] sm:$0xff] %v4792_v11  ;;  %4813 = vpow2.f32 %v3428_v56 }
 0x587   :  { %v4796_v21 = vpop.eup %4795  ;;  %3347 = vst [vmem:[#allocation16 + $0x18] sm:$0xff] %v4794_v12  ;;  %4815 = vpow2.f32 %v3427_v8 }
 0x588   :  { %v4798_v35 = vpop.eup %4797  ;;  %3351 = vst [vmem:[#allocation16 + $0x38] sm:$0xff] %v4796_v21  ;;  %4817 = vpow2.f32 %v3429_v30  ;;  %v3465_v13 = vpop.f32.mrb[24].mxu0 }
 0x589   :  { %v4800_v18 = vpop.eup %4799  ;;  %3353 = vst [vmem:[#allocation16 + $0x48] sm:$0xff] %v4798_v35  ;;  %v3466_v57 = vpop.f32.mrb[25].mxu0 }
 0x58a   :  { %v4802_v22 = vpop.eup %4801  ;;  %3352 = vst [vmem:[#allocation16 + $0x40] sm:$0xff] %v4800_v18  ;;  %v3467_v23 = vadd.f32 %v3466_v57, %v3465_v13 }
 0x58b   :  { %v4804_v24 = vpop.eup %4803  ;;  %3354 = vst [vmem:[#allocation16 + $0x50] sm:$0xff] %v4802_v22 }
 0x58c   :  { %v4806_v26 = vpop.eup %4805  ;;  %3358 = vst [vmem:[#allocation16 + $0x70] sm:$0xff] %v4804_v24  ;;  %v3468_v29 = vpop.f32.mrb[26].mxu0  ;;  %v3073_v47 = vadd.f32 %v3467_v23, %v2464_v41  ;;  %v2455_v23 = vsub.s32 4, %v5364_v53  ;;  %v2459_v24 = vsub.s32 5, %v5364_v53 }
 0x58d   :  { %v4808_v17 = vpop.eup %4807  ;;  %3360 = vst [vmem:[#allocation16 + $0x80] sm:$0xff] %v4806_v26  ;;  %v3469_v31 = vpop.f32.mrb[27].mxu0 }
 0x58e   :  { %v4810_v34 = vpop.eup %4809  ;;  %3359 = vst [vmem:[#allocation16 + $0x78] sm:$0xff] %v4808_v17  ;;  %v3470_v19 = vadd.f32 %v3469_v31, %v3468_v29  ;;  %v2456_v26 = vrot.slane %v5627_v33, %v2455_v23  ;;  %v2460_v29 = vrot.slane %v5627_v33, %v2459_v24 }
 0x58f   :  { %v4812_v10 = vpop.eup %4811  ;;  %3361 = vst [vmem:[#allocation16 + $0x88] sm:$0xff] %v4810_v34 }
 0x590   :  { %v4814_v36 = vpop.eup %4813  ;;  %3365 = vst [vmem:[#allocation16 + $0xa8] sm:$0xff] %v4812_v10  ;;  %v3471_v25 = vpop.f32.mrb[28].mxu0  ;;  %v3078_v50 = vadd.f32 %v3470_v19, %v2464_v41 }
 0x591   :  { %v4816_v55 = vpop.eup %4815  ;;  %v3283_v37 = vadd.f32 1.0, %v4814_v36  ;;  %v3472_v20 = vpop.f32.mrb[29].mxu0 }
 0x592   :  { %v4818_v38 = vpop.eup %4817  ;;  %v3282_v9 = vadd.f32 1.0, %v4816_v55  ;;  %v3473_v16 = vadd.f32 %v3472_v20, %v3471_v25 }
 0x593   :  { %4819 = vrcp.f32 %v3283_v37  ;;  %v3284_v40 = vadd.f32 1.0, %v4818_v38 }
 0x594   :  { %4821 = vrcp.f32 %v3282_v9  ;;  %v3474_v52 = vpop.f32.mrb[30].mxu0  ;;  %v3083_v42 = vadd.f32 %v3473_v16, %v2464_v41 }
 0x595   :  { %4823 = vrcp.f32 %v3284_v40  ;;  %v3475_v48 = vpop.f32.mrb[31].mxu0 }
 0x596   :  { %v3476_v61 = vadd.f32 %v3475_v48, %v3474_v52 }
 0x598   :  { %v3088_v0 = vadd.f32 %v3476_v61, %v2464_v41 }
 0x59d   :  { %v4820_v1 = vpop.eup %4819 }
 0x59e   :  { %v4822_v43 = vpop.eup %4821  ;;  %3367 = vst [vmem:[#allocation16 + $0xb8] sm:$0xff] %v4820_v1 }
 0x59f   :  { %v4824_v63 = vpop.eup %4823  ;;  %3366 = vst [vmem:[#allocation16 + $0xb0] sm:$0xff] %v4822_v43 }
 0x5a0   :  { %3368 = vst [vmem:[#allocation16 + $0xc0] sm:$0xff] %v4824_v63 }
 0x5a9   :  { %v3509_v44 = vpop.f32.mrb[32].mxu0 }
 0x5aa   :  { %v3510_v46 = vpop.f32.mrb[33].mxu0 }
 0x5ab   :  { %v3511_v7 = vadd.f32 %v3510_v46, %v3509_v44 }
 0x5ad   :  { %v3158_v28 = vadd.f32 %v3511_v7, %v3073_v47  ;;  %v3512_v32 = vpop.f32.mrb[34].mxu0 }
 0x5ae   :  { %v3513_v2 = vpop.f32.mrb[35].mxu0 }
 0x5af   :  { %v3411_v51 = vmul.f32 -1.442695, %v3158_v28  ;;  %v3514_v14 = vadd.f32 %v3513_v2, %v3512_v32 }
 0x5b1   :  { %4825 = vpow2.f32 %v3411_v51  ;;  %v3163_v45 = vadd.f32 %v3514_v14, %v3078_v50  ;;  %v3515_v27 = vpop.f32.mrb[36].mxu0 }
 0x5b2   :  { %v3516_v39 = vpop.f32.mrb[37].mxu0 }
 0x5b3   :  { %v3418_v49 = vmul.f32 -1.442695, %v3163_v45  ;;  %v3517_v60 = vadd.f32 %v3516_v39, %v3515_v27 }
 0x5b5   :  { %4827 = vpow2.f32 %v3418_v49  ;;  %v3168_v62 = vadd.f32 %v3517_v60, %v3083_v42  ;;  %v3518_v54 = vpop.f32.mrb[38].mxu0 }
 0x5b6   :  { %v3519_v6 = vpop.f32.mrb[39].mxu0 }
 0x5b7   :  { %v3425_v3 = vmul.f32 -1.442695, %v3168_v62  ;;  %v3520_v4 = vadd.f32 %v3519_v6, %v3518_v54 }
 0x5b9   :  { %4829 = vpow2.f32 %v3425_v3  ;;  %v3173_v56 = vadd.f32 %v3520_v4, %v3088_v0 }
 0x5bb   :  { %v4826_v5 = vpop.eup %4825  ;;  %v3432_v59 = vmul.f32 -1.442695, %v3173_v56 }
 0x5bc   :  { %v3266_v8 = vadd.f32 1.0, %v4826_v5 }
 0x5bd   :  { %4831 = vpow2.f32 %v3432_v59 }
 0x5be   :  { %4833 = vrcp.f32 %v3266_v8 }
 0x5bf   :  { %v4828_v15 = vpop.eup %4827 }
 0x5c0   :  { %v3273_v30 = vadd.f32 1.0, %v4828_v15 }
 0x5c2   :  { %4835 = vrcp.f32 %v3273_v30 }
 0x5c3   :  { %v4830_v11 = vpop.eup %4829 }
 0x5c4   :  { %v3280_v12 = vadd.f32 1.0, %v4830_v11 }
 0x5c6   :  { %4837 = vrcp.f32 %v3280_v12 }
 0x5c7   :  { %v4832_v21 = vpop.eup %4831 }
 0x5c8   :  { %v4834_v35 = vpop.eup %4833  ;;  %v3287_v13 = vadd.f32 1.0, %v4832_v21 }
 0x5c9   :  { %3350 = vst [vmem:[#allocation16 + $0x30] sm:$0xff] %v4834_v35 }
 0x5ca   :  { %4839 = vrcp.f32 %v3287_v13 }
 0x5cc   :  { %v4836_v18 = vpop.eup %4835 }
 0x5cd   :  { %3357 = vst [vmem:[#allocation16 + $0x68] sm:$0xff] %v4836_v18 }
 0x5d0   :  { %v4838_v57 = vpop.eup %4837 }
 0x5d1   :  { %3364 = vst [vmem:[#allocation16 + $0xa0] sm:$0xff] %v4838_v57 }
 0x5d4   :  { %v4840_v22 = vpop.eup %4839 }
 0x5d5   :  { %3371 = vst [vmem:[#allocation16 + $0xd8] sm:$0xff] %v4840_v22 }
 0x5e9   :  { %v2983_v17 = vpop.f32.mrb[32].mxu1 }
 0x5ea   :  { %v4649_v31 = vadd.f32 %v2983_v17, %v2456_v26  ;;  %v2985_v34 = vpop.f32.mrb[33].mxu1 }
 0x5eb   :  { %v4650_v19 = vadd.f32 %v2985_v34, %v2460_v29 }
 0x5ec   :  { %v3409_v10 = vmul.f32 -1.442695, %v4649_v31 }
 0x5ed   :  { %v3410_v36 = vmul.f32 -1.442695, %v4650_v19  ;;  %v2989_v25 = vpop.f32.mrb[34].mxu1 }
 0x5ee   :  { %4841 = vpow2.f32 %v3409_v10  ;;  %v4651_v55 = vadd.f32 %v2989_v25, %v2456_v26  ;;  %v2991_v37 = vpop.f32.mrb[35].mxu1 }
 0x5ef   :  { %4843 = vpow2.f32 %v3410_v36  ;;  %v4652_v20 = vadd.f32 %v2991_v37, %v2460_v29 }
 0x5f0   :  { %v3416_v38 = vmul.f32 -1.442695, %v4651_v55 }
 0x5f1   :  { %v3417_v9 = vmul.f32 -1.442695, %v4652_v20  ;;  %v2995_v16 = vpop.f32.mrb[36].mxu1 }
 0x5f2   :  { %4845 = vpow2.f32 %v3416_v38  ;;  %v4653_v53 = vadd.f32 %v2995_v16, %v2456_v26  ;;  %v2997_v40 = vpop.f32.mrb[37].mxu1 }
 0x5f3   :  { %4847 = vpow2.f32 %v3417_v9  ;;  %v4654_v33 = vadd.f32 %v2997_v40, %v2460_v29 }
 0x5f4   :  { %v3423_v52 = vmul.f32 -1.442695, %v4653_v53 }
 0x5f5   :  { %v3424_v48 = vmul.f32 -1.442695, %v4654_v33  ;;  %v3001_v61 = vpop.f32.mrb[38].mxu1 }
 0x5f6   :  { %4849 = vpow2.f32 %v3423_v52  ;;  %v4655_v1 = vadd.f32 %v3001_v61, %v2456_v26  ;;  %v3003_v43 = vpop.f32.mrb[39].mxu1 }
 0x5f7   :  { %4851 = vpow2.f32 %v3424_v48  ;;  %v4656_v63 = vadd.f32 %v3003_v43, %v2460_v29 }
 0x5f8   :  { %v4842_v58 = vpop.eup %4841  ;;  %v3430_v41 = vmul.f32 -1.442695, %v4655_v1 }
 0x5f9   :  { %v4844_v44 = vpop.eup %4843  ;;  %v3264_v46 = vadd.f32 1.0, %v4842_v58  ;;  %v3431_v47 = vmul.f32 -1.442695, %v4656_v63 }
 0x5fa   :  { %v3265_v7 = vadd.f32 1.0, %v4844_v44  ;;  %4853 = vpow2.f32 %v3430_v41 }
 0x5fb   :  { %4855 = vrcp.f32 %v3264_v46 }
 0x5fc   :  { %v4846_v28 = vpop.eup %4845  ;;  %4857 = vrcp.f32 %v3265_v7 }
 0x5fd   :  { %v4848_v32 = vpop.eup %4847  ;;  %v3271_v2 = vadd.f32 1.0, %v4846_v28  ;;  %4859 = vpow2.f32 %v3431_v47 }
 0x5fe   :  { %v3272_v50 = vadd.f32 1.0, %v4848_v32 }
 0x5ff   :  { %4861 = vrcp.f32 %v3271_v2 }
 0x600   :  { %v4850_v51 = vpop.eup %4849  ;;  %4863 = vrcp.f32 %v3272_v50 }
 0x601   :  { %v4852_v14 = vpop.eup %4851  ;;  %v3278_v45 = vadd.f32 1.0, %v4850_v51 }
 0x602   :  { %v3279_v27 = vadd.f32 1.0, %v4852_v14 }
 0x603   :  { %4865 = vrcp.f32 %v3278_v45 }
 0x604   :  { %v4854_v39 = vpop.eup %4853  ;;  %4867 = vrcp.f32 %v3279_v27 }
 0x605   :  { %v4856_v42 = vpop.eup %4855  ;;  %v3285_v49 = vadd.f32 1.0, %v4854_v39 }
 0x606   :  { %v4858_v60 = vpop.eup %4857  ;;  %3348 = vst [vmem:[#allocation16 + $0x20] sm:$0xff] %v4856_v42 }
 0x607   :  { %v4860_v62 = vpop.eup %4859  ;;  %3349 = vst [vmem:[#allocation16 + $0x28] sm:$0xff] %v4858_v60  ;;  %4869 = vrcp.f32 %v3285_v49 }
 0x608   :  { %v3286_v54 = vadd.f32 1.0, %v4860_v62 }
 0x609   :  { %v4862_v6 = vpop.eup %4861 }
 0x60a   :  { %v4864_v0 = vpop.eup %4863  ;;  %3355 = vst [vmem:[#allocation16 + $0x58] sm:$0xff] %v4862_v6  ;;  %4871 = vrcp.f32 %v3286_v54 }
 0x60b   :  { %3356 = vst [vmem:[#allocation16 + $0x60] sm:$0xff] %v4864_v0 }
 0x60d   :  { %v4866_v3 = vpop.eup %4865 }
 0x60e   :  { %v4868_v4 = vpop.eup %4867  ;;  %3362 = vst [vmem:[#allocation16 + $0x90] sm:$0xff] %v4866_v3 }
 0x60f   :  { %3363 = vst [vmem:[#allocation16 + $0x98] sm:$0xff] %v4868_v4 }
 0x611   :  { %v4870_v56 = vpop.eup %4869 }
 0x612   :  { %3369 = vst [vmem:[#allocation16 + $0xc8] sm:$0xff] %v4870_v56 }
 0x614   :  { %v4872_v5 = vpop.eup %4871 }
 0x615   :  { %3370 = vst [vmem:[#allocation16 + $0xd0] sm:$0xff] %v4872_v5 }
 0x616   :  { %5060 = shalt.err (!%p5057_p12)
}
 0x617   :  { %s5061_s2 = scalar_lea.hbm %s5686_s10, 3584 }
 0x618   :  { %p5062_p13 = scmp.ne.s32.totalorder %s5686_s10, %s5061_s2  ;;  %p5065_p0 = scmp.lt.u32.totalorder %s5061_s2, %s5686_s10 }
 0x61a   :  { %p5067_p1 = pnand %p5065_p0, %p5062_p13 }
 0x61c   :  { %5070 = shalt.err (!%p5067_p1)
}
 0x61d   :  { %3391 = dma.vmem_to_hbm [thread:$0]  %s3386_s20, 3584, %s5686_s10, [#allocation4], %s5094_s6, %s5094_s6, %s5095_s7  }
 0x61e   :  { %5081 = dma.done.wait [#allocation4], 3584  }
 0x61f   :  { %5082 = vsyncadd [#allocation4], 4294963712 }
 0x620   :  { %3399 = vsyncpa [#allocation3], 1 }
 0x621   :  { %3400 = vsyncpa [#allocation6], 1 }
 0x622   :  { %3401 = vsyncpa [#allocation9], 1 }
 0x623   :  { %3402 = vsyncpa [#allocation12], 1 }
 0x624   :  { %3403 = vsyncpa [#allocation15], 1 }
 0x625   :  { %3404 = vsyncpa [#allocation4], 1 }

</bundles_post_ra>
